<compile_context>
chip_gen: v6e
topology: v6e:2x2x1
jax: 0.10.0
libtpu: 0.0.40
codegen_flags: <defaults>
</compile_context>

<pallas_src>
import math

import jax
import jax.numpy as jnp
from jax.experimental import pallas as pl
from jax.experimental.pallas import tpu as pltpu


# ---------------------------------------------------------------------------
# Single fused kernel: encoder bi-GRU + decoder GRU + attention + output head
# ---------------------------------------------------------------------------
def _simple_attention_kernel(xe_ref, xd_ref,
                             enc_wih_ref, enc_bih_ref, enc_whh_ref, enc_bhh_ref,
                             dec_wih_ref, dec_bih_ref, dec_whh_ref, dec_bhh_ref,
                             w_kv_ref, b_kv_ref, w_qa_ref, bq_ref,
                             watt_c_ref, batt_ref, wfc_ref, bfc_ref,
                             out_ref, enc_scr, dec_scr):
    # xe_ref: (S_enc, B, E) time-major encoder embeddings
    # xd_ref: (S_dec, B, E) time-major decoder embeddings
    # enc_wih: (E, 6H) [fwd r,z,n | bwd r,z,n];  enc_bih/enc_bhh: (1, 6H)
    # enc_whh: (2H, 6H) bf16 block-diag (rows 0:H -> fwd cols 0:3H, rows H:2H -> bwd cols 3H:6H)
    # dec_wih: (E, 3D);  dec_whh: (D, 3D) bf16;  dec_bih/dec_bhh: (1, 3D)
    # w_kv: (D, 2D) [W_K | W_V];  b_kv: (1, 2D)
    # w_qa: (D, 2D) [W_Q | W_att_dec-rows];  bq: (1, D)
    # watt_c: (D, D);  batt: (1, D);  wfc: (D, V);  bfc: (1, V)
    # out_ref: (B, S_dec, V);  enc_scr: (B, S_enc, D) f32;  dec_scr: (B, S_dec, D) f32
    S_enc, B, E = xe_ref.shape
    S_dec = xd_ref.shape[0]
    H = enc_whh_ref.shape[0] // 2
    D = 2 * H
    V = out_ref.shape[2]
    f32 = jnp.float32
    bf16 = jnp.bfloat16
    inv_scale = 1.0 / math.sqrt(float(D))          # Attention(hidden*2) -> sqrt(D)

    # ---- hoisted input projections (one matmul per GRU, off the serial chain) ----
    xe2d = xe_ref[...].reshape(S_enc * B, E)
    gi_e = (jnp.dot(xe2d, enc_wih_ref[...], preferred_element_type=f32)
            + enc_bih_ref[...]).reshape(S_enc, B, 6 * H)       # time-major gates

    xd2d = xd_ref[...].reshape(S_dec * B, E)
    gi_d = (jnp.dot(xd2d, dec_wih_ref[...], preferred_element_type=f32)
            + dec_bih_ref[...]).reshape(S_dec, B, 3 * D)       # time-major gates

    enc_whh = enc_whh_ref[...]                                  # (2H, 6H) bf16
    enc_bhh = enc_bhh_ref[...]                                  # (1, 6H)  f32
    dec_whh = dec_whh_ref[...]                                  # (D, 3D)  bf16
    dec_bhh = dec_bhh_ref[...]                                  # (1, 3D)  f32

    # ---- encoder: both directions in one unrolled recurrence (block-diag whh) ----
    h_f = jnp.zeros((B, H), f32)
    h_b = jnp.zeros((B, H), f32)
    for s in range(S_enc):                      # fwd processes t=s, bwd processes t=S-1-s
        h_both = jnp.concatenate([h_f, h_b], axis=-1)           # (B, 2H)
        gh = jnp.dot(h_both.astype(bf16), enc_whh,
                     preferred_element_type=f32) + enc_bhh       # (B, 6H) one MXU push
        gif = gi_e[s]                                            # fwd gate inputs @ t=s
        gib = gi_e[S_enc - 1 - s]                                # bwd gate inputs @ t=S-1-s
        # forward direction
        r_f = jax.nn.sigmoid(gif[:, 0:H] + gh[:, 0:H])
        z_f = jax.nn.sigmoid(gif[:, H:2 * H] + gh[:, H:2 * H])
        n_f = jnp.tanh(gif[:, 2 * H:3 * H] + r_f * gh[:, 2 * H:3 * H])
        h_f = (1.0 - z_f) * n_f + z_f * h_f
        # backward direction
        r_b = jax.nn.sigmoid(gib[:, 3 * H:4 * H] + gh[:, 3 * H:4 * H])
        z_b = jax.nn.sigmoid(gib[:, 4 * H:5 * H] + gh[:, 4 * H:5 * H])
        n_b = jnp.tanh(gib[:, 5 * H:6 * H] + r_b * gh[:, 5 * H:6 * H])
        h_b = (1.0 - z_b) * n_b + z_b * h_b
        # per-step stores into the attention K/V source (static indices, PyTorch layout)
        enc_scr[:, s, 0:H] = h_f
        enc_scr[:, S_enc - 1 - s, H:2 * H] = h_b

    # ---- decoder GRU: init hidden = CONCAT(fwd final, bwd final) ----
    h = jnp.concatenate([h_f, h_b], axis=-1)                     # (B, D)
    for t in range(S_dec):
        gh = jnp.dot(h.astype(bf16), dec_whh,
                     preferred_element_type=f32) + dec_bhh       # (B, 3D) one MXU push
        gi = gi_d[t]                                             # (B, 3D)
        r = jax.nn.sigmoid(gi[:, 0:D] + gh[:, 0:D])
        z = jax.nn.sigmoid(gi[:, D:2 * D] + gh[:, D:2 * D])
        n = jnp.tanh(gi[:, 2 * D:3 * D] + r * gh[:, 2 * D:3 * D])
        h = (1.0 - z) * n + z * h
        dec_scr[:, t, :] = h

    # ---- attention: Q/K/V projections (LHS-fused), scaled-dot softmax, context ----
    enc2d = enc_scr[...].reshape(B * S_enc, D)
    dec2d = dec_scr[...].reshape(B * S_dec, D)

    kv = jnp.dot(enc2d, w_kv_ref[...], preferred_element_type=f32) + b_kv_ref[...]
    k = kv[:, 0:D].reshape(B, S_enc, D)
    v = kv[:, D:2 * D].reshape(B, S_enc, D)

    qa = jnp.dot(dec2d, w_qa_ref[...], preferred_element_type=f32)
    q = (qa[:, 0:D] + bq_ref[...]).reshape(B, S_dec, D)
    a_dec = qa[:, D:2 * D]                                       # dec-rows of attention_fc

    s_att = jnp.einsum('bqd,bkd->bqk', q, k,
                       preferred_element_type=f32) * inv_scale
    s_att = s_att - jnp.max(s_att, axis=-1, keepdims=True)       # stable softmax
    p = jnp.exp(s_att)
    p = p / jnp.sum(p, axis=-1, keepdims=True)                   # exact division
    c = jnp.einsum('bqk,bkd->bqd', p, v,
                   preferred_element_type=f32)                   # (B, S_dec, D)

    # ---- output head: tanh(attention_fc(cat(c, dec))) @ fc ----
    # cat(c, dec) @ W_att == c @ W_att[:D] + dec @ W_att[D:]  (second term already in a_dec)
    c2d = c.reshape(B * S_dec, D)
    hmid = jnp.tanh(jnp.dot(c2d, watt_c_ref[...], preferred_element_type=f32)
                    + a_dec + batt_ref[...])
    logits = (jnp.dot(hmid, wfc_ref[...], preferred_element_type=f32)
              + bfc_ref[...])                                    # (B*S_dec, V)
    out_ref[...] = logits.reshape(B, S_dec, V)


def fused_forward(xe, xd, p):
    S_enc, B, _ = xe.shape
    S_dec = xd.shape[0]
    H = p["enc_whh"].shape[0] // 2
    D = 2 * H
    V = p["wfc"].shape[1]
    return pl.pallas_call(
        _simple_attention_kernel,
        out_shape=jax.ShapeDtypeStruct((B, S_dec, V), jnp.float32),
        scratch_shapes=[pltpu.VMEM((B, S_enc, D), jnp.float32),
                        pltpu.VMEM((B, S_dec, D), jnp.float32)],
    )(xe, xd,
      p["enc_wih"], p["enc_bih"], p["enc_whh"], p["enc_bhh"],
      p["dec_wih"], p["dec_bih"], p["dec_whh"], p["dec_bhh"],
      p["w_kv"], p["b_kv"], p["w_qa"], p["bq"],
      p["watt_c"], p["batt"], p["wfc"], p["bfc"])


# ---------------------------------------------------------------------------
# Full SimpleAttention forward (MergeMode.CONCAT, the module default)
# ---------------------------------------------------------------------------
@jax.jit
def simple_attention_forward(p, x_tokens, x_decode_tokens):
    # Embedding lookups are plain XLA gathers (glue); produced time-major (S, B, E) so
    # the kernel's per-step gate reads are leading-axis address offsets.
    xe = jnp.take(p["enc_emb"], x_tokens.T, axis=0)              # (S_enc, B, E)
    xd = jnp.take(p["dec_emb"], x_decode_tokens.T, axis=0)       # (S_dec, B, E)
    logits = fused_forward(xe, xd, p)                            # (B, S_dec, V)
    # PyTorch: output.permute(0, 2, 1) -> (B, vocab, S_dec)   (glue)
    return {"out": jnp.transpose(logits, (0, 2, 1))}


def init_params(key, vocab, emb, hidden):
    H = hidden
    D = 2 * hidden
    keys = iter(jax.random.split(key, 40))

    def w(shape, scale=0.1):
        return (scale * jax.random.normal(next(keys), shape)).astype(jnp.float32)

    # encoder bidirectional GRU, per-direction gate-combined (r,z,n) weights, (in, out) layout
    enc_wih_f, enc_wih_b = w((emb, 3 * H)), w((emb, 3 * H))
    enc_whh_f, enc_whh_b = w((H, 3 * H)), w((H, 3 * H))
    enc_bih_f, enc_bih_b = w((1, 3 * H)), w((1, 3 * H))
    enc_bhh_f, enc_bhh_b = w((1, 3 * H)), w((1, 3 * H))
    # decoder GRU (hidden = D)
    dec_wih, dec_whh = w((emb, 3 * D)), w((D, 3 * D))
    dec_bih, dec_bhh = w((1, 3 * D)), w((1, 3 * D))
    # attention (Linear weights already transposed to (in, out)) and heads
    wq, bq = w((D, D)), w((1, D))
    wk, bk = w((D, D)), w((1, D))
    wv, bv = w((D, D)), w((1, D))
    watt_c, watt_d, batt = w((D, D)), w((D, D)), w((1, D))      # attention_fc rows: [c | dec]
    wfc, bfc = w((D, vocab)), w((1, vocab))

    zero = jnp.zeros((H, 3 * H), jnp.float32)
    return dict(
        enc_emb=w((vocab, emb)),
        dec_emb=w((vocab, emb)),
        # encoder: input weights fused along N, hidden weights block-diagonal (bf16 for MXU)
        enc_wih=jnp.concatenate([enc_wih_f, enc_wih_b], axis=1),            # (E, 6H)
        enc_bih=jnp.concatenate([enc_bih_f, enc_bih_b], axis=1),            # (1, 6H)
        enc_whh=jnp.concatenate(
            [jnp.concatenate([enc_whh_f, zero], axis=1),
             jnp.concatenate([zero, enc_whh_b], axis=1)],
            axis=0).astype(jnp.bfloat16),                                   # (2H, 6H)
        enc_bhh=jnp.concatenate([enc_bhh_f, enc_bhh_b], axis=1),            # (1, 6H)
        # decoder GRU
        dec_wih=dec_wih, dec_bih=dec_bih,
        dec_whh=dec_whh.astype(jnp.bfloat16), dec_bhh=dec_bhh,
        # attention projections fused along N where they share an LHS
        w_kv=jnp.concatenate([wk, wv], axis=1),                             # (D, 2D)
        b_kv=jnp.concatenate([bk, bv], axis=1),                             # (1, 2D)
        w_qa=jnp.concatenate([wq, watt_d], axis=1),                         # (D, 2D)
        bq=bq,
        watt_c=watt_c, batt=batt,
        wfc=wfc, bfc=bfc,
    )


if __name__ == "__main__":
    vocab_size = 32
    embedding_dim = 16
    hidden_size = 16           # attention dim D = 2 * hidden = 32
    B, S_enc, S_dec = 2, 8, 8

    key = jax.random.PRNGKey(0)
    k_params, k_x, k_xd = jax.random.split(key, 3)

    params = init_params(k_params, vocab_size, embedding_dim, hidden_size)
    x = jax.random.randint(k_x, (B, S_enc), 0, vocab_size, dtype=jnp.int32)
    x_decode = jax.random.randint(k_xd, (B, S_dec), 0, vocab_size, dtype=jnp.int32)

    out = simple_attention_forward(params, x, x_decode)["out"]
    out = jax.block_until_ready(out)
    assert out.shape == (B, vocab_size, S_dec), out.shape
    assert bool(jnp.all(jnp.isfinite(out)))
    print("KERNEL_OK")
</pallas_src>

<mosaic_0001>
module attributes {stable_mosaic.version = 11 : i64} {
  func.func @_simple_attention_kernel(%arg0: memref<8x2x16xf32, #tpu.memory_space<vmem>>, %arg1: memref<8x2x16xf32, #tpu.memory_space<vmem>>, %arg2: memref<16x96xf32, #tpu.memory_space<vmem>>, %arg3: memref<1x96xf32, #tpu.memory_space<vmem>>, %arg4: memref<32x96xbf16, #tpu.memory_space<vmem>>, %arg5: memref<1x96xf32, #tpu.memory_space<vmem>>, %arg6: memref<16x96xf32, #tpu.memory_space<vmem>>, %arg7: memref<1x96xf32, #tpu.memory_space<vmem>>, %arg8: memref<32x96xbf16, #tpu.memory_space<vmem>>, %arg9: memref<1x96xf32, #tpu.memory_space<vmem>>, %arg10: memref<32x64xf32, #tpu.memory_space<vmem>>, %arg11: memref<1x64xf32, #tpu.memory_space<vmem>>, %arg12: memref<32x64xf32, #tpu.memory_space<vmem>>, %arg13: memref<1x32xf32, #tpu.memory_space<vmem>>, %arg14: memref<32x32xf32, #tpu.memory_space<vmem>>, %arg15: memref<1x32xf32, #tpu.memory_space<vmem>>, %arg16: memref<32x32xf32, #tpu.memory_space<vmem>>, %arg17: memref<1x32xf32, #tpu.memory_space<vmem>>, %arg18: memref<2x8x32xf32, #tpu.memory_space<vmem>>, %arg19: memref<2x8x32xf32, #tpu.memory_space<vmem>>, %arg20: memref<2x8x32xf32, #tpu.memory_space<vmem>>) attributes {dimension_semantics = [], scalar_prefetch = 0 : i64, scratch_operands = 2 : i64, tpu.core_type = #tpu.core_type<tc>} {
    %c0 = arith.constant 0 : index
    %c0_0 = arith.constant 0 : index
    %c0_1 = arith.constant 0 : index
    %0 = vector.load %arg0[%c0, %c0_0, %c0_1] : memref<8x2x16xf32, #tpu.memory_space<vmem>>, vector<8x2x16xf32>
    %1 = vector.shape_cast %0 : vector<8x2x16xf32> to vector<16x16xf32>
    %c0_2 = arith.constant 0 : index
    %c0_3 = arith.constant 0 : index
    %2 = vector.load %arg2[%c0_2, %c0_3] : memref<16x96xf32, #tpu.memory_space<vmem>>, vector<16x96xf32>
    %cst = arith.constant dense<0.000000e+00> : vector<16x96xf32>
    %3 = tpu.matmul %1, %2, %cst {dimension_numbers = #tpu.dot_dimension_numbers<[1], [0], [0], [1], [0, 0, 1, 1], [], []>} : vector<16x16xf32>, vector<16x96xf32>, vector<16x96xf32> -> vector<16x96xf32>
    %c0_4 = arith.constant 0 : index
    %c0_5 = arith.constant 0 : index
    %4 = vector.load %arg3[%c0_4, %c0_5] : memref<1x96xf32, #tpu.memory_space<vmem>>, vector<1x96xf32>
    %5 = vector.broadcast %4 : vector<1x96xf32> to vector<16x96xf32>
    %6 = arith.addf %3, %5 : vector<16x96xf32>
    %7 = vector.shape_cast %6 : vector<16x96xf32> to vector<8x2x96xf32>
    %c0_6 = arith.constant 0 : index
    %c0_7 = arith.constant 0 : index
    %c0_8 = arith.constant 0 : index
    %8 = vector.load %arg1[%c0_6, %c0_7, %c0_8] : memref<8x2x16xf32, #tpu.memory_space<vmem>>, vector<8x2x16xf32>
    %9 = vector.shape_cast %8 : vector<8x2x16xf32> to vector<16x16xf32>
    %c0_9 = arith.constant 0 : index
    %c0_10 = arith.constant 0 : index
    %10 = vector.load %arg6[%c0_9, %c0_10] : memref<16x96xf32, #tpu.memory_space<vmem>>, vector<16x96xf32>
    %cst_11 = arith.constant dense<0.000000e+00> : vector<16x96xf32>
    %11 = tpu.matmul %9, %10, %cst_11 {dimension_numbers = #tpu.dot_dimension_numbers<[1], [0], [0], [1], [0, 0, 1, 1], [], []>} : vector<16x16xf32>, vector<16x96xf32>, vector<16x96xf32> -> vector<16x96xf32>
    %c0_12 = arith.constant 0 : index
    %c0_13 = arith.constant 0 : index
    %12 = vector.load %arg7[%c0_12, %c0_13] : memref<1x96xf32, #tpu.memory_space<vmem>>, vector<1x96xf32>
    %13 = vector.broadcast %12 : vector<1x96xf32> to vector<16x96xf32>
    %14 = arith.addf %11, %13 : vector<16x96xf32>
    %15 = vector.shape_cast %14 : vector<16x96xf32> to vector<8x2x96xf32>
    %c0_14 = arith.constant 0 : index
    %c0_15 = arith.constant 0 : index
    %16 = vector.load %arg4[%c0_14, %c0_15] : memref<32x96xbf16, #tpu.memory_space<vmem>>, vector<32x96xbf16>
    %c0_16 = arith.constant 0 : index
    %c0_17 = arith.constant 0 : index
    %17 = vector.load %arg5[%c0_16, %c0_17] : memref<1x96xf32, #tpu.memory_space<vmem>>, vector<1x96xf32>
    %c0_18 = arith.constant 0 : index
    %c0_19 = arith.constant 0 : index
    %18 = vector.load %arg8[%c0_18, %c0_19] : memref<32x96xbf16, #tpu.memory_space<vmem>>, vector<32x96xbf16>
    %c0_20 = arith.constant 0 : index
    %c0_21 = arith.constant 0 : index
    %19 = vector.load %arg9[%c0_20, %c0_21] : memref<1x96xf32, #tpu.memory_space<vmem>>, vector<1x96xf32>
    %cst_22 = arith.constant 0.000000e+00 : f32
    %20 = vector.broadcast %cst_22 : f32 to vector<2x16xf32>
    %cst_23 = arith.constant 0.000000e+00 : f32
    %21 = vector.broadcast %cst_23 : f32 to vector<2x16xf32>
    %22 = tpu.concatenate %20, %21 in 1 : vector<2x16xf32>, vector<2x16xf32> -> vector<2x32xf32>
    %23 = arith.truncf %22 : vector<2x32xf32> to vector<2x32xbf16>
    %cst_24 = arith.constant dense<0.000000e+00> : vector<2x96xf32>
    %24 = tpu.matmul %23, %16, %cst_24 {dimension_numbers = #tpu.dot_dimension_numbers<[1], [0], [0], [1], [0, 0, 1, 1], [], []>} : vector<2x32xbf16>, vector<32x96xbf16>, vector<2x96xf32> -> vector<2x96xf32>
    %25 = vector.broadcast %17 : vector<1x96xf32> to vector<2x96xf32>
    %26 = arith.addf %24, %25 : vector<2x96xf32>
    %27 = vector.extract_strided_slice %7 {offsets = [0, 0, 0], sizes = [1, 2, 96], strides = [1, 1, 1]} : vector<8x2x96xf32> to vector<1x2x96xf32>
    %28 = vector.shape_cast %27 : vector<1x2x96xf32> to vector<2x96xf32>
    %29 = vector.extract_strided_slice %7 {offsets = [7, 0, 0], sizes = [1, 2, 96], strides = [1, 1, 1]} : vector<8x2x96xf32> to vector<1x2x96xf32>
    %30 = vector.shape_cast %29 : vector<1x2x96xf32> to vector<2x96xf32>
    %31 = vector.extract_strided_slice %28 {offsets = [0, 0], sizes = [2, 16], strides = [1, 1]} : vector<2x96xf32> to vector<2x16xf32>
    %32 = vector.extract_strided_slice %26 {offsets = [0, 0], sizes = [2, 16], strides = [1, 1]} : vector<2x96xf32> to vector<2x16xf32>
    %33 = arith.addf %31, %32 : vector<2x16xf32>
    %34 = arith.negf %33 : vector<2x16xf32>
    %35 = math.exp %34 : vector<2x16xf32>
    %cst_25 = arith.constant 1.000000e+00 : f32
    %36 = vector.broadcast %cst_25 : f32 to vector<2x16xf32>
    %37 = arith.addf %36, %35 : vector<2x16xf32>
    %38 = arith.divf %36, %37 : vector<2x16xf32>
    %39 = vector.extract_strided_slice %28 {offsets = [0, 16], sizes = [2, 16], strides = [1, 1]} : vector<2x96xf32> to vector<2x16xf32>
    %40 = vector.extract_strided_slice %26 {offsets = [0, 16], sizes = [2, 16], strides = [1, 1]} : vector<2x96xf32> to vector<2x16xf32>
    %41 = arith.addf %39, %40 : vector<2x16xf32>
    %42 = arith.negf %41 : vector<2x16xf32>
    %43 = math.exp %42 : vector<2x16xf32>
    %cst_26 = arith.constant 1.000000e+00 : f32
    %44 = vector.broadcast %cst_26 : f32 to vector<2x16xf32>
    %45 = arith.addf %44, %43 : vector<2x16xf32>
    %46 = arith.divf %44, %45 : vector<2x16xf32>
    %47 = vector.extract_strided_slice %28 {offsets = [0, 32], sizes = [2, 16], strides = [1, 1]} : vector<2x96xf32> to vector<2x16xf32>
    %48 = vector.extract_strided_slice %26 {offsets = [0, 32], sizes = [2, 16], strides = [1, 1]} : vector<2x96xf32> to vector<2x16xf32>
    %49 = arith.mulf %38, %48 : vector<2x16xf32>
    %50 = arith.addf %47, %49 : vector<2x16xf32>
    %51 = math.tanh %50 : vector<2x16xf32>
    %cst_27 = arith.constant 1.000000e+00 : f32
    %52 = vector.broadcast %cst_27 : f32 to vector<2x16xf32>
    %53 = arith.subf %52, %46 : vector<2x16xf32>
    %54 = arith.mulf %53, %51 : vector<2x16xf32>
    %55 = arith.mulf %46, %20 : vector<2x16xf32>
    %56 = arith.addf %54, %55 : vector<2x16xf32>
    %57 = vector.extract_strided_slice %30 {offsets = [0, 48], sizes = [2, 16], strides = [1, 1]} : vector<2x96xf32> to vector<2x16xf32>
    %58 = vector.extract_strided_slice %26 {offsets = [0, 48], sizes = [2, 16], strides = [1, 1]} : vector<2x96xf32> to vector<2x16xf32>
    %59 = arith.addf %57, %58 : vector<2x16xf32>
    %60 = arith.negf %59 : vector<2x16xf32>
    %61 = math.exp %60 : vector<2x16xf32>
    %cst_28 = arith.constant 1.000000e+00 : f32
    %62 = vector.broadcast %cst_28 : f32 to vector<2x16xf32>
    %63 = arith.addf %62, %61 : vector<2x16xf32>
    %64 = arith.divf %62, %63 : vector<2x16xf32>
    %65 = vector.extract_strided_slice %30 {offsets = [0, 64], sizes = [2, 16], strides = [1, 1]} : vector<2x96xf32> to vector<2x16xf32>
    %66 = vector.extract_strided_slice %26 {offsets = [0, 64], sizes = [2, 16], strides = [1, 1]} : vector<2x96xf32> to vector<2x16xf32>
    %67 = arith.addf %65, %66 : vector<2x16xf32>
    %68 = arith.negf %67 : vector<2x16xf32>
    %69 = math.exp %68 : vector<2x16xf32>
    %cst_29 = arith.constant 1.000000e+00 : f32
    %70 = vector.broadcast %cst_29 : f32 to vector<2x16xf32>
    %71 = arith.addf %70, %69 : vector<2x16xf32>
    %72 = arith.divf %70, %71 : vector<2x16xf32>
    %73 = vector.extract_strided_slice %30 {offsets = [0, 80], sizes = [2, 16], strides = [1, 1]} : vector<2x96xf32> to vector<2x16xf32>
    %74 = vector.extract_strided_slice %26 {offsets = [0, 80], sizes = [2, 16], strides = [1, 1]} : vector<2x96xf32> to vector<2x16xf32>
    %75 = arith.mulf %64, %74 : vector<2x16xf32>
    %76 = arith.addf %73, %75 : vector<2x16xf32>
    %77 = math.tanh %76 : vector<2x16xf32>
    %cst_30 = arith.constant 1.000000e+00 : f32
    %78 = vector.broadcast %cst_30 : f32 to vector<2x16xf32>
    %79 = arith.subf %78, %72 : vector<2x16xf32>
    %80 = arith.mulf %79, %77 : vector<2x16xf32>
    %81 = arith.mulf %72, %21 : vector<2x16xf32>
    %82 = arith.addf %80, %81 : vector<2x16xf32>
    %c0_31 = arith.constant 0 : index
    %c0_32 = arith.constant 0 : index
    %c0_33 = arith.constant 0 : index
    %83 = vector.load %arg19[%c0_31, %c0_32, %c0_33] : memref<2x8x32xf32, #tpu.memory_space<vmem>>, vector<2x1x16xf32>
    %84 = vector.shape_cast %83 : vector<2x1x16xf32> to vector<2x16xf32>
    %85 = vector.shape_cast %56 : vector<2x16xf32> to vector<2x1x16xf32>
    tpu.vector_store %arg19[%c0_31, %c0_32, %c0_33], %85 {strides = array<i32>} : memref<2x8x32xf32, #tpu.memory_space<vmem>>, vector<2x1x16xf32>,
    %c0_34 = arith.constant 0 : index
    %c7 = arith.constant 7 : index
    %c16 = arith.constant 16 : index
    %86 = vector.load %arg19[%c0_34, %c7, %c16] : memref<2x8x32xf32, #tpu.memory_space<vmem>>, vector<2x1x16xf32>
    %87 = vector.shape_cast %86 : vector<2x1x16xf32> to vector<2x16xf32>
    %88 = vector.shape_cast %82 : vector<2x16xf32> to vector<2x1x16xf32>
    tpu.vector_store %arg19[%c0_34, %c7, %c16], %88 {strides = array<i32>} : memref<2x8x32xf32, #tpu.memory_space<vmem>>, vector<2x1x16xf32>,
    %89 = tpu.concatenate %56, %82 in 1 : vector<2x16xf32>, vector<2x16xf32> -> vector<2x32xf32>
    %90 = arith.truncf %89 : vector<2x32xf32> to vector<2x32xbf16>
    %cst_35 = arith.constant dense<0.000000e+00> : vector<2x96xf32>
    %91 = tpu.matmul %90, %16, %cst_35 {dimension_numbers = #tpu.dot_dimension_numbers<[1], [0], [0], [1], [0, 0, 1, 1], [], []>} : vector<2x32xbf16>, vector<32x96xbf16>, vector<2x96xf32> -> vector<2x96xf32>
    %92 = vector.broadcast %17 : vector<1x96xf32> to vector<2x96xf32>
    %93 = arith.addf %91, %92 : vector<2x96xf32>
    %94 = vector.extract_strided_slice %7 {offsets = [1, 0, 0], sizes = [1, 2, 96], strides = [1, 1, 1]} : vector<8x2x96xf32> to vector<1x2x96xf32>
    %95 = vector.shape_cast %94 : vector<1x2x96xf32> to vector<2x96xf32>
    %96 = vector.extract_strided_slice %7 {offsets = [6, 0, 0], sizes = [1, 2, 96], strides = [1, 1, 1]} : vector<8x2x96xf32> to vector<1x2x96xf32>
    %97 = vector.shape_cast %96 : vector<1x2x96xf32> to vector<2x96xf32>
    %98 = vector.extract_strided_slice %95 {offsets = [0, 0], sizes = [2, 16], strides = [1, 1]} : vector<2x96xf32> to vector<2x16xf32>
    %99 = vector.extract_strided_slice %93 {offsets = [0, 0], sizes = [2, 16], strides = [1, 1]} : vector<2x96xf32> to vector<2x16xf32>
    %100 = arith.addf %98, %99 : vector<2x16xf32>
    %101 = arith.negf %100 : vector<2x16xf32>
    %102 = math.exp %101 : vector<2x16xf32>
    %cst_36 = arith.constant 1.000000e+00 : f32
    %103 = vector.broadcast %cst_36 : f32 to vector<2x16xf32>
    %104 = arith.addf %103, %102 : vector<2x16xf32>
    %105 = arith.divf %103, %104 : vector<2x16xf32>
    %106 = vector.extract_strided_slice %95 {offsets = [0, 16], sizes = [2, 16], strides = [1, 1]} : vector<2x96xf32> to vector<2x16xf32>
    %107 = vector.extract_strided_slice %93 {offsets = [0, 16], sizes = [2, 16], strides = [1, 1]} : vector<2x96xf32> to vector<2x16xf32>
    %108 = arith.addf %106, %107 : vector<2x16xf32>
    %109 = arith.negf %108 : vector<2x16xf32>
    %110 = math.exp %109 : vector<2x16xf32>
    %cst_37 = arith.constant 1.000000e+00 : f32
    %111 = vector.broadcast %cst_37 : f32 to vector<2x16xf32>
    %112 = arith.addf %111, %110 : vector<2x16xf32>
    %113 = arith.divf %111, %112 : vector<2x16xf32>
    %114 = vector.extract_strided_slice %95 {offsets = [0, 32], sizes = [2, 16], strides = [1, 1]} : vector<2x96xf32> to vector<2x16xf32>
    %115 = vector.extract_strided_slice %93 {offsets = [0, 32], sizes = [2, 16], strides = [1, 1]} : vector<2x96xf32> to vector<2x16xf32>
    %116 = arith.mulf %105, %115 : vector<2x16xf32>
    %117 = arith.addf %114, %116 : vector<2x16xf32>
    %118 = math.tanh %117 : vector<2x16xf32>
    %cst_38 = arith.constant 1.000000e+00 : f32
    %119 = vector.broadcast %cst_38 : f32 to vector<2x16xf32>
    %120 = arith.subf %119, %113 : vector<2x16xf32>
    %121 = arith.mulf %120, %118 : vector<2x16xf32>
    %122 = arith.mulf %113, %56 : vector<2x16xf32>
    %123 = arith.addf %121, %122 : vector<2x16xf32>
    %124 = vector.extract_strided_slice %97 {offsets = [0, 48], sizes = [2, 16], strides = [1, 1]} : vector<2x96xf32> to vector<2x16xf32>
    %125 = vector.extract_strided_slice %93 {offsets = [0, 48], sizes = [2, 16], strides = [1, 1]} : vector<2x96xf32> to vector<2x16xf32>
    %126 = arith.addf %124, %125 : vector<2x16xf32>
    %127 = arith.negf %126 : vector<2x16xf32>
    %128 = math.exp %127 : vector<2x16xf32>
    %cst_39 = arith.constant 1.000000e+00 : f32
    %129 = vector.broadcast %cst_39 : f32 to vector<2x16xf32>
    %130 = arith.addf %129, %128 : vector<2x16xf32>
    %131 = arith.divf %129, %130 : vector<2x16xf32>
    %132 = vector.extract_strided_slice %97 {offsets = [0, 64], sizes = [2, 16], strides = [1, 1]} : vector<2x96xf32> to vector<2x16xf32>
    %133 = vector.extract_strided_slice %93 {offsets = [0, 64], sizes = [2, 16], strides = [1, 1]} : vector<2x96xf32> to vector<2x16xf32>
    %134 = arith.addf %132, %133 : vector<2x16xf32>
    %135 = arith.negf %134 : vector<2x16xf32>
    %136 = math.exp %135 : vector<2x16xf32>
    %cst_40 = arith.constant 1.000000e+00 : f32
    %137 = vector.broadcast %cst_40 : f32 to vector<2x16xf32>
    %138 = arith.addf %137, %136 : vector<2x16xf32>
    %139 = arith.divf %137, %138 : vector<2x16xf32>
    %140 = vector.extract_strided_slice %97 {offsets = [0, 80], sizes = [2, 16], strides = [1, 1]} : vector<2x96xf32> to vector<2x16xf32>
    %141 = vector.extract_strided_slice %93 {offsets = [0, 80], sizes = [2, 16], strides = [1, 1]} : vector<2x96xf32> to vector<2x16xf32>
    %142 = arith.mulf %131, %141 : vector<2x16xf32>
    %143 = arith.addf %140, %142 : vector<2x16xf32>
    %144 = math.tanh %143 : vector<2x16xf32>
    %cst_41 = arith.constant 1.000000e+00 : f32
    %145 = vector.broadcast %cst_41 : f32 to vector<2x16xf32>
    %146 = arith.subf %145, %139 : vector<2x16xf32>
    %147 = arith.mulf %146, %144 : vector<2x16xf32>
    %148 = arith.mulf %139, %82 : vector<2x16xf32>
    %149 = arith.addf %147, %148 : vector<2x16xf32>
    %c0_42 = arith.constant 0 : index
    %c1 = arith.constant 1 : index
    %c0_43 = arith.constant 0 : index
    %150 = vector.load %arg19[%c0_42, %c1, %c0_43] : memref<2x8x32xf32, #tpu.memory_space<vmem>>, vector<2x1x16xf32>
    %151 = vector.shape_cast %150 : vector<2x1x16xf32> to vector<2x16xf32>
    %152 = vector.shape_cast %123 : vector<2x16xf32> to vector<2x1x16xf32>
    tpu.vector_store %arg19[%c0_42, %c1, %c0_43], %152 {strides = array<i32>} : memref<2x8x32xf32, #tpu.memory_space<vmem>>, vector<2x1x16xf32>,
    %c0_44 = arith.constant 0 : index
    %c6 = arith.constant 6 : index
    %c16_45 = arith.constant 16 : index
    %153 = vector.load %arg19[%c0_44, %c6, %c16_45] : memref<2x8x32xf32, #tpu.memory_space<vmem>>, vector<2x1x16xf32>
    %154 = vector.shape_cast %153 : vector<2x1x16xf32> to vector<2x16xf32>
    %155 = vector.shape_cast %149 : vector<2x16xf32> to vector<2x1x16xf32>
    tpu.vector_store %arg19[%c0_44, %c6, %c16_45], %155 {strides = array<i32>} : memref<2x8x32xf32, #tpu.memory_space<vmem>>, vector<2x1x16xf32>,
    %156 = tpu.concatenate %123, %149 in 1 : vector<2x16xf32>, vector<2x16xf32> -> vector<2x32xf32>
    %157 = arith.truncf %156 : vector<2x32xf32> to vector<2x32xbf16>
    %cst_46 = arith.constant dense<0.000000e+00> : vector<2x96xf32>
    %158 = tpu.matmul %157, %16, %cst_46 {dimension_numbers = #tpu.dot_dimension_numbers<[1], [0], [0], [1], [0, 0, 1, 1], [], []>} : vector<2x32xbf16>, vector<32x96xbf16>, vector<2x96xf32> -> vector<2x96xf32>
    %159 = vector.broadcast %17 : vector<1x96xf32> to vector<2x96xf32>
    %160 = arith.addf %158, %159 : vector<2x96xf32>
    %161 = vector.extract_strided_slice %7 {offsets = [2, 0, 0], sizes = [1, 2, 96], strides = [1, 1, 1]} : vector<8x2x96xf32> to vector<1x2x96xf32>
    %162 = vector.shape_cast %161 : vector<1x2x96xf32> to vector<2x96xf32>
    %163 = vector.extract_strided_slice %7 {offsets = [5, 0, 0], sizes = [1, 2, 96], strides = [1, 1, 1]} : vector<8x2x96xf32> to vector<1x2x96xf32>
    %164 = vector.shape_cast %163 : vector<1x2x96xf32> to vector<2x96xf32>
    %165 = vector.extract_strided_slice %162 {offsets = [0, 0], sizes = [2, 16], strides = [1, 1]} : vector<2x96xf32> to vector<2x16xf32>
    %166 = vector.extract_strided_slice %160 {offsets = [0, 0], sizes = [2, 16], strides = [1, 1]} : vector<2x96xf32> to vector<2x16xf32>
    %167 = arith.addf %165, %166 : vector<2x16xf32>
    %168 = arith.negf %167 : vector<2x16xf32>
    %169 = math.exp %168 : vector<2x16xf32>
    %cst_47 = arith.constant 1.000000e+00 : f32
    %170 = vector.broadcast %cst_47 : f32 to vector<2x16xf32>
    %171 = arith.addf %170, %169 : vector<2x16xf32>
    %172 = arith.divf %170, %171 : vector<2x16xf32>
    %173 = vector.extract_strided_slice %162 {offsets = [0, 16], sizes = [2, 16], strides = [1, 1]} : vector<2x96xf32> to vector<2x16xf32>
    %174 = vector.extract_strided_slice %160 {offsets = [0, 16], sizes = [2, 16], strides = [1, 1]} : vector<2x96xf32> to vector<2x16xf32>
    %175 = arith.addf %173, %174 : vector<2x16xf32>
    %176 = arith.negf %175 : vector<2x16xf32>
    %177 = math.exp %176 : vector<2x16xf32>
    %cst_48 = arith.constant 1.000000e+00 : f32
    %178 = vector.broadcast %cst_48 : f32 to vector<2x16xf32>
    %179 = arith.addf %178, %177 : vector<2x16xf32>
    %180 = arith.divf %178, %179 : vector<2x16xf32>
    %181 = vector.extract_strided_slice %162 {offsets = [0, 32], sizes = [2, 16], strides = [1, 1]} : vector<2x96xf32> to vector<2x16xf32>
    %182 = vector.extract_strided_slice %160 {offsets = [0, 32], sizes = [2, 16], strides = [1, 1]} : vector<2x96xf32> to vector<2x16xf32>
    %183 = arith.mulf %172, %182 : vector<2x16xf32>
    %184 = arith.addf %181, %183 : vector<2x16xf32>
    %185 = math.tanh %184 : vector<2x16xf32>
    %cst_49 = arith.constant 1.000000e+00 : f32
    %186 = vector.broadcast %cst_49 : f32 to vector<2x16xf32>
    %187 = arith.subf %186, %180 : vector<2x16xf32>
    %188 = arith.mulf %187, %185 : vector<2x16xf32>
    %189 = arith.mulf %180, %123 : vector<2x16xf32>
    %190 = arith.addf %188, %189 : vector<2x16xf32>
    %191 = vector.extract_strided_slice %164 {offsets = [0, 48], sizes = [2, 16], strides = [1, 1]} : vector<2x96xf32> to vector<2x16xf32>
    %192 = vector.extract_strided_slice %160 {offsets = [0, 48], sizes = [2, 16], strides = [1, 1]} : vector<2x96xf32> to vector<2x16xf32>
    %193 = arith.addf %191, %192 : vector<2x16xf32>
    %194 = arith.negf %193 : vector<2x16xf32>
    %195 = math.exp %194 : vector<2x16xf32>
    %cst_50 = arith.constant 1.000000e+00 : f32
    %196 = vector.broadcast %cst_50 : f32 to vector<2x16xf32>
    %197 = arith.addf %196, %195 : vector<2x16xf32>
    %198 = arith.divf %196, %197 : vector<2x16xf32>
    %199 = vector.extract_strided_slice %164 {offsets = [0, 64], sizes = [2, 16], strides = [1, 1]} : vector<2x96xf32> to vector<2x16xf32>
    %200 = vector.extract_strided_slice %160 {offsets = [0, 64], sizes = [2, 16], strides = [1, 1]} : vector<2x96xf32> to vector<2x16xf32>
    %201 = arith.addf %199, %200 : vector<2x16xf32>
    %202 = arith.negf %201 : vector<2x16xf32>
    %203 = math.exp %202 : vector<2x16xf32>
    %cst_51 = arith.constant 1.000000e+00 : f32
    %204 = vector.broadcast %cst_51 : f32 to vector<2x16xf32>
    %205 = arith.addf %204, %203 : vector<2x16xf32>
    %206 = arith.divf %204, %205 : vector<2x16xf32>
    %207 = vector.extract_strided_slice %164 {offsets = [0, 80], sizes = [2, 16], strides = [1, 1]} : vector<2x96xf32> to vector<2x16xf32>
    %208 = vector.extract_strided_slice %160 {offsets = [0, 80], sizes = [2, 16], strides = [1, 1]} : vector<2x96xf32> to vector<2x16xf32>
    %209 = arith.mulf %198, %208 : vector<2x16xf32>
    %210 = arith.addf %207, %209 : vector<2x16xf32>
    %211 = math.tanh %210 : vector<2x16xf32>
    %cst_52 = arith.constant 1.000000e+00 : f32
    %212 = vector.broadcast %cst_52 : f32 to vector<2x16xf32>
    %213 = arith.subf %212, %206 : vector<2x16xf32>
    %214 = arith.mulf %213, %211 : vector<2x16xf32>
    %215 = arith.mulf %206, %149 : vector<2x16xf32>
    %216 = arith.addf %214, %215 : vector<2x16xf32>
    %c0_53 = arith.constant 0 : index
    %c2 = arith.constant 2 : index
    %c0_54 = arith.constant 0 : index
    %217 = vector.load %arg19[%c0_53, %c2, %c0_54] : memref<2x8x32xf32, #tpu.memory_space<vmem>>, vector<2x1x16xf32>
    %218 = vector.shape_cast %217 : vector<2x1x16xf32> to vector<2x16xf32>
    %219 = vector.shape_cast %190 : vector<2x16xf32> to vector<2x1x16xf32>
    tpu.vector_store %arg19[%c0_53, %c2, %c0_54], %219 {strides = array<i32>} : memref<2x8x32xf32, #tpu.memory_space<vmem>>, vector<2x1x16xf32>,
    %c0_55 = arith.constant 0 : index
    %c5 = arith.constant 5 : index
    %c16_56 = arith.constant 16 : index
    %220 = vector.load %arg19[%c0_55, %c5, %c16_56] : memref<2x8x32xf32, #tpu.memory_space<vmem>>, vector<2x1x16xf32>
    %221 = vector.shape_cast %220 : vector<2x1x16xf32> to vector<2x16xf32>
    %222 = vector.shape_cast %216 : vector<2x16xf32> to vector<2x1x16xf32>
    tpu.vector_store %arg19[%c0_55, %c5, %c16_56], %222 {strides = array<i32>} : memref<2x8x32xf32, #tpu.memory_space<vmem>>, vector<2x1x16xf32>,
    %223 = tpu.concatenate %190, %216 in 1 : vector<2x16xf32>, vector<2x16xf32> -> vector<2x32xf32>
    %224 = arith.truncf %223 : vector<2x32xf32> to vector<2x32xbf16>
    %cst_57 = arith.constant dense<0.000000e+00> : vector<2x96xf32>
    %225 = tpu.matmul %224, %16, %cst_57 {dimension_numbers = #tpu.dot_dimension_numbers<[1], [0], [0], [1], [0, 0, 1, 1], [], []>} : vector<2x32xbf16>, vector<32x96xbf16>, vector<2x96xf32> -> vector<2x96xf32>
    %226 = vector.broadcast %17 : vector<1x96xf32> to vector<2x96xf32>
    %227 = arith.addf %225, %226 : vector<2x96xf32>
    %228 = vector.extract_strided_slice %7 {offsets = [3, 0, 0], sizes = [1, 2, 96], strides = [1, 1, 1]} : vector<8x2x96xf32> to vector<1x2x96xf32>
    %229 = vector.shape_cast %228 : vector<1x2x96xf32> to vector<2x96xf32>
    %230 = vector.extract_strided_slice %7 {offsets = [4, 0, 0], sizes = [1, 2, 96], strides = [1, 1, 1]} : vector<8x2x96xf32> to vector<1x2x96xf32>
    %231 = vector.shape_cast %230 : vector<1x2x96xf32> to vector<2x96xf32>
    %232 = vector.extract_strided_slice %229 {offsets = [0, 0], sizes = [2, 16], strides = [1, 1]} : vector<2x96xf32> to vector<2x16xf32>
    %233 = vector.extract_strided_slice %227 {offsets = [0, 0], sizes = [2, 16], strides = [1, 1]} : vector<2x96xf32> to vector<2x16xf32>
    %234 = arith.addf %232, %233 : vector<2x16xf32>
    %235 = arith.negf %234 : vector<2x16xf32>
    %236 = math.exp %235 : vector<2x16xf32>
    %cst_58 = arith.constant 1.000000e+00 : f32
    %237 = vector.broadcast %cst_58 : f32 to vector<2x16xf32>
    %238 = arith.addf %237, %236 : vector<2x16xf32>
    %239 = arith.divf %237, %238 : vector<2x16xf32>
    %240 = vector.extract_strided_slice %229 {offsets = [0, 16], sizes = [2, 16], strides = [1, 1]} : vector<2x96xf32> to vector<2x16xf32>
    %241 = vector.extract_strided_slice %227 {offsets = [0, 16], sizes = [2, 16], strides = [1, 1]} : vector<2x96xf32> to vector<2x16xf32>
    %242 = arith.addf %240, %241 : vector<2x16xf32>
    %243 = arith.negf %242 : vector<2x16xf32>
    %244 = math.exp %243 : vector<2x16xf32>
    %cst_59 = arith.constant 1.000000e+00 : f32
    %245 = vector.broadcast %cst_59 : f32 to vector<2x16xf32>
    %246 = arith.addf %245, %244 : vector<2x16xf32>
    %247 = arith.divf %245, %246 : vector<2x16xf32>
    %248 = vector.extract_strided_slice %229 {offsets = [0, 32], sizes = [2, 16], strides = [1, 1]} : vector<2x96xf32> to vector<2x16xf32>
    %249 = vector.extract_strided_slice %227 {offsets = [0, 32], sizes = [2, 16], strides = [1, 1]} : vector<2x96xf32> to vector<2x16xf32>
    %250 = arith.mulf %239, %249 : vector<2x16xf32>
    %251 = arith.addf %248, %250 : vector<2x16xf32>
    %252 = math.tanh %251 : vector<2x16xf32>
    %cst_60 = arith.constant 1.000000e+00 : f32
    %253 = vector.broadcast %cst_60 : f32 to vector<2x16xf32>
    %254 = arith.subf %253, %247 : vector<2x16xf32>
    %255 = arith.mulf %254, %252 : vector<2x16xf32>
    %256 = arith.mulf %247, %190 : vector<2x16xf32>
    %257 = arith.addf %255, %256 : vector<2x16xf32>
    %258 = vector.extract_strided_slice %231 {offsets = [0, 48], sizes = [2, 16], strides = [1, 1]} : vector<2x96xf32> to vector<2x16xf32>
    %259 = vector.extract_strided_slice %227 {offsets = [0, 48], sizes = [2, 16], strides = [1, 1]} : vector<2x96xf32> to vector<2x16xf32>
    %260 = arith.addf %258, %259 : vector<2x16xf32>
    %261 = arith.negf %260 : vector<2x16xf32>
    %262 = math.exp %261 : vector<2x16xf32>
    %cst_61 = arith.constant 1.000000e+00 : f32
    %263 = vector.broadcast %cst_61 : f32 to vector<2x16xf32>
    %264 = arith.addf %263, %262 : vector<2x16xf32>
    %265 = arith.divf %263, %264 : vector<2x16xf32>
    %266 = vector.extract_strided_slice %231 {offsets = [0, 64], sizes = [2, 16], strides = [1, 1]} : vector<2x96xf32> to vector<2x16xf32>
    %267 = vector.extract_strided_slice %227 {offsets = [0, 64], sizes = [2, 16], strides = [1, 1]} : vector<2x96xf32> to vector<2x16xf32>
    %268 = arith.addf %266, %267 : vector<2x16xf32>
    %269 = arith.negf %268 : vector<2x16xf32>
    %270 = math.exp %269 : vector<2x16xf32>
    %cst_62 = arith.constant 1.000000e+00 : f32
    %271 = vector.broadcast %cst_62 : f32 to vector<2x16xf32>
    %272 = arith.addf %271, %270 : vector<2x16xf32>
    %273 = arith.divf %271, %272 : vector<2x16xf32>
    %274 = vector.extract_strided_slice %231 {offsets = [0, 80], sizes = [2, 16], strides = [1, 1]} : vector<2x96xf32> to vector<2x16xf32>
    %275 = vector.extract_strided_slice %227 {offsets = [0, 80], sizes = [2, 16], strides = [1, 1]} : vector<2x96xf32> to vector<2x16xf32>
    %276 = arith.mulf %265, %275 : vector<2x16xf32>
    %277 = arith.addf %274, %276 : vector<2x16xf32>
    %278 = math.tanh %277 : vector<2x16xf32>
    %cst_63 = arith.constant 1.000000e+00 : f32
    %279 = vector.broadcast %cst_63 : f32 to vector<2x16xf32>
    %280 = arith.subf %279, %273 : vector<2x16xf32>
    %281 = arith.mulf %280, %278 : vector<2x16xf32>
    %282 = arith.mulf %273, %216 : vector<2x16xf32>
    %283 = arith.addf %281, %282 : vector<2x16xf32>
    %c0_64 = arith.constant 0 : index
    %c3 = arith.constant 3 : index
    %c0_65 = arith.constant 0 : index
    %284 = vector.load %arg19[%c0_64, %c3, %c0_65] : memref<2x8x32xf32, #tpu.memory_space<vmem>>, vector<2x1x16xf32>
    %285 = vector.shape_cast %284 : vector<2x1x16xf32> to vector<2x16xf32>
    %286 = vector.shape_cast %257 : vector<2x16xf32> to vector<2x1x16xf32>
    tpu.vector_store %arg19[%c0_64, %c3, %c0_65], %286 {strides = array<i32>} : memref<2x8x32xf32, #tpu.memory_space<vmem>>, vector<2x1x16xf32>,
    %c0_66 = arith.constant 0 : index
    %c4 = arith.constant 4 : index
    %c16_67 = arith.constant 16 : index
    %287 = vector.load %arg19[%c0_66, %c4, %c16_67] : memref<2x8x32xf32, #tpu.memory_space<vmem>>, vector<2x1x16xf32>
    %288 = vector.shape_cast %287 : vector<2x1x16xf32> to vector<2x16xf32>
    %289 = vector.shape_cast %283 : vector<2x16xf32> to vector<2x1x16xf32>
    tpu.vector_store %arg19[%c0_66, %c4, %c16_67], %289 {strides = array<i32>} : memref<2x8x32xf32, #tpu.memory_space<vmem>>, vector<2x1x16xf32>,
    %290 = tpu.concatenate %257, %283 in 1 : vector<2x16xf32>, vector<2x16xf32> -> vector<2x32xf32>
    %291 = arith.truncf %290 : vector<2x32xf32> to vector<2x32xbf16>
    %cst_68 = arith.constant dense<0.000000e+00> : vector<2x96xf32>
    %292 = tpu.matmul %291, %16, %cst_68 {dimension_numbers = #tpu.dot_dimension_numbers<[1], [0], [0], [1], [0, 0, 1, 1], [], []>} : vector<2x32xbf16>, vector<32x96xbf16>, vector<2x96xf32> -> vector<2x96xf32>
    %293 = vector.broadcast %17 : vector<1x96xf32> to vector<2x96xf32>
    %294 = arith.addf %292, %293 : vector<2x96xf32>
    %295 = vector.extract_strided_slice %7 {offsets = [4, 0, 0], sizes = [1, 2, 96], strides = [1, 1, 1]} : vector<8x2x96xf32> to vector<1x2x96xf32>
    %296 = vector.shape_cast %295 : vector<1x2x96xf32> to vector<2x96xf32>
    %297 = vector.extract_strided_slice %7 {offsets = [3, 0, 0], sizes = [1, 2, 96], strides = [1, 1, 1]} : vector<8x2x96xf32> to vector<1x2x96xf32>
    %298 = vector.shape_cast %297 : vector<1x2x96xf32> to vector<2x96xf32>
    %299 = vector.extract_strided_slice %296 {offsets = [0, 0], sizes = [2, 16], strides = [1, 1]} : vector<2x96xf32> to vector<2x16xf32>
    %300 = vector.extract_strided_slice %294 {offsets = [0, 0], sizes = [2, 16], strides = [1, 1]} : vector<2x96xf32> to vector<2x16xf32>
    %301 = arith.addf %299, %300 : vector<2x16xf32>
    %302 = arith.negf %301 : vector<2x16xf32>
    %303 = math.exp %302 : vector<2x16xf32>
    %cst_69 = arith.constant 1.000000e+00 : f32
    %304 = vector.broadcast %cst_69 : f32 to vector<2x16xf32>
    %305 = arith.addf %304, %303 : vector<2x16xf32>
    %306 = arith.divf %304, %305 : vector<2x16xf32>
    %307 = vector.extract_strided_slice %296 {offsets = [0, 16], sizes = [2, 16], strides = [1, 1]} : vector<2x96xf32> to vector<2x16xf32>
    %308 = vector.extract_strided_slice %294 {offsets = [0, 16], sizes = [2, 16], strides = [1, 1]} : vector<2x96xf32> to vector<2x16xf32>
    %309 = arith.addf %307, %308 : vector<2x16xf32>
    %310 = arith.negf %309 : vector<2x16xf32>
    %311 = math.exp %310 : vector<2x16xf32>
    %cst_70 = arith.constant 1.000000e+00 : f32
    %312 = vector.broadcast %cst_70 : f32 to vector<2x16xf32>
    %313 = arith.addf %312, %311 : vector<2x16xf32>
    %314 = arith.divf %312, %313 : vector<2x16xf32>
    %315 = vector.extract_strided_slice %296 {offsets = [0, 32], sizes = [2, 16], strides = [1, 1]} : vector<2x96xf32> to vector<2x16xf32>
    %316 = vector.extract_strided_slice %294 {offsets = [0, 32], sizes = [2, 16], strides = [1, 1]} : vector<2x96xf32> to vector<2x16xf32>
    %317 = arith.mulf %306, %316 : vector<2x16xf32>
    %318 = arith.addf %315, %317 : vector<2x16xf32>
    %319 = math.tanh %318 : vector<2x16xf32>
    %cst_71 = arith.constant 1.000000e+00 : f32
    %320 = vector.broadcast %cst_71 : f32 to vector<2x16xf32>
    %321 = arith.subf %320, %314 : vector<2x16xf32>
    %322 = arith.mulf %321, %319 : vector<2x16xf32>
    %323 = arith.mulf %314, %257 : vector<2x16xf32>
    %324 = arith.addf %322, %323 : vector<2x16xf32>
    %325 = vector.extract_strided_slice %298 {offsets = [0, 48], sizes = [2, 16], strides = [1, 1]} : vector<2x96xf32> to vector<2x16xf32>
    %326 = vector.extract_strided_slice %294 {offsets = [0, 48], sizes = [2, 16], strides = [1, 1]} : vector<2x96xf32> to vector<2x16xf32>
    %327 = arith.addf %325, %326 : vector<2x16xf32>
    %328 = arith.negf %327 : vector<2x16xf32>
    %329 = math.exp %328 : vector<2x16xf32>
    %cst_72 = arith.constant 1.000000e+00 : f32
    %330 = vector.broadcast %cst_72 : f32 to vector<2x16xf32>
    %331 = arith.addf %330, %329 : vector<2x16xf32>
    %332 = arith.divf %330, %331 : vector<2x16xf32>
    %333 = vector.extract_strided_slice %298 {offsets = [0, 64], sizes = [2, 16], strides = [1, 1]} : vector<2x96xf32> to vector<2x16xf32>
    %334 = vector.extract_strided_slice %294 {offsets = [0, 64], sizes = [2, 16], strides = [1, 1]} : vector<2x96xf32> to vector<2x16xf32>
    %335 = arith.addf %333, %334 : vector<2x16xf32>
    %336 = arith.negf %335 : vector<2x16xf32>
    %337 = math.exp %336 : vector<2x16xf32>
    %cst_73 = arith.constant 1.000000e+00 : f32
    %338 = vector.broadcast %cst_73 : f32 to vector<2x16xf32>
    %339 = arith.addf %338, %337 : vector<2x16xf32>
    %340 = arith.divf %338, %339 : vector<2x16xf32>
    %341 = vector.extract_strided_slice %298 {offsets = [0, 80], sizes = [2, 16], strides = [1, 1]} : vector<2x96xf32> to vector<2x16xf32>
    %342 = vector.extract_strided_slice %294 {offsets = [0, 80], sizes = [2, 16], strides = [1, 1]} : vector<2x96xf32> to vector<2x16xf32>
    %343 = arith.mulf %332, %342 : vector<2x16xf32>
    %344 = arith.addf %341, %343 : vector<2x16xf32>
    %345 = math.tanh %344 : vector<2x16xf32>
    %cst_74 = arith.constant 1.000000e+00 : f32
    %346 = vector.broadcast %cst_74 : f32 to vector<2x16xf32>
    %347 = arith.subf %346, %340 : vector<2x16xf32>
    %348 = arith.mulf %347, %345 : vector<2x16xf32>
    %349 = arith.mulf %340, %283 : vector<2x16xf32>
    %350 = arith.addf %348, %349 : vector<2x16xf32>
    %c0_75 = arith.constant 0 : index
    %c4_76 = arith.constant 4 : index
    %c0_77 = arith.constant 0 : index
    %351 = vector.load %arg19[%c0_75, %c4_76, %c0_77] : memref<2x8x32xf32, #tpu.memory_space<vmem>>, vector<2x1x16xf32>
    %352 = vector.shape_cast %351 : vector<2x1x16xf32> to vector<2x16xf32>
    %353 = vector.shape_cast %324 : vector<2x16xf32> to vector<2x1x16xf32>
    tpu.vector_store %arg19[%c0_75, %c4_76, %c0_77], %353 {strides = array<i32>} : memref<2x8x32xf32, #tpu.memory_space<vmem>>, vector<2x1x16xf32>,
    %c0_78 = arith.constant 0 : index
    %c3_79 = arith.constant 3 : index
    %c16_80 = arith.constant 16 : index
    %354 = vector.load %arg19[%c0_78, %c3_79, %c16_80] : memref<2x8x32xf32, #tpu.memory_space<vmem>>, vector<2x1x16xf32>
    %355 = vector.shape_cast %354 : vector<2x1x16xf32> to vector<2x16xf32>
    %356 = vector.shape_cast %350 : vector<2x16xf32> to vector<2x1x16xf32>
    tpu.vector_store %arg19[%c0_78, %c3_79, %c16_80], %356 {strides = array<i32>} : memref<2x8x32xf32, #tpu.memory_space<vmem>>, vector<2x1x16xf32>,
    %357 = tpu.concatenate %324, %350 in 1 : vector<2x16xf32>, vector<2x16xf32> -> vector<2x32xf32>
    %358 = arith.truncf %357 : vector<2x32xf32> to vector<2x32xbf16>
    %cst_81 = arith.constant dense<0.000000e+00> : vector<2x96xf32>
    %359 = tpu.matmul %358, %16, %cst_81 {dimension_numbers = #tpu.dot_dimension_numbers<[1], [0], [0], [1], [0, 0, 1, 1], [], []>} : vector<2x32xbf16>, vector<32x96xbf16>, vector<2x96xf32> -> vector<2x96xf32>
    %360 = vector.broadcast %17 : vector<1x96xf32> to vector<2x96xf32>
    %361 = arith.addf %359, %360 : vector<2x96xf32>
    %362 = vector.extract_strided_slice %7 {offsets = [5, 0, 0], sizes = [1, 2, 96], strides = [1, 1, 1]} : vector<8x2x96xf32> to vector<1x2x96xf32>
    %363 = vector.shape_cast %362 : vector<1x2x96xf32> to vector<2x96xf32>
    %364 = vector.extract_strided_slice %7 {offsets = [2, 0, 0], sizes = [1, 2, 96], strides = [1, 1, 1]} : vector<8x2x96xf32> to vector<1x2x96xf32>
    %365 = vector.shape_cast %364 : vector<1x2x96xf32> to vector<2x96xf32>
    %366 = vector.extract_strided_slice %363 {offsets = [0, 0], sizes = [2, 16], strides = [1, 1]} : vector<2x96xf32> to vector<2x16xf32>
    %367 = vector.extract_strided_slice %361 {offsets = [0, 0], sizes = [2, 16], strides = [1, 1]} : vector<2x96xf32> to vector<2x16xf32>
    %368 = arith.addf %366, %367 : vector<2x16xf32>
    %369 = arith.negf %368 : vector<2x16xf32>
    %370 = math.exp %369 : vector<2x16xf32>
    %cst_82 = arith.constant 1.000000e+00 : f32
    %371 = vector.broadcast %cst_82 : f32 to vector<2x16xf32>
    %372 = arith.addf %371, %370 : vector<2x16xf32>
    %373 = arith.divf %371, %372 : vector<2x16xf32>
    %374 = vector.extract_strided_slice %363 {offsets = [0, 16], sizes = [2, 16], strides = [1, 1]} : vector<2x96xf32> to vector<2x16xf32>
    %375 = vector.extract_strided_slice %361 {offsets = [0, 16], sizes = [2, 16], strides = [1, 1]} : vector<2x96xf32> to vector<2x16xf32>
    %376 = arith.addf %374, %375 : vector<2x16xf32>
    %377 = arith.negf %376 : vector<2x16xf32>
    %378 = math.exp %377 : vector<2x16xf32>
    %cst_83 = arith.constant 1.000000e+00 : f32
    %379 = vector.broadcast %cst_83 : f32 to vector<2x16xf32>
    %380 = arith.addf %379, %378 : vector<2x16xf32>
    %381 = arith.divf %379, %380 : vector<2x16xf32>
    %382 = vector.extract_strided_slice %363 {offsets = [0, 32], sizes = [2, 16], strides = [1, 1]} : vector<2x96xf32> to vector<2x16xf32>
    %383 = vector.extract_strided_slice %361 {offsets = [0, 32], sizes = [2, 16], strides = [1, 1]} : vector<2x96xf32> to vector<2x16xf32>
    %384 = arith.mulf %373, %383 : vector<2x16xf32>
    %385 = arith.addf %382, %384 : vector<2x16xf32>
    %386 = math.tanh %385 : vector<2x16xf32>
    %cst_84 = arith.constant 1.000000e+00 : f32
    %387 = vector.broadcast %cst_84 : f32 to vector<2x16xf32>
    %388 = arith.subf %387, %381 : vector<2x16xf32>
    %389 = arith.mulf %388, %386 : vector<2x16xf32>
    %390 = arith.mulf %381, %324 : vector<2x16xf32>
    %391 = arith.addf %389, %390 : vector<2x16xf32>
    %392 = vector.extract_strided_slice %365 {offsets = [0, 48], sizes = [2, 16], strides = [1, 1]} : vector<2x96xf32> to vector<2x16xf32>
    %393 = vector.extract_strided_slice %361 {offsets = [0, 48], sizes = [2, 16], strides = [1, 1]} : vector<2x96xf32> to vector<2x16xf32>
    %394 = arith.addf %392, %393 : vector<2x16xf32>
    %395 = arith.negf %394 : vector<2x16xf32>
    %396 = math.exp %395 : vector<2x16xf32>
    %cst_85 = arith.constant 1.000000e+00 : f32
    %397 = vector.broadcast %cst_85 : f32 to vector<2x16xf32>
    %398 = arith.addf %397, %396 : vector<2x16xf32>
    %399 = arith.divf %397, %398 : vector<2x16xf32>
    %400 = vector.extract_strided_slice %365 {offsets = [0, 64], sizes = [2, 16], strides = [1, 1]} : vector<2x96xf32> to vector<2x16xf32>
    %401 = vector.extract_strided_slice %361 {offsets = [0, 64], sizes = [2, 16], strides = [1, 1]} : vector<2x96xf32> to vector<2x16xf32>
    %402 = arith.addf %400, %401 : vector<2x16xf32>
    %403 = arith.negf %402 : vector<2x16xf32>
    %404 = math.exp %403 : vector<2x16xf32>
    %cst_86 = arith.constant 1.000000e+00 : f32
    %405 = vector.broadcast %cst_86 : f32 to vector<2x16xf32>
    %406 = arith.addf %405, %404 : vector<2x16xf32>
    %407 = arith.divf %405, %406 : vector<2x16xf32>
    %408 = vector.extract_strided_slice %365 {offsets = [0, 80], sizes = [2, 16], strides = [1, 1]} : vector<2x96xf32> to vector<2x16xf32>
    %409 = vector.extract_strided_slice %361 {offsets = [0, 80], sizes = [2, 16], strides = [1, 1]} : vector<2x96xf32> to vector<2x16xf32>
    %410 = arith.mulf %399, %409 : vector<2x16xf32>
    %411 = arith.addf %408, %410 : vector<2x16xf32>
    %412 = math.tanh %411 : vector<2x16xf32>
    %cst_87 = arith.constant 1.000000e+00 : f32
    %413 = vector.broadcast %cst_87 : f32 to vector<2x16xf32>
    %414 = arith.subf %413, %407 : vector<2x16xf32>
    %415 = arith.mulf %414, %412 : vector<2x16xf32>
    %416 = arith.mulf %407, %350 : vector<2x16xf32>
    %417 = arith.addf %415, %416 : vector<2x16xf32>
    %c0_88 = arith.constant 0 : index
    %c5_89 = arith.constant 5 : index
    %c0_90 = arith.constant 0 : index
    %418 = vector.load %arg19[%c0_88, %c5_89, %c0_90] : memref<2x8x32xf32, #tpu.memory_space<vmem>>, vector<2x1x16xf32>
    %419 = vector.shape_cast %418 : vector<2x1x16xf32> to vector<2x16xf32>
    %420 = vector.shape_cast %391 : vector<2x16xf32> to vector<2x1x16xf32>
    tpu.vector_store %arg19[%c0_88, %c5_89, %c0_90], %420 {strides = array<i32>} : memref<2x8x32xf32, #tpu.memory_space<vmem>>, vector<2x1x16xf32>,
    %c0_91 = arith.constant 0 : index
    %c2_92 = arith.constant 2 : index
    %c16_93 = arith.constant 16 : index
    %421 = vector.load %arg19[%c0_91, %c2_92, %c16_93] : memref<2x8x32xf32, #tpu.memory_space<vmem>>, vector<2x1x16xf32>
    %422 = vector.shape_cast %421 : vector<2x1x16xf32> to vector<2x16xf32>
    %423 = vector.shape_cast %417 : vector<2x16xf32> to vector<2x1x16xf32>
    tpu.vector_store %arg19[%c0_91, %c2_92, %c16_93], %423 {strides = array<i32>} : memref<2x8x32xf32, #tpu.memory_space<vmem>>, vector<2x1x16xf32>,
    %424 = tpu.concatenate %391, %417 in 1 : vector<2x16xf32>, vector<2x16xf32> -> vector<2x32xf32>
    %425 = arith.truncf %424 : vector<2x32xf32> to vector<2x32xbf16>
    %cst_94 = arith.constant dense<0.000000e+00> : vector<2x96xf32>
    %426 = tpu.matmul %425, %16, %cst_94 {dimension_numbers = #tpu.dot_dimension_numbers<[1], [0], [0], [1], [0, 0, 1, 1], [], []>} : vector<2x32xbf16>, vector<32x96xbf16>, vector<2x96xf32> -> vector<2x96xf32>
    %427 = vector.broadcast %17 : vector<1x96xf32> to vector<2x96xf32>
    %428 = arith.addf %426, %427 : vector<2x96xf32>
    %429 = vector.extract_strided_slice %7 {offsets = [6, 0, 0], sizes = [1, 2, 96], strides = [1, 1, 1]} : vector<8x2x96xf32> to vector<1x2x96xf32>
    %430 = vector.shape_cast %429 : vector<1x2x96xf32> to vector<2x96xf32>
    %431 = vector.extract_strided_slice %7 {offsets = [1, 0, 0], sizes = [1, 2, 96], strides = [1, 1, 1]} : vector<8x2x96xf32> to vector<1x2x96xf32>
    %432 = vector.shape_cast %431 : vector<1x2x96xf32> to vector<2x96xf32>
    %433 = vector.extract_strided_slice %430 {offsets = [0, 0], sizes = [2, 16], strides = [1, 1]} : vector<2x96xf32> to vector<2x16xf32>
    %434 = vector.extract_strided_slice %428 {offsets = [0, 0], sizes = [2, 16], strides = [1, 1]} : vector<2x96xf32> to vector<2x16xf32>
    %435 = arith.addf %433, %434 : vector<2x16xf32>
    %436 = arith.negf %435 : vector<2x16xf32>
    %437 = math.exp %436 : vector<2x16xf32>
    %cst_95 = arith.constant 1.000000e+00 : f32
    %438 = vector.broadcast %cst_95 : f32 to vector<2x16xf32>
    %439 = arith.addf %438, %437 : vector<2x16xf32>
    %440 = arith.divf %438, %439 : vector<2x16xf32>
    %441 = vector.extract_strided_slice %430 {offsets = [0, 16], sizes = [2, 16], strides = [1, 1]} : vector<2x96xf32> to vector<2x16xf32>
    %442 = vector.extract_strided_slice %428 {offsets = [0, 16], sizes = [2, 16], strides = [1, 1]} : vector<2x96xf32> to vector<2x16xf32>
    %443 = arith.addf %441, %442 : vector<2x16xf32>
    %444 = arith.negf %443 : vector<2x16xf32>
    %445 = math.exp %444 : vector<2x16xf32>
    %cst_96 = arith.constant 1.000000e+00 : f32
    %446 = vector.broadcast %cst_96 : f32 to vector<2x16xf32>
    %447 = arith.addf %446, %445 : vector<2x16xf32>
    %448 = arith.divf %446, %447 : vector<2x16xf32>
    %449 = vector.extract_strided_slice %430 {offsets = [0, 32], sizes = [2, 16], strides = [1, 1]} : vector<2x96xf32> to vector<2x16xf32>
    %450 = vector.extract_strided_slice %428 {offsets = [0, 32], sizes = [2, 16], strides = [1, 1]} : vector<2x96xf32> to vector<2x16xf32>
    %451 = arith.mulf %440, %450 : vector<2x16xf32>
    %452 = arith.addf %449, %451 : vector<2x16xf32>
    %453 = math.tanh %452 : vector<2x16xf32>
    %cst_97 = arith.constant 1.000000e+00 : f32
    %454 = vector.broadcast %cst_97 : f32 to vector<2x16xf32>
    %455 = arith.subf %454, %448 : vector<2x16xf32>
    %456 = arith.mulf %455, %453 : vector<2x16xf32>
    %457 = arith.mulf %448, %391 : vector<2x16xf32>
    %458 = arith.addf %456, %457 : vector<2x16xf32>
    %459 = vector.extract_strided_slice %432 {offsets = [0, 48], sizes = [2, 16], strides = [1, 1]} : vector<2x96xf32> to vector<2x16xf32>
    %460 = vector.extract_strided_slice %428 {offsets = [0, 48], sizes = [2, 16], strides = [1, 1]} : vector<2x96xf32> to vector<2x16xf32>
    %461 = arith.addf %459, %460 : vector<2x16xf32>
    %462 = arith.negf %461 : vector<2x16xf32>
    %463 = math.exp %462 : vector<2x16xf32>
    %cst_98 = arith.constant 1.000000e+00 : f32
    %464 = vector.broadcast %cst_98 : f32 to vector<2x16xf32>
    %465 = arith.addf %464, %463 : vector<2x16xf32>
    %466 = arith.divf %464, %465 : vector<2x16xf32>
    %467 = vector.extract_strided_slice %432 {offsets = [0, 64], sizes = [2, 16], strides = [1, 1]} : vector<2x96xf32> to vector<2x16xf32>
    %468 = vector.extract_strided_slice %428 {offsets = [0, 64], sizes = [2, 16], strides = [1, 1]} : vector<2x96xf32> to vector<2x16xf32>
    %469 = arith.addf %467, %468 : vector<2x16xf32>
    %470 = arith.negf %469 : vector<2x16xf32>
    %471 = math.exp %470 : vector<2x16xf32>
    %cst_99 = arith.constant 1.000000e+00 : f32
    %472 = vector.broadcast %cst_99 : f32 to vector<2x16xf32>
    %473 = arith.addf %472, %471 : vector<2x16xf32>
    %474 = arith.divf %472, %473 : vector<2x16xf32>
    %475 = vector.extract_strided_slice %432 {offsets = [0, 80], sizes = [2, 16], strides = [1, 1]} : vector<2x96xf32> to vector<2x16xf32>
    %476 = vector.extract_strided_slice %428 {offsets = [0, 80], sizes = [2, 16], strides = [1, 1]} : vector<2x96xf32> to vector<2x16xf32>
    %477 = arith.mulf %466, %476 : vector<2x16xf32>
    %478 = arith.addf %475, %477 : vector<2x16xf32>
    %479 = math.tanh %478 : vector<2x16xf32>
    %cst_100 = arith.constant 1.000000e+00 : f32
    %480 = vector.broadcast %cst_100 : f32 to vector<2x16xf32>
    %481 = arith.subf %480, %474 : vector<2x16xf32>
    %482 = arith.mulf %481, %479 : vector<2x16xf32>
    %483 = arith.mulf %474, %417 : vector<2x16xf32>
    %484 = arith.addf %482, %483 : vector<2x16xf32>
    %c0_101 = arith.constant 0 : index
    %c6_102 = arith.constant 6 : index
    %c0_103 = arith.constant 0 : index
    %485 = vector.load %arg19[%c0_101, %c6_102, %c0_103] : memref<2x8x32xf32, #tpu.memory_space<vmem>>, vector<2x1x16xf32>
    %486 = vector.shape_cast %485 : vector<2x1x16xf32> to vector<2x16xf32>
    %487 = vector.shape_cast %458 : vector<2x16xf32> to vector<2x1x16xf32>
    tpu.vector_store %arg19[%c0_101, %c6_102, %c0_103], %487 {strides = array<i32>} : memref<2x8x32xf32, #tpu.memory_space<vmem>>, vector<2x1x16xf32>,
    %c0_104 = arith.constant 0 : index
    %c1_105 = arith.constant 1 : index
    %c16_106 = arith.constant 16 : index
    %488 = vector.load %arg19[%c0_104, %c1_105, %c16_106] : memref<2x8x32xf32, #tpu.memory_space<vmem>>, vector<2x1x16xf32>
    %489 = vector.shape_cast %488 : vector<2x1x16xf32> to vector<2x16xf32>
    %490 = vector.shape_cast %484 : vector<2x16xf32> to vector<2x1x16xf32>
    tpu.vector_store %arg19[%c0_104, %c1_105, %c16_106], %490 {strides = array<i32>} : memref<2x8x32xf32, #tpu.memory_space<vmem>>, vector<2x1x16xf32>,
    %491 = tpu.concatenate %458, %484 in 1 : vector<2x16xf32>, vector<2x16xf32> -> vector<2x32xf32>
    %492 = arith.truncf %491 : vector<2x32xf32> to vector<2x32xbf16>
    %cst_107 = arith.constant dense<0.000000e+00> : vector<2x96xf32>
    %493 = tpu.matmul %492, %16, %cst_107 {dimension_numbers = #tpu.dot_dimension_numbers<[1], [0], [0], [1], [0, 0, 1, 1], [], []>} : vector<2x32xbf16>, vector<32x96xbf16>, vector<2x96xf32> -> vector<2x96xf32>
    %494 = vector.broadcast %17 : vector<1x96xf32> to vector<2x96xf32>
    %495 = arith.addf %493, %494 : vector<2x96xf32>
    %496 = vector.extract_strided_slice %7 {offsets = [7, 0, 0], sizes = [1, 2, 96], strides = [1, 1, 1]} : vector<8x2x96xf32> to vector<1x2x96xf32>
    %497 = vector.shape_cast %496 : vector<1x2x96xf32> to vector<2x96xf32>
    %498 = vector.extract_strided_slice %7 {offsets = [0, 0, 0], sizes = [1, 2, 96], strides = [1, 1, 1]} : vector<8x2x96xf32> to vector<1x2x96xf32>
    %499 = vector.shape_cast %498 : vector<1x2x96xf32> to vector<2x96xf32>
    %500 = vector.extract_strided_slice %497 {offsets = [0, 0], sizes = [2, 16], strides = [1, 1]} : vector<2x96xf32> to vector<2x16xf32>
    %501 = vector.extract_strided_slice %495 {offsets = [0, 0], sizes = [2, 16], strides = [1, 1]} : vector<2x96xf32> to vector<2x16xf32>
    %502 = arith.addf %500, %501 : vector<2x16xf32>
    %503 = arith.negf %502 : vector<2x16xf32>
    %504 = math.exp %503 : vector<2x16xf32>
    %cst_108 = arith.constant 1.000000e+00 : f32
    %505 = vector.broadcast %cst_108 : f32 to vector<2x16xf32>
    %506 = arith.addf %505, %504 : vector<2x16xf32>
    %507 = arith.divf %505, %506 : vector<2x16xf32>
    %508 = vector.extract_strided_slice %497 {offsets = [0, 16], sizes = [2, 16], strides = [1, 1]} : vector<2x96xf32> to vector<2x16xf32>
    %509 = vector.extract_strided_slice %495 {offsets = [0, 16], sizes = [2, 16], strides = [1, 1]} : vector<2x96xf32> to vector<2x16xf32>
    %510 = arith.addf %508, %509 : vector<2x16xf32>
    %511 = arith.negf %510 : vector<2x16xf32>
    %512 = math.exp %511 : vector<2x16xf32>
    %cst_109 = arith.constant 1.000000e+00 : f32
    %513 = vector.broadcast %cst_109 : f32 to vector<2x16xf32>
    %514 = arith.addf %513, %512 : vector<2x16xf32>
    %515 = arith.divf %513, %514 : vector<2x16xf32>
    %516 = vector.extract_strided_slice %497 {offsets = [0, 32], sizes = [2, 16], strides = [1, 1]} : vector<2x96xf32> to vector<2x16xf32>
    %517 = vector.extract_strided_slice %495 {offsets = [0, 32], sizes = [2, 16], strides = [1, 1]} : vector<2x96xf32> to vector<2x16xf32>
    %518 = arith.mulf %507, %517 : vector<2x16xf32>
    %519 = arith.addf %516, %518 : vector<2x16xf32>
    %520 = math.tanh %519 : vector<2x16xf32>
    %cst_110 = arith.constant 1.000000e+00 : f32
    %521 = vector.broadcast %cst_110 : f32 to vector<2x16xf32>
    %522 = arith.subf %521, %515 : vector<2x16xf32>
    %523 = arith.mulf %522, %520 : vector<2x16xf32>
    %524 = arith.mulf %515, %458 : vector<2x16xf32>
    %525 = arith.addf %523, %524 : vector<2x16xf32>
    %526 = vector.extract_strided_slice %499 {offsets = [0, 48], sizes = [2, 16], strides = [1, 1]} : vector<2x96xf32> to vector<2x16xf32>
    %527 = vector.extract_strided_slice %495 {offsets = [0, 48], sizes = [2, 16], strides = [1, 1]} : vector<2x96xf32> to vector<2x16xf32>
    %528 = arith.addf %526, %527 : vector<2x16xf32>
    %529 = arith.negf %528 : vector<2x16xf32>
    %530 = math.exp %529 : vector<2x16xf32>
    %cst_111 = arith.constant 1.000000e+00 : f32
    %531 = vector.broadcast %cst_111 : f32 to vector<2x16xf32>
    %532 = arith.addf %531, %530 : vector<2x16xf32>
    %533 = arith.divf %531, %532 : vector<2x16xf32>
    %534 = vector.extract_strided_slice %499 {offsets = [0, 64], sizes = [2, 16], strides = [1, 1]} : vector<2x96xf32> to vector<2x16xf32>
    %535 = vector.extract_strided_slice %495 {offsets = [0, 64], sizes = [2, 16], strides = [1, 1]} : vector<2x96xf32> to vector<2x16xf32>
    %536 = arith.addf %534, %535 : vector<2x16xf32>
    %537 = arith.negf %536 : vector<2x16xf32>
    %538 = math.exp %537 : vector<2x16xf32>
    %cst_112 = arith.constant 1.000000e+00 : f32
    %539 = vector.broadcast %cst_112 : f32 to vector<2x16xf32>
    %540 = arith.addf %539, %538 : vector<2x16xf32>
    %541 = arith.divf %539, %540 : vector<2x16xf32>
    %542 = vector.extract_strided_slice %499 {offsets = [0, 80], sizes = [2, 16], strides = [1, 1]} : vector<2x96xf32> to vector<2x16xf32>
    %543 = vector.extract_strided_slice %495 {offsets = [0, 80], sizes = [2, 16], strides = [1, 1]} : vector<2x96xf32> to vector<2x16xf32>
    %544 = arith.mulf %533, %543 : vector<2x16xf32>
    %545 = arith.addf %542, %544 : vector<2x16xf32>
    %546 = math.tanh %545 : vector<2x16xf32>
    %cst_113 = arith.constant 1.000000e+00 : f32
    %547 = vector.broadcast %cst_113 : f32 to vector<2x16xf32>
    %548 = arith.subf %547, %541 : vector<2x16xf32>
    %549 = arith.mulf %548, %546 : vector<2x16xf32>
    %550 = arith.mulf %541, %484 : vector<2x16xf32>
    %551 = arith.addf %549, %550 : vector<2x16xf32>
    %c0_114 = arith.constant 0 : index
    %c7_115 = arith.constant 7 : index
    %c0_116 = arith.constant 0 : index
    %552 = vector.load %arg19[%c0_114, %c7_115, %c0_116] : memref<2x8x32xf32, #tpu.memory_space<vmem>>, vector<2x1x16xf32>
    %553 = vector.shape_cast %552 : vector<2x1x16xf32> to vector<2x16xf32>
    %554 = vector.shape_cast %525 : vector<2x16xf32> to vector<2x1x16xf32>
    tpu.vector_store %arg19[%c0_114, %c7_115, %c0_116], %554 {strides = array<i32>} : memref<2x8x32xf32, #tpu.memory_space<vmem>>, vector<2x1x16xf32>,
    %c0_117 = arith.constant 0 : index
    %c0_118 = arith.constant 0 : index
    %c16_119 = arith.constant 16 : index
    %555 = vector.load %arg19[%c0_117, %c0_118, %c16_119] : memref<2x8x32xf32, #tpu.memory_space<vmem>>, vector<2x1x16xf32>
    %556 = vector.shape_cast %555 : vector<2x1x16xf32> to vector<2x16xf32>
    %557 = vector.shape_cast %551 : vector<2x16xf32> to vector<2x1x16xf32>
    tpu.vector_store %arg19[%c0_117, %c0_118, %c16_119], %557 {strides = array<i32>} : memref<2x8x32xf32, #tpu.memory_space<vmem>>, vector<2x1x16xf32>,
    %558 = tpu.concatenate %525, %551 in 1 : vector<2x16xf32>, vector<2x16xf32> -> vector<2x32xf32>
    %559 = arith.truncf %558 : vector<2x32xf32> to vector<2x32xbf16>
    %cst_120 = arith.constant dense<0.000000e+00> : vector<2x96xf32>
    %560 = tpu.matmul %559, %18, %cst_120 {dimension_numbers = #tpu.dot_dimension_numbers<[1], [0], [0], [1], [0, 0, 1, 1], [], []>} : vector<2x32xbf16>, vector<32x96xbf16>, vector<2x96xf32> -> vector<2x96xf32>
    %561 = vector.broadcast %19 : vector<1x96xf32> to vector<2x96xf32>
    %562 = arith.addf %560, %561 : vector<2x96xf32>
    %563 = vector.extract_strided_slice %15 {offsets = [0, 0, 0], sizes = [1, 2, 96], strides = [1, 1, 1]} : vector<8x2x96xf32> to vector<1x2x96xf32>
    %564 = vector.shape_cast %563 : vector<1x2x96xf32> to vector<2x96xf32>
    %565 = vector.extract_strided_slice %564 {offsets = [0, 0], sizes = [2, 32], strides = [1, 1]} : vector<2x96xf32> to vector<2x32xf32>
    %566 = vector.extract_strided_slice %562 {offsets = [0, 0], sizes = [2, 32], strides = [1, 1]} : vector<2x96xf32> to vector<2x32xf32>
    %567 = arith.addf %565, %566 : vector<2x32xf32>
    %568 = arith.negf %567 : vector<2x32xf32>
    %569 = math.exp %568 : vector<2x32xf32>
    %cst_121 = arith.constant 1.000000e+00 : f32
    %570 = vector.broadcast %cst_121 : f32 to vector<2x32xf32>
    %571 = arith.addf %570, %569 : vector<2x32xf32>
    %572 = arith.divf %570, %571 : vector<2x32xf32>
    %573 = vector.extract_strided_slice %564 {offsets = [0, 32], sizes = [2, 32], strides = [1, 1]} : vector<2x96xf32> to vector<2x32xf32>
    %574 = vector.extract_strided_slice %562 {offsets = [0, 32], sizes = [2, 32], strides = [1, 1]} : vector<2x96xf32> to vector<2x32xf32>
    %575 = arith.addf %573, %574 : vector<2x32xf32>
    %576 = arith.negf %575 : vector<2x32xf32>
    %577 = math.exp %576 : vector<2x32xf32>
    %cst_122 = arith.constant 1.000000e+00 : f32
    %578 = vector.broadcast %cst_122 : f32 to vector<2x32xf32>
    %579 = arith.addf %578, %577 : vector<2x32xf32>
    %580 = arith.divf %578, %579 : vector<2x32xf32>
    %581 = vector.extract_strided_slice %564 {offsets = [0, 64], sizes = [2, 32], strides = [1, 1]} : vector<2x96xf32> to vector<2x32xf32>
    %582 = vector.extract_strided_slice %562 {offsets = [0, 64], sizes = [2, 32], strides = [1, 1]} : vector<2x96xf32> to vector<2x32xf32>
    %583 = arith.mulf %572, %582 : vector<2x32xf32>
    %584 = arith.addf %581, %583 : vector<2x32xf32>
    %585 = math.tanh %584 : vector<2x32xf32>
    %cst_123 = arith.constant 1.000000e+00 : f32
    %586 = vector.broadcast %cst_123 : f32 to vector<2x32xf32>
    %587 = arith.subf %586, %580 : vector<2x32xf32>
    %588 = arith.mulf %587, %585 : vector<2x32xf32>
    %589 = arith.mulf %580, %558 : vector<2x32xf32>
    %590 = arith.addf %588, %589 : vector<2x32xf32>
    %c0_124 = arith.constant 0 : index
    %c0_125 = arith.constant 0 : index
    %c0_126 = arith.constant 0 : index
    %591 = vector.load %arg20[%c0_124, %c0_125, %c0_126] : memref<2x8x32xf32, #tpu.memory_space<vmem>>, vector<2x1x32xf32>
    %592 = vector.shape_cast %591 : vector<2x1x32xf32> to vector<2x32xf32>
    %593 = vector.shape_cast %590 : vector<2x32xf32> to vector<2x1x32xf32>
    tpu.vector_store %arg20[%c0_124, %c0_125, %c0_126], %593 {strides = array<i32>} : memref<2x8x32xf32, #tpu.memory_space<vmem>>, vector<2x1x32xf32>,
    %594 = arith.truncf %590 : vector<2x32xf32> to vector<2x32xbf16>
    %cst_127 = arith.constant dense<0.000000e+00> : vector<2x96xf32>
    %595 = tpu.matmul %594, %18, %cst_127 {dimension_numbers = #tpu.dot_dimension_numbers<[1], [0], [0], [1], [0, 0, 1, 1], [], []>} : vector<2x32xbf16>, vector<32x96xbf16>, vector<2x96xf32> -> vector<2x96xf32>
    %596 = vector.broadcast %19 : vector<1x96xf32> to vector<2x96xf32>
    %597 = arith.addf %595, %596 : vector<2x96xf32>
    %598 = vector.extract_strided_slice %15 {offsets = [1, 0, 0], sizes = [1, 2, 96], strides = [1, 1, 1]} : vector<8x2x96xf32> to vector<1x2x96xf32>
    %599 = vector.shape_cast %598 : vector<1x2x96xf32> to vector<2x96xf32>
    %600 = vector.extract_strided_slice %599 {offsets = [0, 0], sizes = [2, 32], strides = [1, 1]} : vector<2x96xf32> to vector<2x32xf32>
    %601 = vector.extract_strided_slice %597 {offsets = [0, 0], sizes = [2, 32], strides = [1, 1]} : vector<2x96xf32> to vector<2x32xf32>
    %602 = arith.addf %600, %601 : vector<2x32xf32>
    %603 = arith.negf %602 : vector<2x32xf32>
    %604 = math.exp %603 : vector<2x32xf32>
    %cst_128 = arith.constant 1.000000e+00 : f32
    %605 = vector.broadcast %cst_128 : f32 to vector<2x32xf32>
    %606 = arith.addf %605, %604 : vector<2x32xf32>
    %607 = arith.divf %605, %606 : vector<2x32xf32>
    %608 = vector.extract_strided_slice %599 {offsets = [0, 32], sizes = [2, 32], strides = [1, 1]} : vector<2x96xf32> to vector<2x32xf32>
    %609 = vector.extract_strided_slice %597 {offsets = [0, 32], sizes = [2, 32], strides = [1, 1]} : vector<2x96xf32> to vector<2x32xf32>
    %610 = arith.addf %608, %609 : vector<2x32xf32>
    %611 = arith.negf %610 : vector<2x32xf32>
    %612 = math.exp %611 : vector<2x32xf32>
    %cst_129 = arith.constant 1.000000e+00 : f32
    %613 = vector.broadcast %cst_129 : f32 to vector<2x32xf32>
    %614 = arith.addf %613, %612 : vector<2x32xf32>
    %615 = arith.divf %613, %614 : vector<2x32xf32>
    %616 = vector.extract_strided_slice %599 {offsets = [0, 64], sizes = [2, 32], strides = [1, 1]} : vector<2x96xf32> to vector<2x32xf32>
    %617 = vector.extract_strided_slice %597 {offsets = [0, 64], sizes = [2, 32], strides = [1, 1]} : vector<2x96xf32> to vector<2x32xf32>
    %618 = arith.mulf %607, %617 : vector<2x32xf32>
    %619 = arith.addf %616, %618 : vector<2x32xf32>
    %620 = math.tanh %619 : vector<2x32xf32>
    %cst_130 = arith.constant 1.000000e+00 : f32
    %621 = vector.broadcast %cst_130 : f32 to vector<2x32xf32>
    %622 = arith.subf %621, %615 : vector<2x32xf32>
    %623 = arith.mulf %622, %620 : vector<2x32xf32>
    %624 = arith.mulf %615, %590 : vector<2x32xf32>
    %625 = arith.addf %623, %624 : vector<2x32xf32>
    %c0_131 = arith.constant 0 : index
    %c1_132 = arith.constant 1 : index
    %c0_133 = arith.constant 0 : index
    %626 = vector.load %arg20[%c0_131, %c1_132, %c0_133] : memref<2x8x32xf32, #tpu.memory_space<vmem>>, vector<2x1x32xf32>
    %627 = vector.shape_cast %626 : vector<2x1x32xf32> to vector<2x32xf32>
    %628 = vector.shape_cast %625 : vector<2x32xf32> to vector<2x1x32xf32>
    tpu.vector_store %arg20[%c0_131, %c1_132, %c0_133], %628 {strides = array<i32>} : memref<2x8x32xf32, #tpu.memory_space<vmem>>, vector<2x1x32xf32>,
    %629 = arith.truncf %625 : vector<2x32xf32> to vector<2x32xbf16>
    %cst_134 = arith.constant dense<0.000000e+00> : vector<2x96xf32>
    %630 = tpu.matmul %629, %18, %cst_134 {dimension_numbers = #tpu.dot_dimension_numbers<[1], [0], [0], [1], [0, 0, 1, 1], [], []>} : vector<2x32xbf16>, vector<32x96xbf16>, vector<2x96xf32> -> vector<2x96xf32>
    %631 = vector.broadcast %19 : vector<1x96xf32> to vector<2x96xf32>
    %632 = arith.addf %630, %631 : vector<2x96xf32>
    %633 = vector.extract_strided_slice %15 {offsets = [2, 0, 0], sizes = [1, 2, 96], strides = [1, 1, 1]} : vector<8x2x96xf32> to vector<1x2x96xf32>
    %634 = vector.shape_cast %633 : vector<1x2x96xf32> to vector<2x96xf32>
    %635 = vector.extract_strided_slice %634 {offsets = [0, 0], sizes = [2, 32], strides = [1, 1]} : vector<2x96xf32> to vector<2x32xf32>
    %636 = vector.extract_strided_slice %632 {offsets = [0, 0], sizes = [2, 32], strides = [1, 1]} : vector<2x96xf32> to vector<2x32xf32>
    %637 = arith.addf %635, %636 : vector<2x32xf32>
    %638 = arith.negf %637 : vector<2x32xf32>
    %639 = math.exp %638 : vector<2x32xf32>
    %cst_135 = arith.constant 1.000000e+00 : f32
    %640 = vector.broadcast %cst_135 : f32 to vector<2x32xf32>
    %641 = arith.addf %640, %639 : vector<2x32xf32>
    %642 = arith.divf %640, %641 : vector<2x32xf32>
    %643 = vector.extract_strided_slice %634 {offsets = [0, 32], sizes = [2, 32], strides = [1, 1]} : vector<2x96xf32> to vector<2x32xf32>
    %644 = vector.extract_strided_slice %632 {offsets = [0, 32], sizes = [2, 32], strides = [1, 1]} : vector<2x96xf32> to vector<2x32xf32>
    %645 = arith.addf %643, %644 : vector<2x32xf32>
    %646 = arith.negf %645 : vector<2x32xf32>
    %647 = math.exp %646 : vector<2x32xf32>
    %cst_136 = arith.constant 1.000000e+00 : f32
    %648 = vector.broadcast %cst_136 : f32 to vector<2x32xf32>
    %649 = arith.addf %648, %647 : vector<2x32xf32>
    %650 = arith.divf %648, %649 : vector<2x32xf32>
    %651 = vector.extract_strided_slice %634 {offsets = [0, 64], sizes = [2, 32], strides = [1, 1]} : vector<2x96xf32> to vector<2x32xf32>
    %652 = vector.extract_strided_slice %632 {offsets = [0, 64], sizes = [2, 32], strides = [1, 1]} : vector<2x96xf32> to vector<2x32xf32>
    %653 = arith.mulf %642, %652 : vector<2x32xf32>
    %654 = arith.addf %651, %653 : vector<2x32xf32>
    %655 = math.tanh %654 : vector<2x32xf32>
    %cst_137 = arith.constant 1.000000e+00 : f32
    %656 = vector.broadcast %cst_137 : f32 to vector<2x32xf32>
    %657 = arith.subf %656, %650 : vector<2x32xf32>
    %658 = arith.mulf %657, %655 : vector<2x32xf32>
    %659 = arith.mulf %650, %625 : vector<2x32xf32>
    %660 = arith.addf %658, %659 : vector<2x32xf32>
    %c0_138 = arith.constant 0 : index
    %c2_139 = arith.constant 2 : index
    %c0_140 = arith.constant 0 : index
    %661 = vector.load %arg20[%c0_138, %c2_139, %c0_140] : memref<2x8x32xf32, #tpu.memory_space<vmem>>, vector<2x1x32xf32>
    %662 = vector.shape_cast %661 : vector<2x1x32xf32> to vector<2x32xf32>
    %663 = vector.shape_cast %660 : vector<2x32xf32> to vector<2x1x32xf32>
    tpu.vector_store %arg20[%c0_138, %c2_139, %c0_140], %663 {strides = array<i32>} : memref<2x8x32xf32, #tpu.memory_space<vmem>>, vector<2x1x32xf32>,
    %664 = arith.truncf %660 : vector<2x32xf32> to vector<2x32xbf16>
    %cst_141 = arith.constant dense<0.000000e+00> : vector<2x96xf32>
    %665 = tpu.matmul %664, %18, %cst_141 {dimension_numbers = #tpu.dot_dimension_numbers<[1], [0], [0], [1], [0, 0, 1, 1], [], []>} : vector<2x32xbf16>, vector<32x96xbf16>, vector<2x96xf32> -> vector<2x96xf32>
    %666 = vector.broadcast %19 : vector<1x96xf32> to vector<2x96xf32>
    %667 = arith.addf %665, %666 : vector<2x96xf32>
    %668 = vector.extract_strided_slice %15 {offsets = [3, 0, 0], sizes = [1, 2, 96], strides = [1, 1, 1]} : vector<8x2x96xf32> to vector<1x2x96xf32>
    %669 = vector.shape_cast %668 : vector<1x2x96xf32> to vector<2x96xf32>
    %670 = vector.extract_strided_slice %669 {offsets = [0, 0], sizes = [2, 32], strides = [1, 1]} : vector<2x96xf32> to vector<2x32xf32>
    %671 = vector.extract_strided_slice %667 {offsets = [0, 0], sizes = [2, 32], strides = [1, 1]} : vector<2x96xf32> to vector<2x32xf32>
    %672 = arith.addf %670, %671 : vector<2x32xf32>
    %673 = arith.negf %672 : vector<2x32xf32>
    %674 = math.exp %673 : vector<2x32xf32>
    %cst_142 = arith.constant 1.000000e+00 : f32
    %675 = vector.broadcast %cst_142 : f32 to vector<2x32xf32>
    %676 = arith.addf %675, %674 : vector<2x32xf32>
    %677 = arith.divf %675, %676 : vector<2x32xf32>
    %678 = vector.extract_strided_slice %669 {offsets = [0, 32], sizes = [2, 32], strides = [1, 1]} : vector<2x96xf32> to vector<2x32xf32>
    %679 = vector.extract_strided_slice %667 {offsets = [0, 32], sizes = [2, 32], strides = [1, 1]} : vector<2x96xf32> to vector<2x32xf32>
    %680 = arith.addf %678, %679 : vector<2x32xf32>
    %681 = arith.negf %680 : vector<2x32xf32>
    %682 = math.exp %681 : vector<2x32xf32>
    %cst_143 = arith.constant 1.000000e+00 : f32
    %683 = vector.broadcast %cst_143 : f32 to vector<2x32xf32>
    %684 = arith.addf %683, %682 : vector<2x32xf32>
    %685 = arith.divf %683, %684 : vector<2x32xf32>
    %686 = vector.extract_strided_slice %669 {offsets = [0, 64], sizes = [2, 32], strides = [1, 1]} : vector<2x96xf32> to vector<2x32xf32>
    %687 = vector.extract_strided_slice %667 {offsets = [0, 64], sizes = [2, 32], strides = [1, 1]} : vector<2x96xf32> to vector<2x32xf32>
    %688 = arith.mulf %677, %687 : vector<2x32xf32>
    %689 = arith.addf %686, %688 : vector<2x32xf32>
    %690 = math.tanh %689 : vector<2x32xf32>
    %cst_144 = arith.constant 1.000000e+00 : f32
    %691 = vector.broadcast %cst_144 : f32 to vector<2x32xf32>
    %692 = arith.subf %691, %685 : vector<2x32xf32>
    %693 = arith.mulf %692, %690 : vector<2x32xf32>
    %694 = arith.mulf %685, %660 : vector<2x32xf32>
    %695 = arith.addf %693, %694 : vector<2x32xf32>
    %c0_145 = arith.constant 0 : index
    %c3_146 = arith.constant 3 : index
    %c0_147 = arith.constant 0 : index
    %696 = vector.load %arg20[%c0_145, %c3_146, %c0_147] : memref<2x8x32xf32, #tpu.memory_space<vmem>>, vector<2x1x32xf32>
    %697 = vector.shape_cast %696 : vector<2x1x32xf32> to vector<2x32xf32>
    %698 = vector.shape_cast %695 : vector<2x32xf32> to vector<2x1x32xf32>
    tpu.vector_store %arg20[%c0_145, %c3_146, %c0_147], %698 {strides = array<i32>} : memref<2x8x32xf32, #tpu.memory_space<vmem>>, vector<2x1x32xf32>,
    %699 = arith.truncf %695 : vector<2x32xf32> to vector<2x32xbf16>
    %cst_148 = arith.constant dense<0.000000e+00> : vector<2x96xf32>
    %700 = tpu.matmul %699, %18, %cst_148 {dimension_numbers = #tpu.dot_dimension_numbers<[1], [0], [0], [1], [0, 0, 1, 1], [], []>} : vector<2x32xbf16>, vector<32x96xbf16>, vector<2x96xf32> -> vector<2x96xf32>
    %701 = vector.broadcast %19 : vector<1x96xf32> to vector<2x96xf32>
    %702 = arith.addf %700, %701 : vector<2x96xf32>
    %703 = vector.extract_strided_slice %15 {offsets = [4, 0, 0], sizes = [1, 2, 96], strides = [1, 1, 1]} : vector<8x2x96xf32> to vector<1x2x96xf32>
    %704 = vector.shape_cast %703 : vector<1x2x96xf32> to vector<2x96xf32>
    %705 = vector.extract_strided_slice %704 {offsets = [0, 0], sizes = [2, 32], strides = [1, 1]} : vector<2x96xf32> to vector<2x32xf32>
    %706 = vector.extract_strided_slice %702 {offsets = [0, 0], sizes = [2, 32], strides = [1, 1]} : vector<2x96xf32> to vector<2x32xf32>
    %707 = arith.addf %705, %706 : vector<2x32xf32>
    %708 = arith.negf %707 : vector<2x32xf32>
    %709 = math.exp %708 : vector<2x32xf32>
    %cst_149 = arith.constant 1.000000e+00 : f32
    %710 = vector.broadcast %cst_149 : f32 to vector<2x32xf32>
    %711 = arith.addf %710, %709 : vector<2x32xf32>
    %712 = arith.divf %710, %711 : vector<2x32xf32>
    %713 = vector.extract_strided_slice %704 {offsets = [0, 32], sizes = [2, 32], strides = [1, 1]} : vector<2x96xf32> to vector<2x32xf32>
    %714 = vector.extract_strided_slice %702 {offsets = [0, 32], sizes = [2, 32], strides = [1, 1]} : vector<2x96xf32> to vector<2x32xf32>
    %715 = arith.addf %713, %714 : vector<2x32xf32>
    %716 = arith.negf %715 : vector<2x32xf32>
    %717 = math.exp %716 : vector<2x32xf32>
    %cst_150 = arith.constant 1.000000e+00 : f32
    %718 = vector.broadcast %cst_150 : f32 to vector<2x32xf32>
    %719 = arith.addf %718, %717 : vector<2x32xf32>
    %720 = arith.divf %718, %719 : vector<2x32xf32>
    %721 = vector.extract_strided_slice %704 {offsets = [0, 64], sizes = [2, 32], strides = [1, 1]} : vector<2x96xf32> to vector<2x32xf32>
    %722 = vector.extract_strided_slice %702 {offsets = [0, 64], sizes = [2, 32], strides = [1, 1]} : vector<2x96xf32> to vector<2x32xf32>
    %723 = arith.mulf %712, %722 : vector<2x32xf32>
    %724 = arith.addf %721, %723 : vector<2x32xf32>
    %725 = math.tanh %724 : vector<2x32xf32>
    %cst_151 = arith.constant 1.000000e+00 : f32
    %726 = vector.broadcast %cst_151 : f32 to vector<2x32xf32>
    %727 = arith.subf %726, %720 : vector<2x32xf32>
    %728 = arith.mulf %727, %725 : vector<2x32xf32>
    %729 = arith.mulf %720, %695 : vector<2x32xf32>
    %730 = arith.addf %728, %729 : vector<2x32xf32>
    %c0_152 = arith.constant 0 : index
    %c4_153 = arith.constant 4 : index
    %c0_154 = arith.constant 0 : index
    %731 = vector.load %arg20[%c0_152, %c4_153, %c0_154] : memref<2x8x32xf32, #tpu.memory_space<vmem>>, vector<2x1x32xf32>
    %732 = vector.shape_cast %731 : vector<2x1x32xf32> to vector<2x32xf32>
    %733 = vector.shape_cast %730 : vector<2x32xf32> to vector<2x1x32xf32>
    tpu.vector_store %arg20[%c0_152, %c4_153, %c0_154], %733 {strides = array<i32>} : memref<2x8x32xf32, #tpu.memory_space<vmem>>, vector<2x1x32xf32>,
    %734 = arith.truncf %730 : vector<2x32xf32> to vector<2x32xbf16>
    %cst_155 = arith.constant dense<0.000000e+00> : vector<2x96xf32>
    %735 = tpu.matmul %734, %18, %cst_155 {dimension_numbers = #tpu.dot_dimension_numbers<[1], [0], [0], [1], [0, 0, 1, 1], [], []>} : vector<2x32xbf16>, vector<32x96xbf16>, vector<2x96xf32> -> vector<2x96xf32>
    %736 = vector.broadcast %19 : vector<1x96xf32> to vector<2x96xf32>
    %737 = arith.addf %735, %736 : vector<2x96xf32>
    %738 = vector.extract_strided_slice %15 {offsets = [5, 0, 0], sizes = [1, 2, 96], strides = [1, 1, 1]} : vector<8x2x96xf32> to vector<1x2x96xf32>
    %739 = vector.shape_cast %738 : vector<1x2x96xf32> to vector<2x96xf32>
    %740 = vector.extract_strided_slice %739 {offsets = [0, 0], sizes = [2, 32], strides = [1, 1]} : vector<2x96xf32> to vector<2x32xf32>
    %741 = vector.extract_strided_slice %737 {offsets = [0, 0], sizes = [2, 32], strides = [1, 1]} : vector<2x96xf32> to vector<2x32xf32>
    %742 = arith.addf %740, %741 : vector<2x32xf32>
    %743 = arith.negf %742 : vector<2x32xf32>
    %744 = math.exp %743 : vector<2x32xf32>
    %cst_156 = arith.constant 1.000000e+00 : f32
    %745 = vector.broadcast %cst_156 : f32 to vector<2x32xf32>
    %746 = arith.addf %745, %744 : vector<2x32xf32>
    %747 = arith.divf %745, %746 : vector<2x32xf32>
    %748 = vector.extract_strided_slice %739 {offsets = [0, 32], sizes = [2, 32], strides = [1, 1]} : vector<2x96xf32> to vector<2x32xf32>
    %749 = vector.extract_strided_slice %737 {offsets = [0, 32], sizes = [2, 32], strides = [1, 1]} : vector<2x96xf32> to vector<2x32xf32>
    %750 = arith.addf %748, %749 : vector<2x32xf32>
    %751 = arith.negf %750 : vector<2x32xf32>
    %752 = math.exp %751 : vector<2x32xf32>
    %cst_157 = arith.constant 1.000000e+00 : f32
    %753 = vector.broadcast %cst_157 : f32 to vector<2x32xf32>
    %754 = arith.addf %753, %752 : vector<2x32xf32>
    %755 = arith.divf %753, %754 : vector<2x32xf32>
    %756 = vector.extract_strided_slice %739 {offsets = [0, 64], sizes = [2, 32], strides = [1, 1]} : vector<2x96xf32> to vector<2x32xf32>
    %757 = vector.extract_strided_slice %737 {offsets = [0, 64], sizes = [2, 32], strides = [1, 1]} : vector<2x96xf32> to vector<2x32xf32>
    %758 = arith.mulf %747, %757 : vector<2x32xf32>
    %759 = arith.addf %756, %758 : vector<2x32xf32>
    %760 = math.tanh %759 : vector<2x32xf32>
    %cst_158 = arith.constant 1.000000e+00 : f32
    %761 = vector.broadcast %cst_158 : f32 to vector<2x32xf32>
    %762 = arith.subf %761, %755 : vector<2x32xf32>
    %763 = arith.mulf %762, %760 : vector<2x32xf32>
    %764 = arith.mulf %755, %730 : vector<2x32xf32>
    %765 = arith.addf %763, %764 : vector<2x32xf32>
    %c0_159 = arith.constant 0 : index
    %c5_160 = arith.constant 5 : index
    %c0_161 = arith.constant 0 : index
    %766 = vector.load %arg20[%c0_159, %c5_160, %c0_161] : memref<2x8x32xf32, #tpu.memory_space<vmem>>, vector<2x1x32xf32>
    %767 = vector.shape_cast %766 : vector<2x1x32xf32> to vector<2x32xf32>
    %768 = vector.shape_cast %765 : vector<2x32xf32> to vector<2x1x32xf32>
    tpu.vector_store %arg20[%c0_159, %c5_160, %c0_161], %768 {strides = array<i32>} : memref<2x8x32xf32, #tpu.memory_space<vmem>>, vector<2x1x32xf32>,
    %769 = arith.truncf %765 : vector<2x32xf32> to vector<2x32xbf16>
    %cst_162 = arith.constant dense<0.000000e+00> : vector<2x96xf32>
    %770 = tpu.matmul %769, %18, %cst_162 {dimension_numbers = #tpu.dot_dimension_numbers<[1], [0], [0], [1], [0, 0, 1, 1], [], []>} : vector<2x32xbf16>, vector<32x96xbf16>, vector<2x96xf32> -> vector<2x96xf32>
    %771 = vector.broadcast %19 : vector<1x96xf32> to vector<2x96xf32>
    %772 = arith.addf %770, %771 : vector<2x96xf32>
    %773 = vector.extract_strided_slice %15 {offsets = [6, 0, 0], sizes = [1, 2, 96], strides = [1, 1, 1]} : vector<8x2x96xf32> to vector<1x2x96xf32>
    %774 = vector.shape_cast %773 : vector<1x2x96xf32> to vector<2x96xf32>
    %775 = vector.extract_strided_slice %774 {offsets = [0, 0], sizes = [2, 32], strides = [1, 1]} : vector<2x96xf32> to vector<2x32xf32>
    %776 = vector.extract_strided_slice %772 {offsets = [0, 0], sizes = [2, 32], strides = [1, 1]} : vector<2x96xf32> to vector<2x32xf32>
    %777 = arith.addf %775, %776 : vector<2x32xf32>
    %778 = arith.negf %777 : vector<2x32xf32>
    %779 = math.exp %778 : vector<2x32xf32>
    %cst_163 = arith.constant 1.000000e+00 : f32
    %780 = vector.broadcast %cst_163 : f32 to vector<2x32xf32>
    %781 = arith.addf %780, %779 : vector<2x32xf32>
    %782 = arith.divf %780, %781 : vector<2x32xf32>
    %783 = vector.extract_strided_slice %774 {offsets = [0, 32], sizes = [2, 32], strides = [1, 1]} : vector<2x96xf32> to vector<2x32xf32>
    %784 = vector.extract_strided_slice %772 {offsets = [0, 32], sizes = [2, 32], strides = [1, 1]} : vector<2x96xf32> to vector<2x32xf32>
    %785 = arith.addf %783, %784 : vector<2x32xf32>
    %786 = arith.negf %785 : vector<2x32xf32>
    %787 = math.exp %786 : vector<2x32xf32>
    %cst_164 = arith.constant 1.000000e+00 : f32
    %788 = vector.broadcast %cst_164 : f32 to vector<2x32xf32>
    %789 = arith.addf %788, %787 : vector<2x32xf32>
    %790 = arith.divf %788, %789 : vector<2x32xf32>
    %791 = vector.extract_strided_slice %774 {offsets = [0, 64], sizes = [2, 32], strides = [1, 1]} : vector<2x96xf32> to vector<2x32xf32>
    %792 = vector.extract_strided_slice %772 {offsets = [0, 64], sizes = [2, 32], strides = [1, 1]} : vector<2x96xf32> to vector<2x32xf32>
    %793 = arith.mulf %782, %792 : vector<2x32xf32>
    %794 = arith.addf %791, %793 : vector<2x32xf32>
    %795 = math.tanh %794 : vector<2x32xf32>
    %cst_165 = arith.constant 1.000000e+00 : f32
    %796 = vector.broadcast %cst_165 : f32 to vector<2x32xf32>
    %797 = arith.subf %796, %790 : vector<2x32xf32>
    %798 = arith.mulf %797, %795 : vector<2x32xf32>
    %799 = arith.mulf %790, %765 : vector<2x32xf32>
    %800 = arith.addf %798, %799 : vector<2x32xf32>
    %c0_166 = arith.constant 0 : index
    %c6_167 = arith.constant 6 : index
    %c0_168 = arith.constant 0 : index
    %801 = vector.load %arg20[%c0_166, %c6_167, %c0_168] : memref<2x8x32xf32, #tpu.memory_space<vmem>>, vector<2x1x32xf32>
    %802 = vector.shape_cast %801 : vector<2x1x32xf32> to vector<2x32xf32>
    %803 = vector.shape_cast %800 : vector<2x32xf32> to vector<2x1x32xf32>
    tpu.vector_store %arg20[%c0_166, %c6_167, %c0_168], %803 {strides = array<i32>} : memref<2x8x32xf32, #tpu.memory_space<vmem>>, vector<2x1x32xf32>,
    %804 = arith.truncf %800 : vector<2x32xf32> to vector<2x32xbf16>
    %cst_169 = arith.constant dense<0.000000e+00> : vector<2x96xf32>
    %805 = tpu.matmul %804, %18, %cst_169 {dimension_numbers = #tpu.dot_dimension_numbers<[1], [0], [0], [1], [0, 0, 1, 1], [], []>} : vector<2x32xbf16>, vector<32x96xbf16>, vector<2x96xf32> -> vector<2x96xf32>
    %806 = vector.broadcast %19 : vector<1x96xf32> to vector<2x96xf32>
    %807 = arith.addf %805, %806 : vector<2x96xf32>
    %808 = vector.extract_strided_slice %15 {offsets = [7, 0, 0], sizes = [1, 2, 96], strides = [1, 1, 1]} : vector<8x2x96xf32> to vector<1x2x96xf32>
    %809 = vector.shape_cast %808 : vector<1x2x96xf32> to vector<2x96xf32>
    %810 = vector.extract_strided_slice %809 {offsets = [0, 0], sizes = [2, 32], strides = [1, 1]} : vector<2x96xf32> to vector<2x32xf32>
    %811 = vector.extract_strided_slice %807 {offsets = [0, 0], sizes = [2, 32], strides = [1, 1]} : vector<2x96xf32> to vector<2x32xf32>
    %812 = arith.addf %810, %811 : vector<2x32xf32>
    %813 = arith.negf %812 : vector<2x32xf32>
    %814 = math.exp %813 : vector<2x32xf32>
    %cst_170 = arith.constant 1.000000e+00 : f32
    %815 = vector.broadcast %cst_170 : f32 to vector<2x32xf32>
    %816 = arith.addf %815, %814 : vector<2x32xf32>
    %817 = arith.divf %815, %816 : vector<2x32xf32>
    %818 = vector.extract_strided_slice %809 {offsets = [0, 32], sizes = [2, 32], strides = [1, 1]} : vector<2x96xf32> to vector<2x32xf32>
    %819 = vector.extract_strided_slice %807 {offsets = [0, 32], sizes = [2, 32], strides = [1, 1]} : vector<2x96xf32> to vector<2x32xf32>
    %820 = arith.addf %818, %819 : vector<2x32xf32>
    %821 = arith.negf %820 : vector<2x32xf32>
    %822 = math.exp %821 : vector<2x32xf32>
    %cst_171 = arith.constant 1.000000e+00 : f32
    %823 = vector.broadcast %cst_171 : f32 to vector<2x32xf32>
    %824 = arith.addf %823, %822 : vector<2x32xf32>
    %825 = arith.divf %823, %824 : vector<2x32xf32>
    %826 = vector.extract_strided_slice %809 {offsets = [0, 64], sizes = [2, 32], strides = [1, 1]} : vector<2x96xf32> to vector<2x32xf32>
    %827 = vector.extract_strided_slice %807 {offsets = [0, 64], sizes = [2, 32], strides = [1, 1]} : vector<2x96xf32> to vector<2x32xf32>
    %828 = arith.mulf %817, %827 : vector<2x32xf32>
    %829 = arith.addf %826, %828 : vector<2x32xf32>
    %830 = math.tanh %829 : vector<2x32xf32>
    %cst_172 = arith.constant 1.000000e+00 : f32
    %831 = vector.broadcast %cst_172 : f32 to vector<2x32xf32>
    %832 = arith.subf %831, %825 : vector<2x32xf32>
    %833 = arith.mulf %832, %830 : vector<2x32xf32>
    %834 = arith.mulf %825, %800 : vector<2x32xf32>
    %835 = arith.addf %833, %834 : vector<2x32xf32>
    %c0_173 = arith.constant 0 : index
    %c7_174 = arith.constant 7 : index
    %c0_175 = arith.constant 0 : index
    %836 = vector.load %arg20[%c0_173, %c7_174, %c0_175] : memref<2x8x32xf32, #tpu.memory_space<vmem>>, vector<2x1x32xf32>
    %837 = vector.shape_cast %836 : vector<2x1x32xf32> to vector<2x32xf32>
    %838 = vector.shape_cast %835 : vector<2x32xf32> to vector<2x1x32xf32>
    tpu.vector_store %arg20[%c0_173, %c7_174, %c0_175], %838 {strides = array<i32>} : memref<2x8x32xf32, #tpu.memory_space<vmem>>, vector<2x1x32xf32>,
    %c0_176 = arith.constant 0 : index
    %c0_177 = arith.constant 0 : index
    %c0_178 = arith.constant 0 : index
    %839 = vector.load %arg19[%c0_176, %c0_177, %c0_178] : memref<2x8x32xf32, #tpu.memory_space<vmem>>, vector<2x8x32xf32>
    %840 = vector.shape_cast %839 : vector<2x8x32xf32> to vector<16x32xf32>
    %c0_179 = arith.constant 0 : index
    %c0_180 = arith.constant 0 : index
    %c0_181 = arith.constant 0 : index
    %841 = vector.load %arg20[%c0_179, %c0_180, %c0_181] : memref<2x8x32xf32, #tpu.memory_space<vmem>>, vector<2x8x32xf32>
    %842 = vector.shape_cast %841 : vector<2x8x32xf32> to vector<16x32xf32>
    %c0_182 = arith.constant 0 : index
    %c0_183 = arith.constant 0 : index
    %843 = vector.load %arg10[%c0_182, %c0_183] : memref<32x64xf32, #tpu.memory_space<vmem>>, vector<32x64xf32>
    %cst_184 = arith.constant dense<0.000000e+00> : vector<16x64xf32>
    %844 = tpu.matmul %840, %843, %cst_184 {dimension_numbers = #tpu.dot_dimension_numbers<[1], [0], [0], [1], [0, 0, 1, 1], [], []>} : vector<16x32xf32>, vector<32x64xf32>, vector<16x64xf32> -> vector<16x64xf32>
    %c0_185 = arith.constant 0 : index
    %c0_186 = arith.constant 0 : index
    %845 = vector.load %arg11[%c0_185, %c0_186] : memref<1x64xf32, #tpu.memory_space<vmem>>, vector<1x64xf32>
    %846 = vector.broadcast %845 : vector<1x64xf32> to vector<16x64xf32>
    %847 = arith.addf %844, %846 : vector<16x64xf32>
    %848 = vector.extract_strided_slice %847 {offsets = [0, 0], sizes = [16, 32], strides = [1, 1]} : vector<16x64xf32> to vector<16x32xf32>
    %849 = vector.shape_cast %848 : vector<16x32xf32> to vector<2x8x32xf32>
    %850 = vector.extract_strided_slice %847 {offsets = [0, 32], sizes = [16, 32], strides = [1, 1]} : vector<16x64xf32> to vector<16x32xf32>
    %851 = vector.shape_cast %850 : vector<16x32xf32> to vector<2x8x32xf32>
    %c0_187 = arith.constant 0 : index
    %c0_188 = arith.constant 0 : index
    %852 = vector.load %arg12[%c0_187, %c0_188] : memref<32x64xf32, #tpu.memory_space<vmem>>, vector<32x64xf32>
    %cst_189 = arith.constant dense<0.000000e+00> : vector<16x64xf32>
    %853 = tpu.matmul %842, %852, %cst_189 {dimension_numbers = #tpu.dot_dimension_numbers<[1], [0], [0], [1], [0, 0, 1, 1], [], []>} : vector<16x32xf32>, vector<32x64xf32>, vector<16x64xf32> -> vector<16x64xf32>
    %854 = vector.extract_strided_slice %853 {offsets = [0, 0], sizes = [16, 32], strides = [1, 1]} : vector<16x64xf32> to vector<16x32xf32>
    %c0_190 = arith.constant 0 : index
    %c0_191 = arith.constant 0 : index
    %855 = vector.load %arg13[%c0_190, %c0_191] : memref<1x32xf32, #tpu.memory_space<vmem>>, vector<1x32xf32>
    %856 = vector.broadcast %855 : vector<1x32xf32> to vector<16x32xf32>
    %857 = arith.addf %854, %856 : vector<16x32xf32>
    %858 = vector.shape_cast %857 : vector<16x32xf32> to vector<2x8x32xf32>
    %859 = vector.extract_strided_slice %853 {offsets = [0, 32], sizes = [16, 32], strides = [1, 1]} : vector<16x64xf32> to vector<16x32xf32>
    "tpu.trace_start"() <{level = 10 : i32, message = "bqd,bkd->bqk"}> : () -> ()
    %cst_192 = arith.constant dense<0.000000e+00> : vector<2x8x8xf32>
    %860 = tpu.matmul %858, %849, %cst_192 {dimension_numbers = #tpu.dot_dimension_numbers<[2], [2], [1], [1], [0, 0, 0, 1, 1, 1], [0], [0]>} : vector<2x8x32xf32>, vector<2x8x32xf32>, vector<2x8x8xf32> -> vector<2x8x8xf32>
    "tpu.trace_stop"() : () -> ()
    %cst_193 = arith.constant 0.176776692 : f32
    %861 = vector.broadcast %cst_193 : f32 to vector<2x8x8xf32>
    %862 = arith.mulf %860, %861 : vector<2x8x8xf32>
    %cst_194 = arith.constant dense<0xFF800000> : vector<2x8xf32>
    %863 = vector.multi_reduction <maximumf>, %862, %cst_194 [2] : vector<2x8x8xf32> to vector<2x8xf32>
    %864 = vector.shape_cast %863 : vector<2x8xf32> to vector<2x8x1xf32>
    %865 = vector.broadcast %864 : vector<2x8x1xf32> to vector<2x8x8xf32>
    %866 = arith.subf %862, %865 : vector<2x8x8xf32>
    %867 = math.exp %866 : vector<2x8x8xf32>
    %cst_195 = arith.constant dense<0.000000e+00> : vector<2x8xf32>
    %868 = vector.multi_reduction <add>, %867, %cst_195 [2] : vector<2x8x8xf32> to vector<2x8xf32>
    %869 = vector.shape_cast %868 : vector<2x8xf32> to vector<2x8x1xf32>
    %870 = vector.broadcast %869 : vector<2x8x1xf32> to vector<2x8x8xf32>
    %871 = arith.divf %867, %870 : vector<2x8x8xf32>
    "tpu.trace_start"() <{level = 10 : i32, message = "bqk,bkd->bqd"}> : () -> ()
    %cst_196 = arith.constant dense<0.000000e+00> : vector<2x8x32xf32>
    %872 = tpu.matmul %871, %851, %cst_196 {dimension_numbers = #tpu.dot_dimension_numbers<[2], [1], [1], [2], [0, 0, 0, 1, 1, 2], [0], [0]>} : vector<2x8x8xf32>, vector<2x8x32xf32>, vector<2x8x32xf32> -> vector<2x8x32xf32>
    "tpu.trace_stop"() : () -> ()
    %873 = vector.shape_cast %872 : vector<2x8x32xf32> to vector<16x32xf32>
    %c0_197 = arith.constant 0 : index
    %c0_198 = arith.constant 0 : index
    %874 = vector.load %arg14[%c0_197, %c0_198] : memref<32x32xf32, #tpu.memory_space<vmem>>, vector<32x32xf32>
    %cst_199 = arith.constant dense<0.000000e+00> : vector<16x32xf32>
    %875 = tpu.matmul %873, %874, %cst_199 {dimension_numbers = #tpu.dot_dimension_numbers<[1], [0], [0], [1], [0, 0, 1, 1], [], []>} : vector<16x32xf32>, vector<32x32xf32>, vector<16x32xf32> -> vector<16x32xf32>
    %876 = arith.addf %875, %859 : vector<16x32xf32>
    %c0_200 = arith.constant 0 : index
    %c0_201 = arith.constant 0 : index
    %877 = vector.load %arg15[%c0_200, %c0_201] : memref<1x32xf32, #tpu.memory_space<vmem>>, vector<1x32xf32>
    %878 = vector.broadcast %877 : vector<1x32xf32> to vector<16x32xf32>
    %879 = arith.addf %876, %878 : vector<16x32xf32>
    %880 = math.tanh %879 : vector<16x32xf32>
    %c0_202 = arith.constant 0 : index
    %c0_203 = arith.constant 0 : index
    %881 = vector.load %arg16[%c0_202, %c0_203] : memref<32x32xf32, #tpu.memory_space<vmem>>, vector<32x32xf32>
    %cst_204 = arith.constant dense<0.000000e+00> : vector<16x32xf32>
    %882 = tpu.matmul %880, %881, %cst_204 {dimension_numbers = #tpu.dot_dimension_numbers<[1], [0], [0], [1], [0, 0, 1, 1], [], []>} : vector<16x32xf32>, vector<32x32xf32>, vector<16x32xf32> -> vector<16x32xf32>
    %c0_205 = arith.constant 0 : index
    %c0_206 = arith.constant 0 : index
    %883 = vector.load %arg17[%c0_205, %c0_206] : memref<1x32xf32, #tpu.memory_space<vmem>>, vector<1x32xf32>
    %884 = vector.broadcast %883 : vector<1x32xf32> to vector<16x32xf32>
    %885 = arith.addf %882, %884 : vector<16x32xf32>
    %886 = vector.shape_cast %885 : vector<16x32xf32> to vector<2x8x32xf32>
    %c0_207 = arith.constant 0 : index
    %c0_208 = arith.constant 0 : index
    %c0_209 = arith.constant 0 : index
    %887 = vector.load %arg18[%c0_207, %c0_208, %c0_209] : memref<2x8x32xf32, #tpu.memory_space<vmem>>, vector<2x8x32xf32>
    tpu.vector_store %arg18[%c0_207, %c0_208, %c0_209], %886 {strides = array<i32>} : memref<2x8x32xf32, #tpu.memory_space<vmem>>, vector<2x8x32xf32>,
    return
  }
}

</mosaic_0001>

<bundles_post_ra>
// kernel: simple_attention_forward.1
= control target key start
LH: loop header
LB: loop body
LE: loop exit
PB: predicated region body
PF: predicated region fallthrough
CT: control target
= control target key end

     0   :  { %s4950_s0 = inlined_call_operand.vmem [shape: f32[8,2,16], index: 0, kind: input, shape index: {}]   ;;  %s4951_s1 = inlined_call_operand.vmem [shape: f32[8,2,16], index: 1, kind: input, shape index: {}]   ;;  %s4952_s2 = inlined_call_operand.vmem [shape: f32[16,96], index: 2, kind: input, shape index: {}]   ;;  %s4953_s3 = inlined_call_operand.vmem [shape: f32[1,96], index: 3, kind: input, shape index: {}]   ;;  %s4954_s4 = inlined_call_operand.vmem [shape: bf16[32,96], index: 4, kind: input, shape index: {}]   ;;  %s4955_s5 = inlined_call_operand.vmem [shape: f32[1,96], index: 5, kind: input, shape index: {}]   ;;  %s4956_s6 = inlined_call_operand.vmem [shape: f32[16,96], index: 6, kind: input, shape index: {}]   ;;  %s4957_s7 = inlined_call_operand.vmem [shape: f32[1,96], index: 7, kind: input, shape index: {}]   ;;  %s4958_s8 = inlined_call_operand.vmem [shape: bf16[32,96], index: 8, kind: input, shape index: {}]   ;;  %s4959_s9 = inlined_call_operand.vmem [shape: f32[1,96], index: 9, kind: input, shape index: {}]   ;;  %s4960_s10 = inlined_call_operand.vmem [shape: f32[32,64], index: 10, kind: input, shape index: {}]   ;;  %s4961_s11 = inlined_call_operand.vmem [shape: f32[1,64], index: 11, kind: input, shape index: {}]   ;;  %s4962_s12 = inlined_call_operand.vmem [shape: f32[32,64], index: 12, kind: input, shape index: {}]   ;;  %s4963_s13 = inlined_call_operand.vmem [shape: f32[1,32], index: 13, kind: input, shape index: {}]   ;;  %s4964_s14 = inlined_call_operand.vmem [shape: f32[32,32], index: 14, kind: input, shape index: {}]   ;;  %s4965_s15 = inlined_call_operand.vmem [shape: f32[1,32], index: 15, kind: input, shape index: {}]   ;;  %s4966_s16 = inlined_call_operand.vmem [shape: f32[32,32], index: 16, kind: input, shape index: {}]   ;;  %s4967_s17 = inlined_call_operand.vmem [shape: f32[1,32], index: 17, kind: input, shape index: {}]   ;;  %s4968_s18 = inlined_call_operand.hbm [shape: f32[2,8,32], index: 18, kind: output, shape index: {}]  }
   0x1   :  { %4972 = sst [smem:[#allocation7_spill]] %s4950_s0 }
   0x2   :  { %4973 = sst [smem:[#allocation8_spill]] %s4951_s1 }
   0x3   :  { %4974 = sst [smem:[#allocation9_spill]] %s4952_s2 }
   0x4   :  { %s4975_s29 = sld [smem:[#allocation9_spill]]  ;;  %v91_v3 = vlaneseq  ;;  %v3975_v7 = vmov 1983009808   ;;  %v3976_v20 = vmov 0.0  }
   0x5   :  { %s4976_s20 = sld [smem:[#allocation7_spill]]  ;;  %v89_v8 = vunpack.c.l.s4 %v3975_v7 }
   0x6   :  { %v4101_v10 = vshrl.u32 %v91_v3, 7 }
   0x7   :  { %v90_v14 = vunpack.c.0.s8 %v89_v8 }
   0x9   :  { %v4116_v19 = vsub.s32 %v90_v14, %v4101_v10 }
   0xa   :  { %v70_v0 = vld [vmem:[%s4975_s29 + $0x8] sm:$0xff]  ;;  %v69_v1 = vld [vmem:[%s4975_s29] sm:$0xff] }
   0xb   :  { %v61_v2 = vld [vmem:[%s4976_s20] sm:$0x3]  ;;  %3574 = vmatprep.subr.mxu0 %v70_v0  ;;  %v62_v4 = vld [vmem:[%s4976_s20 + $0x2] sm:$0x3]  ;;  %v63_v5 = vld [vmem:[%s4976_s20 + $0x4] sm:$0x3] }
   0xc   :  { %v64_v6 = vld [vmem:[%s4976_s20 + $0x6] sm:$0x3]  ;;  %3575 = vmatpush3.msra.mxu0 %v70_v0  ;;  %v86_v9 = vcombine.low %v61_v2, %v62_v4  ;;  %v65_v11 = vld [vmem:[%s4976_s20 + $0x8] sm:$0x3]  ;;  %v66_v12 = vld [vmem:[%s4976_s20 + $0xa] sm:$0x3] }
   0xd   :  { %3576 = vmatprep.subr.mxu0 %v69_v1  ;;  %v87_v13 = vcombine.low %v63_v5, %v64_v6  ;;  %v67_v15 = vld [vmem:[%s4976_s20 + $0xc] sm:$0x3]  ;;  %v68_v16 = vld [vmem:[%s4976_s20 + $0xe] sm:$0x3]  ;;  %v103_v17 = vcombine.low %v65_v11, %v66_v12 }
   0xe   :  { %3577 = vmatpush3.msra.mxu0 %v69_v1  ;;  %v104_v18 = vcombine.low %v67_v15, %v68_v16  ;;  %v94_v21 = vrot.slane %v86_v9, %v4116_v19 }
   0xf   :  { %3588 = vmatprep.subr.bf16.mxu0 %v3976_v20  ;;  %v101_v22 = vrot.slane %v87_v13, %v4116_v19  ;;  %v111_v23 = vrot.slane %v103_v17, %v4116_v19 }
  0x10   :  { %v118_v24 = vrot.slane %v104_v18, %v4116_v19 }
  0x11   :  { %23 = vsyncpa [#allocation5], 0  ;;  %vm120_vm0 = vcmask 130048   ;;  %v102_v25 = vcombine.low %v94_v21, %v101_v22  ;;  %v4126_v27 = vld [vmem:[%s4954_s4 + $0x8] sm:$0xff]   ;;  %v4134_v28 = vld [vmem:[%s4954_s4] sm:$0xff]   ;;  %vm3977_vm1 = vmmov 0  }
  0x12   :  { %v119_v26 = vcombine.low %v111_v23, %v118_v24  ;;  %v3978_v29 = vmov 0.0|0.0   ;;  %v4150_v32 = vld [vmem:[%s4955_s5] ss:$0 sm:$0xff]  ;;  %s3979_s24 = smov 96   ;;  %v253_v63 = vld [vmem:[%s4956_s6 + $0x8] sm:$0xff]  ;;  %s4977_s19 = sld [smem:[#allocation8_spill]] }
  0x13   :  { %3578 = vmatprep.mubr.msk.f32.mxu0 %vm120_vm0, %v102_v25  ;;  %v3417_v39 = vld [vmem:[%s4953_s3] ss:$0 sm:$0xff]  ;;  %s3980_s3 = smov 32   ;;  %3581 = vmatprep.subr.mxu1 %v253_v63  ;;  %s3981_s30 = smov 112   ;;  %vm455_vm2 = vcmask 261120   ;;  %vm603_vm3 = vcmask 254080  }
  0x14   :  { %3579 = vmatmul.mubr.msk.f32.vlgmr.msra.gmra.mxu0 %vm120_vm0, %v119_v26  ;;  %v252_v0 = vld [vmem:[%s4956_s6] sm:$0xff]  ;;  %3582 = vmatpush3.msra.mxu1 %v253_v63  ;;  %s3982_s0 = smov 80   ;;  %s3983_s4 = smov 64   ;;  %vm577_vm4 = vcmask 122880   ;;  %vm1946_vm5 = vcmask 253952   ;;  %vm3028_vm6 = vcmask 64512  }
  0x15   :  { %3589 = vmatpush3.bf16.msra.mxu0 %v4126_v27  ;;  %3592 = vmatprep.mubr.msk.bf16.mxu0 %vm3977_vm1, %v3976_v20 }
  0x16   :  { %3590 = vmatprep.subr.bf16.mxu0 %v3976_v20  ;;  %3583 = vmatprep.subr.mxu1 %v252_v0 }
  0x17   :  { %3584 = vmatpush3.msra.mxu1 %v252_v0 }
  0x18   :  { %v244_v1 = vld [vmem:[%s4977_s19] sm:$0x3]  ;;  %v245_v2 = vld [vmem:[%s4977_s19 + $0x2] sm:$0x3]  ;;  %v246_v3 = vld [vmem:[%s4977_s19 + $0x4] sm:$0x3]  ;;  %3596 = vmatprep.subr.bf16.mxu1 %v3976_v20 }
  0x19   :  { %3591 = vmatpush3.bf16.msra.mxu0 %v4134_v28  ;;  %v247_v4 = vld [vmem:[%s4977_s19 + $0x6] sm:$0x3]  ;;  %v269_v5 = vcombine.low %v244_v1, %v245_v2  ;;  %v248_v7 = vld [vmem:[%s4977_s19 + $0x8] sm:$0x3]  ;;  %v249_v8 = vld [vmem:[%s4977_s19 + $0xa] sm:$0x3] }
  0x1a   :  { %3604 = vmatprep.subr.bf16.mxu0 %v3976_v20  ;;  %v270_v6 = vcombine.low %v246_v3, %v247_v4  ;;  %v250_v9 = vld [vmem:[%s4977_s19 + $0xc] sm:$0x3]  ;;  %v251_v11 = vld [vmem:[%s4977_s19 + $0xe] sm:$0x3]  ;;  %v286_v12 = vcombine.low %v248_v7, %v249_v8 }
  0x1b   :  { %v277_v13 = vrot.slane %v269_v5, %v4116_v19  ;;  %v287_v15 = vcombine.low %v250_v9, %v251_v11 }
  0x1c   :  { %3593 = vmatmul.mubr.bf16.vlgmr.msra.gmra.mxu0 %v3978_v29  ;;  %v284_v14 = vrot.slane %v270_v6, %v4116_v19  ;;  %v294_v17 = vrot.slane %v286_v12, %v4116_v19 }
  0x1d   :  { %3605 = vmatpush3.bf16.msra.mxu0 %v4126_v27  ;;  %3608 = vmatprep.mubr.msk.bf16.mxu0 %vm3977_vm1, %v3976_v20  ;;  %v301_v22 = vrot.slane %v287_v15, %v4116_v19 }
  0x1e   :  { %3606 = vmatprep.subr.bf16.mxu0 %v3976_v20  ;;  %v285_v21 = vcombine.low %v277_v13, %v284_v14 }
  0x1f   :  { %v302_v23 = vcombine.low %v294_v17, %v301_v22 }
  0x20   :  { %3585 = vmatprep.mubr.msk.f32.mxu1 %vm120_vm0, %v285_v21 }
  0x21   :  { %3607 = vmatpush3.bf16.msra.mxu0 %v4134_v28  ;;  %3586 = vmatmul.mubr.msk.f32.vlgmr.msra.gmra.mxu1 %vm120_vm0, %v302_v23 }
  0x22   :  { %3620 = vmatprep.subr.bf16.mxu0 %v3976_v20  ;;  %3597 = vmatpush3.bf16.msra.mxu1 %v4126_v27 }
  0x23   :  { %3600 = vmatprep.mubr.msk.bf16.mxu1 %vm3977_vm1, %v3976_v20  ;;  %3598 = vmatprep.subr.bf16.mxu1 %v3976_v20 }
  0x26   :  { %3599 = vmatpush3.bf16.msra.mxu1 %v4134_v28 }
  0x27   :  { %3612 = vmatprep.subr.bf16.mxu1 %v3976_v20 }
  0xd4   :  { %v3580_v30 = vpop.f32.mrf.mxu0 }
  0xd5   :  { %v4158_v40 = vadd.f32 %v3580_v30, %v3417_v39 }
  0xd6   :  { %v191_v31 = vpop.f32.mrf.mxu0 }
  0xd7   :  { %v219_v41 = vcombine.high %v4158_v40, %v4158_v40  ;;  %v4165_v43 = vadd.f32 %v3417_v39, %v191_v31  ;;  %v4239_v39 = vld [vmem:[%s4957_s7] ss:$0 sm:$0xff] }
  0xd9   :  { %v4163_v42 = vrot.slane %v219_v41, %v4116_v19  ;;  %v4173_v45 = vrot.slane %v4165_v43, %v4116_v19 }
  0xdb   :  { %v4169_v44 = vcombine.high %v4163_v42, %v4163_v42 }
  0xdc   :  { %v493_v33 = vpop.f32.mrf.mxu0 }
  0xdd   :  { %v494_v34 = vadd.f32 %v4150_v32, %v493_v33 }
  0xde   :  { %v3594_v35 = vpop.f32.mrf.mxu0 }
  0xdf   :  { %v513_v36 = vrot.slane %v494_v34, %v4116_v19  ;;  %v499_v46 = vadd.f32 %v494_v34, %v4173_v45  ;;  %v532_v47 = vadd.f32 %v494_v34, %v4169_v44 }
  0xe0   :  { %v496_v37 = vpop.f32.mrf.mxu0 }
  0xe1   :  { %514 = vrot.lane.b32.xlu0 %v513_v36, %s3979_s24  ;;  %v3426_v48 = vmul.f32 -1.442695, %v499_v46  ;;  %v3427_v49 = vmul.f32 -1.442695, %v532_v47  ;;  %v3587_v41 = vpop.f32.mrf.mxu1 }
  0xe2   :  { %v3595_v38 = vpop.f32.mrf.mxu0  ;;  %v4242_v46 = vadd.f32 %v3587_v41, %v4239_v39 }
  0xe3   :  { %3797 = vpow2.f32 %v3426_v48 }
  0xe4   :  { %3799 = vpow2.f32 %v3427_v49 }
  0xf0   :  { %v3798_v50 = vpop.eup %3797 }
  0xf1   :  { %v3800_v51 = vpop.eup %3799  ;;  %v503_v52 = vadd.f32 1.0, %v3798_v50 }
  0xf2   :  { %v536_v53 = vadd.f32 1.0, %v3800_v51  ;;  %v4252_v51 = vpop.f32.mrf.mxu1 }
  0xf3   :  { %3801 = vrcp.f32 %v503_v52 }
  0xf4   :  { %3803 = vrcp.f32 %v536_v53 }
 0x100   :  { %v3802_v54 = vpop.eup %3801 }
 0x101   :  { %v3804_v55 = vpop.eup %3803  ;;  %v524_v25 = vsub.f32 1.0, %v3802_v54  ;;  %v530_v33 = vmul.f32 0.0, %v3802_v54 }
 0x102   :  { %v546_v24 = vsub.f32 1.0, %v3804_v55  ;;  %v552_v30 = vmul.f32 0.0, %v3804_v55 }
 0x153   :  { %v515_v56 = vpop.permute.xlu0 %514 }
 0x154   :  { %v517_v57 = vmul.f32 %v3802_v54, %v515_v56  ;;  %v539_v58 = vmul.f32 %v3804_v55, %v515_v56 }
 0x156   :  { %541 = vrot.lane.b32.xlu1 %v539_v58, %s3980_s3  ;;  %519 = vrot.lane.b32.xlu0 %v517_v57, %s3980_s3  ;;  %v4259_v58 = vcombine.high %v4173_v45, %v4173_v45 }
 0x1c8   :  { %v542_v59 = vpop.permute.xlu1 %541  ;;  %v520_v60 = vpop.permute.xlu0 %519 }
 0x1c9   :  { %v544_v61 = vadd.f32 %v542_v59, %v4169_v44  ;;  %v522_v62 = vadd.f32 %v520_v60, %v4173_v45 }
 0x1cb   :  { %3805 = vtanh.f32 %v544_v61 }
 0x1cc   :  { %3807 = vtanh.f32 %v522_v62 }
 0x1d8   :  { %v3806_v16 = vpop.eup %3805 }
 0x1d9   :  { %v3808_v18 = vpop.eup %3807  ;;  %548 = vrot.lane.b32.xlu0 %v3806_v16, %s3981_s30 }
 0x1da   :  { %526 = vrot.lane.b32.xlu1 %v3808_v18, %s3981_s30 }
 0x24b   :  { %v549_v26 = vpop.permute.xlu0 %548 }
 0x24c   :  { %v527_v29 = vpop.permute.xlu1 %526  ;;  %v551_v31 = vmul.f32 %v549_v26, %v546_v24 }
 0x24d   :  { %v529_v34 = vmul.f32 %v527_v29, %v524_v25 }
 0x24e   :  { %v4226_v35 = vadd.f32 %v552_v30, %v551_v31 }
 0x24f   :  { %v4228_v36 = vadd.f32 %v530_v33, %v529_v34 }
 0x250   :  { %v622_v37 = vrot.slane %v4226_v35, %v4116_v19 }
 0x251   :  { %v612_v38 = vrot.slane %v4228_v36, %v4116_v19 }
 0x252   :  { %623 = vrot.lane.b32.xlu0 %v622_v37, %s3982_s0 }
 0x253   :  { %613 = vrot.lane.b32.xlu1 %v612_v38, %s3981_s30 }
 0x2c4   :  { %v624_v47 = vpop.permute.xlu0 %623 }
 0x2c5   :  { %v614_v48 = vpop.permute.xlu1 %613 }
 0x2c6   :  { %v626_v49 = vsel %vm120_vm0, %v614_v48, %v624_v47 }
 0x2c7   :  { %v627_v50 = vpack.c.bf16 %v626_v49, %v626_v49 }
 0x2c9   :  { %3601 = vmatmul.mubr.msk.bf16.vlgmr.msra.gmra.mxu1 %vm455_vm2, %v627_v50 }
 0x2ca   :  { %3613 = vmatpush3.bf16.msra.mxu1 %v4126_v27  ;;  %3616 = vmatprep.mubr.msk.bf16.mxu1 %vm3977_vm1, %v3976_v20 }
 0x2cb   :  { %3614 = vmatprep.subr.bf16.mxu1 %v3976_v20 }
 0x2ce   :  { %3615 = vmatpush3.bf16.msra.mxu1 %v4134_v28 }
 0x2cf   :  { %3628 = vmatprep.subr.bf16.mxu1 %v3976_v20 }
 0x389   :  { %v665_v52 = vpop.f32.mrf.mxu1 }
 0x38a   :  { %v666_v53 = vadd.f32 %v4150_v32, %v665_v52  ;;  %v202_v52 = vcombine.high %v4165_v43, %v4165_v43 }
 0x38b   :  { %v3602_v54 = vpop.f32.mrf.mxu1 }
 0x38c   :  { %v685_v55 = vrot.slane %v666_v53, %v4116_v19  ;;  %v671_v59 = vadd.f32 %v666_v53, %v4259_v58  ;;  %v704_v60 = vadd.f32 %v666_v53, %v4163_v42  ;;  %v4296_v53 = vrot.slane %v4158_v40, %v4116_v19 }
 0x38d   :  { %v668_v56 = vpop.f32.mrf.mxu1  ;;  %v4299_v54 = vrot.slane %v202_v52, %v4116_v19 }
 0x38e   :  { %686 = vrot.lane.b32.xlu1 %v685_v55, %s3979_s24  ;;  %v3429_v61 = vmul.f32 -1.442695, %v671_v59  ;;  %v3430_v62 = vmul.f32 -1.442695, %v704_v60  ;;  %v4303_v55 = vcombine.high %v4296_v53, %v4296_v53 }
 0x38f   :  { %v3603_v57 = vpop.f32.mrf.mxu1 }
 0x390   :  { %3809 = vpow2.f32 %v3429_v61 }
 0x391   :  { %3811 = vpow2.f32 %v3430_v62 }
 0x39d   :  { %v3810_v63 = vpop.eup %3809 }
 0x39e   :  { %v3812_v0 = vpop.eup %3811  ;;  %v675_v1 = vadd.f32 1.0, %v3810_v63 }
 0x39f   :  { %v708_v2 = vadd.f32 1.0, %v3812_v0 }
 0x3a0   :  { %3813 = vrcp.f32 %v675_v1 }
 0x3a1   :  { %3815 = vrcp.f32 %v708_v2 }
 0x3ad   :  { %v3814_v3 = vpop.eup %3813 }
 0x3ae   :  { %v3816_v4 = vpop.eup %3815  ;;  %v696_v17 = vsub.f32 1.0, %v3814_v3  ;;  %v702_v23 = vmul.f32 %v3814_v3, %v4228_v36 }
 0x3af   :  { %v718_v15 = vsub.f32 1.0, %v3816_v4  ;;  %v724_v18 = vmul.f32 %v3816_v4, %v4226_v35 }
 0x400   :  { %v687_v5 = vpop.permute.xlu1 %686 }
 0x401   :  { %v689_v6 = vmul.f32 %v3814_v3, %v687_v5  ;;  %v711_v7 = vmul.f32 %v3816_v4, %v687_v5 }
 0x403   :  { %713 = vrot.lane.b32.xlu1 %v711_v7, %s3980_s3  ;;  %691 = vrot.lane.b32.xlu0 %v689_v6, %s3980_s3 }
 0x475   :  { %v714_v8 = vpop.permute.xlu1 %713  ;;  %v692_v9 = vpop.permute.xlu0 %691 }
 0x476   :  { %v716_v11 = vadd.f32 %v714_v8, %v4163_v42  ;;  %v694_v12 = vadd.f32 %v692_v9, %v4259_v58 }
 0x478   :  { %3817 = vtanh.f32 %v716_v11 }
 0x479   :  { %3819 = vtanh.f32 %v694_v12 }
 0x485   :  { %v3818_v13 = vpop.eup %3817 }
 0x486   :  { %v3820_v14 = vpop.eup %3819  ;;  %720 = vrot.lane.b32.xlu1 %v3818_v13, %s3981_s30 }
 0x487   :  { %698 = vrot.lane.b32.xlu0 %v3820_v14, %s3981_s30 }
 0x4f8   :  { %v721_v16 = vpop.permute.xlu1 %720 }
 0x4f9   :  { %v723_v21 = vmul.f32 %v721_v16, %v718_v15  ;;  %v699_v22 = vpop.permute.xlu0 %698 }
 0x4fa   :  { %v701_v24 = vmul.f32 %v699_v22, %v696_v17 }
 0x4fb   :  { %v4271_v25 = vadd.f32 %v724_v18, %v723_v21 }
 0x4fc   :  { %v4273_v26 = vadd.f32 %v702_v23, %v701_v24 }
 0x4fd   :  { %v792_v29 = vrot.slane %v4271_v25, %v4116_v19 }
 0x4fe   :  { %v782_v30 = vrot.slane %v4273_v26, %v4116_v19 }
 0x4ff   :  { %793 = vrot.lane.b32.xlu1 %v792_v29, %s3982_s0 }
 0x500   :  { %783 = vrot.lane.b32.xlu0 %v782_v30, %s3981_s30 }
 0x571   :  { %v794_v31 = vpop.permute.xlu1 %793 }
 0x572   :  { %v784_v33 = vpop.permute.xlu0 %783 }
 0x573   :  { %v796_v34 = vsel %vm120_vm0, %v784_v33, %v794_v31 }
 0x574   :  { %v797_v37 = vpack.c.bf16 %v796_v34, %v796_v34 }
 0x576   :  { %3609 = vmatmul.mubr.msk.bf16.vlgmr.msra.gmra.mxu0 %vm455_vm2, %v797_v37 }
 0x577   :  { %3621 = vmatpush3.bf16.msra.mxu0 %v4126_v27  ;;  %3624 = vmatprep.mubr.msk.bf16.mxu0 %vm3977_vm1, %v3976_v20 }
 0x578   :  { %3622 = vmatprep.subr.bf16.mxu0 %v3976_v20 }
 0x57b   :  { %3623 = vmatpush3.bf16.msra.mxu0 %v4134_v28 }
 0x57c   :  { %3636 = vmatprep.subr.bf16.mxu0 %v3976_v20 }
 0x636   :  { %v835_v38 = vpop.f32.mrf.mxu0 }
 0x637   :  { %v836_v41 = vadd.f32 %v4150_v32, %v835_v38 }
 0x638   :  { %v3610_v47 = vpop.f32.mrf.mxu0 }
 0x639   :  { %v855_v48 = vrot.slane %v836_v41, %v4116_v19  ;;  %v841_v56 = vadd.f32 %v836_v41, %v4299_v54  ;;  %v874_v57 = vadd.f32 %v836_v41, %v4303_v55 }
 0x63a   :  { %v838_v49 = vpop.f32.mrf.mxu0 }
 0x63b   :  { %856 = vrot.lane.b32.xlu0 %v855_v48, %s3979_s24  ;;  %v3432_v59 = vmul.f32 -1.442695, %v841_v56  ;;  %v3433_v60 = vmul.f32 -1.442695, %v874_v57  ;;  %v4338_v49 = vcombine.high %v4299_v54, %v4299_v54 }
 0x63c   :  { %v3611_v50 = vpop.f32.mrf.mxu0 }
 0x63d   :  { %3821 = vpow2.f32 %v3432_v59 }
 0x63e   :  { %3823 = vpow2.f32 %v3433_v60 }
 0x64a   :  { %v3822_v43 = vpop.eup %3821 }
 0x64b   :  { %v3824_v61 = vpop.eup %3823  ;;  %v845_v62 = vadd.f32 1.0, %v3822_v43 }
 0x64c   :  { %v878_v40 = vadd.f32 1.0, %v3824_v61 }
 0x64d   :  { %3825 = vrcp.f32 %v845_v62 }
 0x64e   :  { %3827 = vrcp.f32 %v878_v40 }
 0x65a   :  { %v3826_v63 = vpop.eup %3825 }
 0x65b   :  { %v3828_v0 = vpop.eup %3827  ;;  %v866_v13 = vsub.f32 1.0, %v3826_v63  ;;  %v872_v17 = vmul.f32 %v3826_v63, %v4273_v26 }
 0x65c   :  { %v888_v11 = vsub.f32 1.0, %v3828_v0  ;;  %v894_v14 = vmul.f32 %v3828_v0, %v4271_v25 }
 0x6ad   :  { %v857_v1 = vpop.permute.xlu0 %856 }
 0x6ae   :  { %v859_v2 = vmul.f32 %v3826_v63, %v857_v1  ;;  %v881_v3 = vmul.f32 %v3828_v0, %v857_v1 }
 0x6b0   :  { %883 = vrot.lane.b32.xlu0 %v881_v3, %s3980_s3  ;;  %861 = vrot.lane.b32.xlu1 %v859_v2, %s3980_s3 }
 0x722   :  { %v884_v4 = vpop.permute.xlu0 %883  ;;  %v862_v5 = vpop.permute.xlu1 %861 }
 0x723   :  { %v886_v6 = vadd.f32 %v884_v4, %v4303_v55  ;;  %v864_v7 = vadd.f32 %v862_v5, %v4299_v54 }
 0x725   :  { %3829 = vtanh.f32 %v886_v6 }
 0x726   :  { %3831 = vtanh.f32 %v864_v7 }
 0x732   :  { %v3830_v8 = vpop.eup %3829 }
 0x733   :  { %v3832_v9 = vpop.eup %3831  ;;  %890 = vrot.lane.b32.xlu0 %v3830_v8, %s3981_s30 }
 0x734   :  { %868 = vrot.lane.b32.xlu1 %v3832_v9, %s3981_s30 }
 0x7a5   :  { %v891_v12 = vpop.permute.xlu0 %890 }
 0x7a6   :  { %v893_v15 = vmul.f32 %v891_v12, %v888_v11  ;;  %v869_v16 = vpop.permute.xlu1 %868 }
 0x7a7   :  { %v871_v18 = vmul.f32 %v869_v16, %v866_v13 }
 0x7a8   :  { %v4315_v21 = vadd.f32 %v894_v14, %v893_v15 }
 0x7a9   :  { %v4317_v22 = vadd.f32 %v872_v17, %v871_v18 }
 0x7aa   :  { %v962_v23 = vrot.slane %v4315_v21, %v4116_v19 }
 0x7ab   :  { %v952_v24 = vrot.slane %v4317_v22, %v4116_v19 }
 0x7ac   :  { %963 = vrot.lane.b32.xlu0 %v962_v23, %s3982_s0 }
 0x7ad   :  { %953 = vrot.lane.b32.xlu1 %v952_v24, %s3981_s30 }
 0x81e   :  { %v964_v29 = vpop.permute.xlu0 %963 }
 0x81f   :  { %v954_v30 = vpop.permute.xlu1 %953 }
 0x820   :  { %v966_v31 = vsel %vm120_vm0, %v954_v30, %v964_v29 }
 0x821   :  { %v967_v33 = vpack.c.bf16 %v966_v31, %v966_v31 }
 0x823   :  { %3617 = vmatmul.mubr.msk.bf16.vlgmr.msra.gmra.mxu1 %vm455_vm2, %v967_v33 }
 0x824   :  { %3629 = vmatpush3.bf16.msra.mxu1 %v4126_v27  ;;  %3632 = vmatprep.mubr.msk.bf16.mxu1 %vm3977_vm1, %v3976_v20 }
 0x825   :  { %3630 = vmatprep.subr.bf16.mxu1 %v3976_v20 }
 0x828   :  { %3631 = vmatpush3.bf16.msra.mxu1 %v4134_v28 }
 0x829   :  { %3644 = vmatprep.subr.bf16.mxu1 %v3976_v20 }
 0x8e3   :  { %v1005_v34 = vpop.f32.mrf.mxu1 }
 0x8e4   :  { %v1006_v37 = vadd.f32 %v4150_v32, %v1005_v34 }
 0x8e5   :  { %v3618_v38 = vpop.f32.mrf.mxu1 }
 0x8e6   :  { %v1025_v41 = vrot.slane %v1006_v37, %v4116_v19  ;;  %v1011_v50 = vadd.f32 %v1006_v37, %v4338_v49  ;;  %v1044_v52 = vadd.f32 %v1006_v37, %v4296_v53 }
 0x8e7   :  { %v1008_v47 = vpop.f32.mrf.mxu1 }
 0x8e8   :  { %1026 = vrot.lane.b32.xlu1 %v1025_v41, %s3979_s24  ;;  %v3435_v56 = vmul.f32 -1.442695, %v1011_v50  ;;  %v3436_v57 = vmul.f32 -1.442695, %v1044_v52 }
 0x8e9   :  { %v3619_v48 = vpop.f32.mrf.mxu1 }
 0x8ea   :  { %3833 = vpow2.f32 %v3435_v56 }
 0x8eb   :  { %3835 = vpow2.f32 %v3436_v57 }
 0x8f7   :  { %v3834_v59 = vpop.eup %3833 }
 0x8f8   :  { %v3836_v60 = vpop.eup %3835  ;;  %v1015_v43 = vadd.f32 1.0, %v3834_v59 }
 0x8f9   :  { %v1048_v61 = vadd.f32 1.0, %v3836_v60 }
 0x8fa   :  { %3837 = vrcp.f32 %v1015_v43 }
 0x8fb   :  { %3839 = vrcp.f32 %v1048_v61 }
 0x907   :  { %v3838_v62 = vpop.eup %3837 }
 0x908   :  { %v3840_v40 = vpop.eup %3839  ;;  %v1036_v11 = vsub.f32 1.0, %v3838_v62  ;;  %v1042_v15 = vmul.f32 %v3838_v62, %v4317_v22 }
 0x909   :  { %v1058_v8 = vsub.f32 1.0, %v3840_v40  ;;  %v1064_v12 = vmul.f32 %v3840_v40, %v4315_v21 }
 0x95a   :  { %v1027_v63 = vpop.permute.xlu1 %1026 }
 0x95b   :  { %v1029_v0 = vmul.f32 %v3838_v62, %v1027_v63  ;;  %v1051_v1 = vmul.f32 %v3840_v40, %v1027_v63 }
 0x95d   :  { %1053 = vrot.lane.b32.xlu1 %v1051_v1, %s3980_s3  ;;  %1031 = vrot.lane.b32.xlu0 %v1029_v0, %s3980_s3 }
 0x9cf   :  { %v1054_v2 = vpop.permute.xlu1 %1053  ;;  %v1032_v3 = vpop.permute.xlu0 %1031 }
 0x9d0   :  { %v1056_v4 = vadd.f32 %v1054_v2, %v4296_v53  ;;  %v1034_v5 = vadd.f32 %v1032_v3, %v4338_v49 }
 0x9d2   :  { %3841 = vtanh.f32 %v1056_v4 }
 0x9d3   :  { %3843 = vtanh.f32 %v1034_v5 }
 0x9df   :  { %v3842_v6 = vpop.eup %3841 }
 0x9e0   :  { %v3844_v7 = vpop.eup %3843  ;;  %1060 = vrot.lane.b32.xlu1 %v3842_v6, %s3981_s30 }
 0x9e1   :  { %1038 = vrot.lane.b32.xlu0 %v3844_v7, %s3981_s30 }
 0xa52   :  { %v1061_v9 = vpop.permute.xlu1 %1060 }
 0xa53   :  { %v1063_v13 = vmul.f32 %v1061_v9, %v1058_v8  ;;  %v1039_v14 = vpop.permute.xlu0 %1038 }
 0xa54   :  { %v1041_v16 = vmul.f32 %v1039_v14, %v1036_v11 }
 0xa55   :  { %v4350_v17 = vadd.f32 %v1064_v12, %v1063_v13 }
 0xa56   :  { %v4352_v18 = vadd.f32 %v1042_v15, %v1041_v16 }
 0xa57   :  { %v1132_v23 = vrot.slane %v4350_v17, %v4116_v19 }
 0xa58   :  { %v1122_v24 = vrot.slane %v4352_v18, %v4116_v19 }
 0xa59   :  { %1133 = vrot.lane.b32.xlu1 %v1132_v23, %s3982_s0 }
 0xa5a   :  { %1123 = vrot.lane.b32.xlu0 %v1122_v24, %s3981_s30 }
 0xacb   :  { %v1134_v29 = vpop.permute.xlu1 %1133 }
 0xacc   :  { %v1124_v30 = vpop.permute.xlu0 %1123 }
 0xacd   :  { %v1136_v31 = vsel %vm120_vm0, %v1124_v30, %v1134_v29 }
 0xace   :  { %v1137_v33 = vpack.c.bf16 %v1136_v31, %v1136_v31 }
 0xad0   :  { %3625 = vmatmul.mubr.msk.bf16.vlgmr.msra.gmra.mxu0 %vm455_vm2, %v1137_v33 }
 0xad1   :  { %3637 = vmatpush3.bf16.msra.mxu0 %v4126_v27  ;;  %3640 = vmatprep.mubr.msk.bf16.mxu0 %vm3977_vm1, %v3976_v20 }
 0xad2   :  { %3638 = vmatprep.subr.bf16.mxu0 %v3976_v20 }
 0xad5   :  { %3639 = vmatpush3.bf16.msra.mxu0 %v4134_v28 }
 0xad6   :  { %3652 = vmatprep.subr.bf16.mxu0 %v3976_v20 }
 0xb90   :  { %v1175_v34 = vpop.f32.mrf.mxu0 }
 0xb91   :  { %v1176_v37 = vadd.f32 %v4150_v32, %v1175_v34 }
 0xb92   :  { %v3626_v38 = vpop.f32.mrf.mxu0 }
 0xb93   :  { %v1195_v41 = vrot.slane %v1176_v37, %v4116_v19  ;;  %v1181_v50 = vadd.f32 %v1176_v37, %v4296_v53  ;;  %v1214_v52 = vadd.f32 %v1176_v37, %v4338_v49 }
 0xb94   :  { %v1178_v47 = vpop.f32.mrf.mxu0 }
 0xb95   :  { %1196 = vrot.lane.b32.xlu0 %v1195_v41, %s3979_s24  ;;  %v3438_v56 = vmul.f32 -1.442695, %v1181_v50  ;;  %v3439_v57 = vmul.f32 -1.442695, %v1214_v52 }
 0xb96   :  { %v3627_v48 = vpop.f32.mrf.mxu0 }
 0xb97   :  { %3845 = vpow2.f32 %v3438_v56 }
 0xb98   :  { %3847 = vpow2.f32 %v3439_v57 }
 0xba4   :  { %v3846_v59 = vpop.eup %3845 }
 0xba5   :  { %v3848_v60 = vpop.eup %3847  ;;  %v1185_v43 = vadd.f32 1.0, %v3846_v59 }
 0xba6   :  { %v1218_v61 = vadd.f32 1.0, %v3848_v60 }
 0xba7   :  { %3849 = vrcp.f32 %v1185_v43 }
 0xba8   :  { %3851 = vrcp.f32 %v1218_v61 }
 0xbb4   :  { %v3850_v62 = vpop.eup %3849 }
 0xbb5   :  { %v3852_v40 = vpop.eup %3851  ;;  %v1206_v11 = vsub.f32 1.0, %v3850_v62  ;;  %v1212_v15 = vmul.f32 %v3850_v62, %v4352_v18 }
 0xbb6   :  { %v1228_v8 = vsub.f32 1.0, %v3852_v40  ;;  %v1234_v12 = vmul.f32 %v3852_v40, %v4350_v17 }
 0xc07   :  { %v1197_v63 = vpop.permute.xlu0 %1196 }
 0xc08   :  { %v1199_v0 = vmul.f32 %v3850_v62, %v1197_v63  ;;  %v1221_v1 = vmul.f32 %v3852_v40, %v1197_v63 }
 0xc0a   :  { %1223 = vrot.lane.b32.xlu0 %v1221_v1, %s3980_s3  ;;  %1201 = vrot.lane.b32.xlu1 %v1199_v0, %s3980_s3 }
 0xc7c   :  { %v1224_v2 = vpop.permute.xlu0 %1223  ;;  %v1202_v3 = vpop.permute.xlu1 %1201 }
 0xc7d   :  { %v1226_v4 = vadd.f32 %v1224_v2, %v4338_v49  ;;  %v1204_v5 = vadd.f32 %v1202_v3, %v4296_v53 }
 0xc7f   :  { %3853 = vtanh.f32 %v1226_v4 }
 0xc80   :  { %3855 = vtanh.f32 %v1204_v5 }
 0xc8c   :  { %v3854_v6 = vpop.eup %3853 }
 0xc8d   :  { %v3856_v7 = vpop.eup %3855  ;;  %1230 = vrot.lane.b32.xlu0 %v3854_v6, %s3981_s30 }
 0xc8e   :  { %1208 = vrot.lane.b32.xlu1 %v3856_v7, %s3981_s30 }
 0xcff   :  { %v1231_v9 = vpop.permute.xlu0 %1230 }
 0xd00   :  { %v1233_v13 = vmul.f32 %v1231_v9, %v1228_v8  ;;  %v1209_v14 = vpop.permute.xlu1 %1208 }
 0xd01   :  { %v1211_v49 = vmul.f32 %v1209_v14, %v1206_v11 }
 0xd02   :  { %v4381_v16 = vadd.f32 %v1234_v12, %v1233_v13 }
 0xd03   :  { %v4383_v53 = vadd.f32 %v1212_v15, %v1211_v49 }
 0xd04   :  { %v1302_v23 = vrot.slane %v4381_v16, %v4116_v19 }
 0xd05   :  { %v1292_v24 = vrot.slane %v4383_v53, %v4116_v19 }
 0xd06   :  { %1303 = vrot.lane.b32.xlu0 %v1302_v23, %s3982_s0 }
 0xd07   :  { %1293 = vrot.lane.b32.xlu1 %v1292_v24, %s3981_s30 }
 0xd78   :  { %v1304_v29 = vpop.permute.xlu0 %1303 }
 0xd79   :  { %v1294_v30 = vpop.permute.xlu1 %1293 }
 0xd7a   :  { %v1306_v31 = vsel %vm120_vm0, %v1294_v30, %v1304_v29 }
 0xd7b   :  { %v1307_v33 = vpack.c.bf16 %v1306_v31, %v1306_v31 }
 0xd7d   :  { %3633 = vmatmul.mubr.msk.bf16.vlgmr.msra.gmra.mxu1 %vm455_vm2, %v1307_v33 }
 0xd7e   :  { %3645 = vmatpush3.bf16.msra.mxu1 %v4126_v27  ;;  %3648 = vmatprep.mubr.msk.bf16.mxu1 %vm3977_vm1, %v3976_v20 }
 0xd7f   :  { %3646 = vmatprep.subr.bf16.mxu1 %v3976_v20 }
 0xd82   :  { %3647 = vmatpush3.bf16.msra.mxu1 %v4134_v28 }
 0xd83   :  { %3660 = vmatprep.subr.bf16.mxu1 %v3976_v20 }
 0xe3d   :  { %v1345_v34 = vpop.f32.mrf.mxu1 }
 0xe3e   :  { %v1346_v37 = vadd.f32 %v4150_v32, %v1345_v34 }
 0xe3f   :  { %v3634_v38 = vpop.f32.mrf.mxu1 }
 0xe40   :  { %v1365_v41 = vrot.slane %v1346_v37, %v4116_v19  ;;  %v1351_v27 = vadd.f32 %v1346_v37, %v4303_v55  ;;  %v1384_v50 = vadd.f32 %v1346_v37, %v4299_v54 }
 0xe41   :  { %v1348_v47 = vpop.f32.mrf.mxu1 }
 0xe42   :  { %1366 = vrot.lane.b32.xlu1 %v1365_v41, %s3979_s24  ;;  %v3441_v52 = vmul.f32 -1.442695, %v1351_v27  ;;  %v3442_v56 = vmul.f32 -1.442695, %v1384_v50 }
 0xe43   :  { %v3635_v48 = vpop.f32.mrf.mxu1 }
 0xe44   :  { %3857 = vpow2.f32 %v3441_v52 }
 0xe45   :  { %3859 = vpow2.f32 %v3442_v56 }
 0xe51   :  { %v3858_v28 = vpop.eup %3857 }
 0xe52   :  { %v3860_v57 = vpop.eup %3859  ;;  %v1355_v59 = vadd.f32 1.0, %v3858_v28 }
 0xe53   :  { %v1388_v60 = vadd.f32 1.0, %v3860_v57 }
 0xe54   :  { %3861 = vrcp.f32 %v1355_v59 }
 0xe55   :  { %3863 = vrcp.f32 %v1388_v60 }
 0xe61   :  { %v3862_v43 = vpop.eup %3861 }
 0xe62   :  { %v3864_v61 = vpop.eup %3863  ;;  %v1376_v8 = vsub.f32 1.0, %v3862_v43  ;;  %v1382_v13 = vmul.f32 %v3862_v43, %v4383_v53 }
 0xe63   :  { %v1398_v6 = vsub.f32 1.0, %v3864_v61  ;;  %v1404_v9 = vmul.f32 %v3864_v61, %v4381_v16 }
 0xeb4   :  { %v1367_v62 = vpop.permute.xlu1 %1366 }
 0xeb5   :  { %v1369_v40 = vmul.f32 %v3862_v43, %v1367_v62  ;;  %v1391_v63 = vmul.f32 %v3864_v61, %v1367_v62 }
 0xeb7   :  { %1393 = vrot.lane.b32.xlu1 %v1391_v63, %s3980_s3  ;;  %1371 = vrot.lane.b32.xlu0 %v1369_v40, %s3980_s3 }
 0xf29   :  { %v1394_v0 = vpop.permute.xlu1 %1393  ;;  %v1372_v1 = vpop.permute.xlu0 %1371 }
 0xf2a   :  { %v1396_v2 = vadd.f32 %v1394_v0, %v4299_v54  ;;  %v1374_v3 = vadd.f32 %v1372_v1, %v4303_v55 }
 0xf2c   :  { %3865 = vtanh.f32 %v1396_v2 }
 0xf2d   :  { %3867 = vtanh.f32 %v1374_v3 }
 0xf39   :  { %v3866_v4 = vpop.eup %3865 }
 0xf3a   :  { %v3868_v5 = vpop.eup %3867  ;;  %1400 = vrot.lane.b32.xlu1 %v3866_v4, %s3981_s30 }
 0xf3b   :  { %1378 = vrot.lane.b32.xlu0 %v3868_v5, %s3981_s30 }
 0xfac   :  { %v1401_v7 = vpop.permute.xlu1 %1400 }
 0xfad   :  { %v1403_v11 = vmul.f32 %v1401_v7, %v1398_v6  ;;  %v1379_v12 = vpop.permute.xlu0 %1378 }
 0xfae   :  { %v1381_v54 = vmul.f32 %v1379_v12, %v1376_v8 }
 0xfaf   :  { %v4412_v14 = vadd.f32 %v1404_v9, %v1403_v11 }
 0xfb0   :  { %v4414_v55 = vadd.f32 %v1382_v13, %v1381_v54 }
 0xfb1   :  { %v1472_v15 = vrot.slane %v4412_v14, %v4116_v19 }
 0xfb2   :  { %v1462_v49 = vrot.slane %v4414_v55, %v4116_v19 }
 0xfb3   :  { %1473 = vrot.lane.b32.xlu1 %v1472_v15, %s3982_s0 }
 0xfb4   :  { %1463 = vrot.lane.b32.xlu0 %v1462_v49, %s3981_s30 }
0x1025   :  { %v1474_v23 = vpop.permute.xlu1 %1473 }
0x1026   :  { %v1464_v24 = vpop.permute.xlu0 %1463 }
0x1027   :  { %v1476_v29 = vsel %vm120_vm0, %v1464_v24, %v1474_v23 }
0x1028   :  { %v1477_v30 = vpack.c.bf16 %v1476_v29, %v1476_v29 }
0x102a   :  { %3641 = vmatmul.mubr.msk.bf16.vlgmr.msra.gmra.mxu0 %vm455_vm2, %v1477_v30 }
0x102b   :  { %3656 = vmatprep.mubr.msk.bf16.mxu0 %vm3977_vm1, %v3976_v20 }
0x10ea   :  { %v1515_v31 = vpop.f32.mrf.mxu0 }
0x10eb   :  { %v1516_v33 = vadd.f32 %v4150_v32, %v1515_v31 }
0x10ec   :  { %v3642_v34 = vpop.f32.mrf.mxu0 }
0x10ed   :  { %v1535_v37 = vrot.slane %v1516_v33, %v4116_v19  ;;  %v1521_v47 = vadd.f32 %v1516_v33, %v4163_v42  ;;  %v1554_v48 = vadd.f32 %v1516_v33, %v4259_v58 }
0x10ee   :  { %v1518_v38 = vpop.f32.mrf.mxu0 }
0x10ef   :  { %1536 = vrot.lane.b32.xlu0 %v1535_v37, %s3979_s24  ;;  %v3444_v27 = vmul.f32 -1.442695, %v1521_v47  ;;  %v3445_v50 = vmul.f32 -1.442695, %v1554_v48 }
0x10f0   :  { %v3643_v41 = vpop.f32.mrf.mxu0 }
0x10f1   :  { %3869 = vpow2.f32 %v3444_v27 }
0x10f2   :  { %3871 = vpow2.f32 %v3445_v50 }
0x10fe   :  { %v3870_v52 = vpop.eup %3869 }
0x10ff   :  { %v3872_v56 = vpop.eup %3871  ;;  %v1525_v28 = vadd.f32 1.0, %v3870_v52 }
0x1100   :  { %v1558_v57 = vadd.f32 1.0, %v3872_v56 }
0x1101   :  { %3873 = vrcp.f32 %v1525_v28 }
0x1102   :  { %3875 = vrcp.f32 %v1558_v57 }
0x110e   :  { %v3874_v59 = vpop.eup %3873 }
0x110f   :  { %v3876_v60 = vpop.eup %3875  ;;  %v1546_v6 = vsub.f32 1.0, %v3874_v59  ;;  %v1552_v11 = vmul.f32 %v3874_v59, %v4414_v55 }
0x1110   :  { %v1568_v4 = vsub.f32 1.0, %v3876_v60  ;;  %v1574_v7 = vmul.f32 %v3876_v60, %v4412_v14 }
0x1161   :  { %v1537_v43 = vpop.permute.xlu0 %1536 }
0x1162   :  { %v1539_v61 = vmul.f32 %v3874_v59, %v1537_v43  ;;  %v1561_v62 = vmul.f32 %v3876_v60, %v1537_v43 }
0x1164   :  { %1563 = vrot.lane.b32.xlu0 %v1561_v62, %s3980_s3  ;;  %1541 = vrot.lane.b32.xlu1 %v1539_v61, %s3980_s3 }
0x11d6   :  { %v1564_v40 = vpop.permute.xlu0 %1563  ;;  %v1542_v63 = vpop.permute.xlu1 %1541 }
0x11d7   :  { %v1566_v0 = vadd.f32 %v1564_v40, %v4259_v58  ;;  %v1544_v1 = vadd.f32 %v1542_v63, %v4163_v42  ;;  %v4465_v63 = vld [vmem:[%s4958_s8 + $0x8] sm:$0xff]  }
0x11d8   :  { %3653 = vmatpush3.bf16.msra.mxu0 %v4465_v63 }
0x11d9   :  { %3877 = vtanh.f32 %v1566_v0  ;;  %v4471_v0 = vld [vmem:[%s4958_s8] sm:$0xff]   ;;  %3654 = vmatprep.subr.bf16.mxu0 %v3976_v20 }
0x11da   :  { %3879 = vtanh.f32 %v1544_v1 }
0x11dc   :  { %3655 = vmatpush3.bf16.msra.mxu0 %v4471_v0 }
0x11dd   :  { %3668 = vmatprep.subr.bf16.mxu0 %v3976_v20 }
0x11e6   :  { %v3878_v2 = vpop.eup %3877 }
0x11e7   :  { %v3880_v3 = vpop.eup %3879  ;;  %1570 = vrot.lane.b32.xlu0 %v3878_v2, %s3981_s30 }
0x11e8   :  { %1548 = vrot.lane.b32.xlu1 %v3880_v3, %s3981_s30 }
0x1259   :  { %v1571_v5 = vpop.permute.xlu0 %1570 }
0x125a   :  { %v1573_v8 = vmul.f32 %v1571_v5, %v1568_v4  ;;  %v1549_v9 = vpop.permute.xlu1 %1548 }
0x125b   :  { %v1551_v58 = vmul.f32 %v1549_v9, %v1546_v6 }
0x125c   :  { %v4439_v12 = vadd.f32 %v1574_v7, %v1573_v8 }
0x125d   :  { %v4441_v42 = vadd.f32 %v1552_v11, %v1551_v58 }
0x125e   :  { %v1642_v13 = vrot.slane %v4439_v12, %v4116_v19 }
0x125f   :  { %v1632_v54 = vrot.slane %v4441_v42, %v4116_v19 }
0x1260   :  { %1643 = vrot.lane.b32.xlu0 %v1642_v13, %s3982_s0 }
0x1261   :  { %1633 = vrot.lane.b32.xlu1 %v1632_v54, %s3981_s30 }
0x12d2   :  { %v1644_v15 = vpop.permute.xlu0 %1643 }
0x12d3   :  { %v1634_v49 = vpop.permute.xlu1 %1633 }
0x12d4   :  { %v1646_v23 = vsel %vm120_vm0, %v1634_v49, %v1644_v15 }
0x12d5   :  { %v1647_v24 = vpack.c.bf16 %v1646_v23, %v1646_v23 }
0x12d7   :  { %3649 = vmatmul.mubr.msk.bf16.vlgmr.msra.gmra.mxu1 %vm455_vm2, %v1647_v24  ;;  %v4505_v24 = vld [vmem:[%s4959_s9] ss:$0 sm:$0xff] }
0x12d8   :  { %3664 = vmatprep.mubr.msk.bf16.mxu1 %vm3977_vm1, %v3976_v20  ;;  %3661 = vmatpush3.bf16.msra.mxu1 %v4465_v63 }
0x12d9   :  { %3662 = vmatprep.subr.bf16.mxu1 %v3976_v20 }
0x12dc   :  { %3663 = vmatpush3.bf16.msra.mxu1 %v4471_v0 }
0x12dd   :  { %3676 = vmatprep.subr.bf16.mxu1 %v3976_v20 }
0x1397   :  { %v1685_v29 = vpop.f32.mrf.mxu1 }
0x1398   :  { %v1686_v30 = vadd.f32 %v4150_v32, %v1685_v29 }
0x1399   :  { %v3650_v31 = vpop.f32.mrf.mxu1 }
0x139a   :  { %v1705_v33 = vrot.slane %v1686_v30, %v4116_v19  ;;  %v1691_v38 = vadd.f32 %v1686_v30, %v4169_v44  ;;  %v1724_v41 = vadd.f32 %v1686_v30, %v4173_v45 }
0x139b   :  { %v1688_v34 = vpop.f32.mrf.mxu1 }
0x139c   :  { %1706 = vrot.lane.b32.xlu1 %v1705_v33, %s3979_s24  ;;  %v3447_v47 = vmul.f32 -1.442695, %v1691_v38  ;;  %v3448_v48 = vmul.f32 -1.442695, %v1724_v41  ;;  %v4512_v38 = vadd.f32 %v4239_v39, %v4252_v51 }
0x139d   :  { %v3651_v37 = vpop.f32.mrf.mxu1 }
0x139e   :  { %3881 = vpow2.f32 %v3447_v47  ;;  %v391_v41 = vrot.slane %v4512_v38, %v4116_v19 }
0x139f   :  { %3883 = vpow2.f32 %v3448_v48 }
0x13ab   :  { %v3882_v27 = vpop.eup %3881 }
0x13ac   :  { %v3884_v50 = vpop.eup %3883  ;;  %v1695_v52 = vadd.f32 1.0, %v3882_v27 }
0x13ad   :  { %v1728_v56 = vadd.f32 1.0, %v3884_v50 }
0x13ae   :  { %3885 = vrcp.f32 %v1695_v52 }
0x13af   :  { %3887 = vrcp.f32 %v1728_v56 }
0x13bb   :  { %v3886_v32 = vpop.eup %3885 }
0x13bc   :  { %v3888_v28 = vpop.eup %3887  ;;  %v1716_v3 = vsub.f32 1.0, %v3886_v32  ;;  %v1722_v7 = vmul.f32 %v3886_v32, %v4441_v42 }
0x13bd   :  { %v1738_v1 = vsub.f32 1.0, %v3888_v28  ;;  %v1744_v4 = vmul.f32 %v3888_v28, %v4439_v12 }
0x140e   :  { %v1707_v57 = vpop.permute.xlu1 %1706 }
0x140f   :  { %v1709_v59 = vmul.f32 %v3886_v32, %v1707_v57  ;;  %v1731_v60 = vmul.f32 %v3888_v28, %v1707_v57 }
0x1411   :  { %1733 = vrot.lane.b32.xlu1 %v1731_v60, %s3980_s3  ;;  %1711 = vrot.lane.b32.xlu0 %v1709_v59, %s3980_s3 }
0x1483   :  { %v1734_v43 = vpop.permute.xlu1 %1733  ;;  %v1712_v61 = vpop.permute.xlu0 %1711 }
0x1484   :  { %v1736_v62 = vadd.f32 %v1734_v43, %v4173_v45  ;;  %v1714_v40 = vadd.f32 %v1712_v61, %v4169_v44 }
0x1486   :  { %3889 = vtanh.f32 %v1736_v62 }
0x1487   :  { %3891 = vtanh.f32 %v1714_v40 }
0x1493   :  { %v3890_v44 = vpop.eup %3889 }
0x1494   :  { %v3892_v45 = vpop.eup %3891  ;;  %1740 = vrot.lane.b32.xlu1 %v3890_v44, %s3981_s30 }
0x1495   :  { %1718 = vrot.lane.b32.xlu0 %v3892_v45, %s3981_s30 }
0x1506   :  { %v1741_v2 = vpop.permute.xlu1 %1740 }
0x1507   :  { %v1743_v5 = vmul.f32 %v1741_v2, %v1738_v1  ;;  %v1719_v6 = vpop.permute.xlu0 %1718 }
0x1508   :  { %v1721_v8 = vmul.f32 %v1719_v6, %v1716_v3 }
0x1509   :  { %v4484_v9 = vadd.f32 %v1744_v4, %v1743_v5 }
0x150a   :  { %v4486_v11 = vadd.f32 %v1722_v7, %v1721_v8  ;;  %v399_v7 = vcombine.high %v391_v41, %v391_v41 }
0x150b   :  { %v1812_v58 = vrot.slane %v4484_v9, %v4116_v19 }
0x150c   :  { %v1802_v13 = vrot.slane %v4486_v11, %v4116_v19 }
0x150d   :  { %1813 = vrot.lane.b32.xlu1 %v1812_v58, %s3982_s0 }
0x150e   :  { %1803 = vrot.lane.b32.xlu0 %v1802_v13, %s3981_s30 }
0x157f   :  { %v1814_v54 = vpop.permute.xlu1 %1813 }
0x1580   :  { %v1804_v15 = vpop.permute.xlu0 %1803 }
0x1581   :  { %v1816_v49 = vsel %vm120_vm0, %v1804_v15, %v1814_v54 }
0x1582   :  { %v1817_v23 = vpack.c.bf16 %v1816_v49, %v1816_v49  ;;  %v1917_v28 = vrot.slane %v1816_v49, %v4116_v19 }
0x1584   :  { %3657 = vmatmul.mubr.msk.bf16.vlgmr.msra.gmra.mxu0 %vm455_vm2, %v1817_v23 }
0x1585   :  { %3669 = vmatpush3.bf16.msra.mxu0 %v4465_v63  ;;  %3672 = vmatprep.mubr.msk.bf16.mxu0 %vm3977_vm1, %v3976_v20 }
0x1586   :  { %3670 = vmatprep.subr.bf16.mxu0 %v3976_v20 }
0x1589   :  { %3671 = vmatpush3.bf16.msra.mxu0 %v4471_v0 }
0x158a   :  { %3684 = vmatprep.subr.bf16.mxu0 %v3976_v20 }
0x1644   :  { %v1873_v29 = vpop.f32.mrf.mxu0 }
0x1645   :  { %v1874_v30 = vadd.f32 %v4505_v24, %v1873_v29 }
0x1646   :  { %v3658_v31 = vpop.f32.mrf.mxu0 }
0x1647   :  { %v1893_v33 = vrot.slane %v1874_v30, %v4116_v19  ;;  %v1879_v47 = vadd.f32 %v1874_v30, %v391_v41 }
0x1648   :  { %v1876_v34 = vpop.f32.mrf.mxu0 }
0x1649   :  { %1894 = vrot.lane.b32.xlu0 %v1893_v33, %s3983_s4  ;;  %v3453_v48 = vmul.f32 -1.442695, %v1879_v47 }
0x164a   :  { %v3659_v37 = vpop.f32.mrf.mxu0 }
0x164b   :  { %3893 = vpow2.f32 %v3453_v48 }
0x1658   :  { %v3894_v27 = vpop.eup %3893 }
0x1659   :  { %v1883_v50 = vadd.f32 1.0, %v3894_v27 }
0x165b   :  { %3895 = vrcp.f32 %v1883_v50 }
0x1668   :  { %v3896_v52 = vpop.eup %3895 }
0x1669   :  { %v1904_v60 = vsub.f32 1.0, %v3896_v52 }
0x16bb   :  { %v1895_v56 = vpop.permute.xlu0 %1894 }
0x16bc   :  { %v1897_v32 = vmul.f32 %v3896_v52, %v1895_v56 }
0x16be   :  { %1899 = vrot.lane.b32.xlu1 %v1897_v32, %s3983_s4 }
0x16c2   :  { %1918 = vrot.lane.b32.xlu1 %v1917_v28, %s3980_s3 }
0x1730   :  { %v1900_v39 = vpop.permute.xlu1 %1899 }
0x1731   :  { %v1902_v51 = vadd.f32 %v1900_v39, %v391_v41 }
0x1733   :  { %3897 = vtanh.f32 %v1902_v51  ;;  %v384_v51 = vcombine.high %v4512_v38, %v4512_v38 }
0x1734   :  { %v1919_v59 = vpop.permute.xlu1 %1918 }
0x1735   :  { %v1921_v61 = vmul.f32 %v3896_v52, %v1919_v59 }
0x1740   :  { %v3898_v57 = vpop.eup %3897 }
0x1741   :  { %1906 = vrot.lane.b32.xlu0 %v3898_v57, %s3979_s24  ;;  %v398_v57 = vrot.slane %v384_v51, %v4116_v19 }
0x17b3   :  { %v1907_v43 = vpop.permute.xlu0 %1906 }
0x17b4   :  { %v1909_v62 = vmul.f32 %v1907_v43, %v1904_v60 }
0x17b6   :  { %v4520_v40 = vadd.f32 %v1921_v61, %v1909_v62 }
0x17b8   :  { %v1949_v44 = vpack.c.bf16 %v4520_v40, %v4520_v40 }
0x17ba   :  { %1951 = vrot.lane.b32.xlu0 %v1949_v44, %s3979_s24 }
0x182c   :  { %v1952_v45 = vpop.permute.xlu0 %1951 }
0x182d   :  { %3665 = vmatmul.mubr.msk.bf16.vlgmr.msra.gmra.mxu1 %vm455_vm2, %v1952_v45 }
0x182e   :  { %3677 = vmatpush3.bf16.msra.mxu1 %v4465_v63  ;;  %3680 = vmatprep.mubr.msk.bf16.mxu1 %vm3977_vm1, %v3976_v20 }
0x182f   :  { %3678 = vmatprep.subr.bf16.mxu1 %v3976_v20 }
0x1832   :  { %3679 = vmatpush3.bf16.msra.mxu1 %v4471_v0 }
0x1833   :  { %3692 = vmatprep.subr.bf16.mxu1 %v3976_v20 }
0x18ed   :  { %v1990_v1 = vpop.f32.mrf.mxu1 }
0x18ee   :  { %v1991_v2 = vadd.f32 %v4505_v24, %v1990_v1 }
0x18ef   :  { %v3666_v3 = vpop.f32.mrf.mxu1 }
0x18f0   :  { %v2010_v4 = vrot.slane %v1991_v2, %v4116_v19  ;;  %v1996_v8 = vadd.f32 %v1991_v2, %v399_v7 }
0x18f1   :  { %v1993_v5 = vpop.f32.mrf.mxu1 }
0x18f2   :  { %2011 = vrot.lane.b32.xlu1 %v2010_v4, %s3983_s4  ;;  %v3455_v58 = vmul.f32 -1.442695, %v1996_v8 }
0x18f3   :  { %v3667_v6 = vpop.f32.mrf.mxu1 }
0x18f4   :  { %3899 = vpow2.f32 %v3455_v58 }
0x1901   :  { %v3900_v13 = vpop.eup %3899 }
0x1902   :  { %v2000_v54 = vadd.f32 1.0, %v3900_v13 }
0x1904   :  { %3901 = vrcp.f32 %v2000_v54 }
0x1911   :  { %v3902_v15 = vpop.eup %3901 }
0x1912   :  { %v2021_v33 = vsub.f32 1.0, %v3902_v15  ;;  %v2027_v37 = vmul.f32 %v3902_v15, %v4520_v40 }
0x1964   :  { %v2012_v49 = vpop.permute.xlu1 %2011 }
0x1965   :  { %v2014_v23 = vmul.f32 %v3902_v15, %v2012_v49 }
0x1967   :  { %2016 = vrot.lane.b32.xlu0 %v2014_v23, %s3983_s4 }
0x19d9   :  { %v2017_v29 = vpop.permute.xlu0 %2016 }
0x19da   :  { %v2019_v30 = vadd.f32 %v2017_v29, %v399_v7 }
0x19dc   :  { %3903 = vtanh.f32 %v2019_v30  ;;  %v400_v30 = vcombine.high %v398_v57, %v398_v57 }
0x19e9   :  { %v3904_v31 = vpop.eup %3903 }
0x19ea   :  { %2023 = vrot.lane.b32.xlu1 %v3904_v31, %s3979_s24 }
0x1a5c   :  { %v2024_v34 = vpop.permute.xlu1 %2023 }
0x1a5d   :  { %v2026_v41 = vmul.f32 %v2024_v34, %v2021_v33 }
0x1a5f   :  { %v4538_v47 = vadd.f32 %v2027_v37, %v2026_v41 }
0x1a61   :  { %v2054_v48 = vpack.c.bf16 %v4538_v47, %v4538_v47 }
0x1a63   :  { %2056 = vrot.lane.b32.xlu0 %v2054_v48, %s3979_s24 }
0x1ad5   :  { %v2057_v27 = vpop.permute.xlu0 %2056 }
0x1ad6   :  { %3673 = vmatmul.mubr.msk.bf16.vlgmr.msra.gmra.mxu0 %vm455_vm2, %v2057_v27 }
0x1ad7   :  { %3685 = vmatpush3.bf16.msra.mxu0 %v4465_v63  ;;  %3688 = vmatprep.mubr.msk.bf16.mxu0 %vm3977_vm1, %v3976_v20 }
0x1ad8   :  { %3686 = vmatprep.subr.bf16.mxu0 %v3976_v20 }
0x1adb   :  { %3687 = vmatpush3.bf16.msra.mxu0 %v4471_v0 }
0x1adc   :  { %3700 = vmatprep.subr.bf16.mxu0 %v3976_v20 }
0x1b96   :  { %v2095_v50 = vpop.f32.mrf.mxu0 }
0x1b97   :  { %v2096_v52 = vadd.f32 %v4505_v24, %v2095_v50 }
0x1b98   :  { %v3674_v56 = vpop.f32.mrf.mxu0 }
0x1b99   :  { %v2115_v32 = vrot.slane %v2096_v52, %v4116_v19  ;;  %v2101_v59 = vadd.f32 %v2096_v52, %v398_v57 }
0x1b9a   :  { %v2098_v28 = vpop.f32.mrf.mxu0 }
0x1b9b   :  { %2116 = vrot.lane.b32.xlu1 %v2115_v32, %s3983_s4  ;;  %v3457_v60 = vmul.f32 -1.442695, %v2101_v59 }
0x1b9c   :  { %v3675_v39 = vpop.f32.mrf.mxu0 }
0x1b9d   :  { %3905 = vpow2.f32 %v3457_v60 }
0x1baa   :  { %v3906_v43 = vpop.eup %3905 }
0x1bab   :  { %v2105_v61 = vadd.f32 1.0, %v3906_v43 }
0x1bad   :  { %3907 = vrcp.f32 %v2105_v61 }
0x1bba   :  { %v3908_v62 = vpop.eup %3907 }
0x1bbb   :  { %v2126_v38 = vsub.f32 1.0, %v3908_v62  ;;  %v2132_v5 = vmul.f32 %v3908_v62, %v4538_v47 }
0x1c0d   :  { %v2117_v44 = vpop.permute.xlu1 %2116 }
0x1c0e   :  { %v2119_v45 = vmul.f32 %v3908_v62, %v2117_v44 }
0x1c10   :  { %2121 = vrot.lane.b32.xlu0 %v2119_v45, %s3983_s4 }
0x1c82   :  { %v2122_v1 = vpop.permute.xlu0 %2121 }
0x1c83   :  { %v2124_v2 = vadd.f32 %v2122_v1, %v398_v57 }
0x1c85   :  { %3909 = vtanh.f32 %v2124_v2  ;;  %v408_v2 = vrot.slane %v4242_v46, %v4116_v19 }
0x1c92   :  { %v3910_v3 = vpop.eup %3909 }
0x1c93   :  { %2128 = vrot.lane.b32.xlu1 %v3910_v3, %s3979_s24 }
0x1d05   :  { %v2129_v4 = vpop.permute.xlu1 %2128 }
0x1d06   :  { %v2131_v6 = vmul.f32 %v2129_v4, %v2126_v38 }
0x1d08   :  { %v4559_v7 = vadd.f32 %v2132_v5, %v2131_v6 }
0x1d0a   :  { %v2159_v8 = vpack.c.bf16 %v4559_v7, %v4559_v7 }
0x1d0c   :  { %2161 = vrot.lane.b32.xlu0 %v2159_v8, %s3979_s24 }
0x1d7e   :  { %v2162_v58 = vpop.permute.xlu0 %2161 }
0x1d7f   :  { %3681 = vmatmul.mubr.msk.bf16.vlgmr.msra.gmra.mxu1 %vm455_vm2, %v2162_v58 }
0x1d80   :  { %3693 = vmatpush3.bf16.msra.mxu1 %v4465_v63  ;;  %3696 = vmatprep.mubr.msk.bf16.mxu1 %vm3977_vm1, %v3976_v20 }
0x1d81   :  { %3694 = vmatprep.subr.bf16.mxu1 %v3976_v20 }
0x1d84   :  { %3695 = vmatpush3.bf16.msra.mxu1 %v4471_v0 }
0x1d85   :  { %3708 = vmatprep.subr.bf16.mxu1 %v3976_v20 }
0x1e3f   :  { %v2200_v13 = vpop.f32.mrf.mxu1 }
0x1e40   :  { %v2201_v54 = vadd.f32 %v4505_v24, %v2200_v13 }
0x1e41   :  { %v3682_v15 = vpop.f32.mrf.mxu1 }
0x1e42   :  { %v2220_v49 = vrot.slane %v2201_v54, %v4116_v19  ;;  %v2206_v31 = vadd.f32 %v2201_v54, %v400_v30 }
0x1e43   :  { %v2203_v23 = vpop.f32.mrf.mxu1 }
0x1e44   :  { %2221 = vrot.lane.b32.xlu1 %v2220_v49, %s3983_s4  ;;  %v3459_v33 = vmul.f32 -1.442695, %v2206_v31 }
0x1e45   :  { %v3683_v29 = vpop.f32.mrf.mxu1 }
0x1e46   :  { %3911 = vpow2.f32 %v3459_v33 }
0x1e53   :  { %v3912_v34 = vpop.eup %3911 }
0x1e54   :  { %v2210_v37 = vadd.f32 1.0, %v3912_v34 }
0x1e56   :  { %3913 = vrcp.f32 %v2210_v37 }
0x1e63   :  { %v3914_v41 = vpop.eup %3913 }
0x1e64   :  { %v2231_v32 = vsub.f32 1.0, %v3914_v41  ;;  %v2237_v39 = vmul.f32 %v3914_v41, %v4559_v7 }
0x1eb6   :  { %v2222_v48 = vpop.permute.xlu1 %2221 }
0x1eb7   :  { %v2224_v27 = vmul.f32 %v3914_v41, %v2222_v48 }
0x1eb9   :  { %2226 = vrot.lane.b32.xlu0 %v2224_v27, %s3983_s4 }
0x1f2b   :  { %v2227_v50 = vpop.permute.xlu0 %2226 }
0x1f2c   :  { %v2229_v52 = vadd.f32 %v2227_v50, %v400_v30 }
0x1f2e   :  { %3915 = vtanh.f32 %v2229_v52 }
0x1f3b   :  { %v3916_v56 = vpop.eup %3915 }
0x1f3c   :  { %2233 = vrot.lane.b32.xlu1 %v3916_v56, %s3979_s24  ;;  %v416_v56 = vcombine.high %v408_v2, %v408_v2 }
0x1fae   :  { %v2234_v28 = vpop.permute.xlu1 %2233 }
0x1faf   :  { %v2236_v51 = vmul.f32 %v2234_v28, %v2231_v32 }
0x1fb1   :  { %v4577_v57 = vadd.f32 %v2237_v39, %v2236_v51 }
0x1fb3   :  { %v2264_v59 = vpack.c.bf16 %v4577_v57, %v4577_v57 }
0x1fb5   :  { %2266 = vrot.lane.b32.xlu0 %v2264_v59, %s3979_s24 }
0x2027   :  { %v2267_v60 = vpop.permute.xlu0 %2266 }
0x2028   :  { %3689 = vmatmul.mubr.msk.bf16.vlgmr.msra.gmra.mxu0 %vm455_vm2, %v2267_v60 }
0x2029   :  { %3701 = vmatpush3.bf16.msra.mxu0 %v4465_v63  ;;  %3704 = vmatprep.mubr.msk.bf16.mxu0 %vm3977_vm1, %v3976_v20 }
0x202a   :  { %3702 = vmatprep.subr.bf16.mxu0 %v3976_v20 }
0x202d   :  { %3703 = vmatpush3.bf16.msra.mxu0 %v4471_v0 }
0x20e8   :  { %v2305_v43 = vpop.f32.mrf.mxu0 }
0x20e9   :  { %v2306_v61 = vadd.f32 %v4505_v24, %v2305_v43 }
0x20ea   :  { %v3690_v62 = vpop.f32.mrf.mxu0 }
0x20eb   :  { %v2325_v44 = vrot.slane %v2306_v61, %v4116_v19  ;;  %v2311_v3 = vadd.f32 %v2306_v61, %v408_v2 }
0x20ec   :  { %v2308_v45 = vpop.f32.mrf.mxu0 }
0x20ed   :  { %2326 = vrot.lane.b32.xlu1 %v2325_v44, %s3983_s4  ;;  %v3461_v38 = vmul.f32 -1.442695, %v2311_v3 }
0x20ee   :  { %v3691_v1 = vpop.f32.mrf.mxu0 }
0x20ef   :  { %3917 = vpow2.f32 %v3461_v38 }
0x20fc   :  { %v3918_v4 = vpop.eup %3917 }
0x20fd   :  { %v2315_v5 = vadd.f32 1.0, %v3918_v4 }
0x20ff   :  { %3919 = vrcp.f32 %v2315_v5 }
0x210c   :  { %v3920_v6 = vpop.eup %3919 }
0x210d   :  { %v2336_v49 = vsub.f32 1.0, %v3920_v6  ;;  %v2342_v29 = vmul.f32 %v3920_v6, %v4577_v57 }
0x215f   :  { %v2327_v8 = vpop.permute.xlu1 %2326 }
0x2160   :  { %v2329_v58 = vmul.f32 %v3920_v6, %v2327_v8 }
0x2162   :  { %2331 = vrot.lane.b32.xlu0 %v2329_v58, %s3983_s4 }
0x21d4   :  { %v2332_v13 = vpop.permute.xlu0 %2331 }
0x21d5   :  { %v2334_v54 = vadd.f32 %v2332_v13, %v408_v2 }
0x21d7   :  { %3921 = vtanh.f32 %v2334_v54  ;;  %v401_v54 = vcombine.high %v4242_v46, %v4242_v46 }
0x21e4   :  { %v3922_v15 = vpop.eup %3921 }
0x21e5   :  { %2338 = vrot.lane.b32.xlu1 %v3922_v15, %s3979_s24  ;;  %v415_v15 = vrot.slane %v401_v54, %v4116_v19 }
0x2257   :  { %v2339_v23 = vpop.permute.xlu1 %2338 }
0x2258   :  { %v2341_v30 = vmul.f32 %v2339_v23, %v2336_v49 }
0x225a   :  { %v4596_v31 = vadd.f32 %v2342_v29, %v2341_v30 }
0x225c   :  { %v2369_v33 = vpack.c.bf16 %v4596_v31, %v4596_v31 }
0x225e   :  { %2371 = vrot.lane.b32.xlu0 %v2369_v33, %s3979_s24 }
0x22d0   :  { %v2372_v34 = vpop.permute.xlu0 %2371 }
0x22d1   :  { %3697 = vmatmul.mubr.msk.bf16.vlgmr.msra.gmra.mxu1 %vm455_vm2, %v2372_v34 }
0x22d2   :  { %3709 = vmatpush3.bf16.msra.mxu1 %v4465_v63  ;;  %3712 = vmatprep.mubr.msk.bf16.mxu1 %vm3977_vm1, %v3976_v20 }
0x22d3   :  { %3710 = vmatprep.subr.bf16.mxu1 %v3976_v20 }
0x22d6   :  { %3711 = vmatpush3.bf16.msra.mxu1 %v4471_v0 }
0x2391   :  { %v2410_v37 = vpop.f32.mrf.mxu1 }
0x2392   :  { %v2411_v41 = vadd.f32 %v4505_v24, %v2410_v37 }
0x2393   :  { %v3698_v48 = vpop.f32.mrf.mxu1 }
0x2394   :  { %v2430_v27 = vrot.slane %v2411_v41, %v4116_v19  ;;  %v2416_v32 = vadd.f32 %v2411_v41, %v416_v56 }
0x2395   :  { %v2413_v50 = vpop.f32.mrf.mxu1 }
0x2396   :  { %2431 = vrot.lane.b32.xlu1 %v2430_v27, %s3983_s4  ;;  %v3463_v63 = vmul.f32 -1.442695, %v2416_v32 }
0x2397   :  { %v3699_v52 = vpop.f32.mrf.mxu1 }
0x2398   :  { %3923 = vpow2.f32 %v3463_v63 }
0x23a5   :  { %v3924_v28 = vpop.eup %3923 }
0x23a6   :  { %v2420_v39 = vadd.f32 1.0, %v3924_v28 }
0x23a8   :  { %3925 = vrcp.f32 %v2420_v39  ;;  %v3984_v39 = vmov 1966171168  }
0x23b5   :  { %v3926_v51 = vpop.eup %3925 }
0x23b6   :  { %v2441_v62 = vsub.f32 1.0, %v3926_v51  ;;  %v2447_v45 = vmul.f32 %v3926_v51, %v4596_v31 }
0x2408   :  { %v2432_v59 = vpop.permute.xlu1 %2431 }
0x2409   :  { %v2434_v0 = vmul.f32 %v3926_v51, %v2432_v59  ;;  %v556_v51 = vunpack.c.l.s4 %v3984_v39 }
0x240b   :  { %2436 = vrot.lane.b32.xlu0 %v2434_v0, %s3983_s4  ;;  %v557_v59 = vunpack.c.0.s8 %v556_v51 }
0x240d   :  { %v4635_v0 = vsub.s32 %v557_v59, %v4101_v10 }
0x247d   :  { %v2437_v60 = vpop.permute.xlu0 %2436 }
0x247e   :  { %v2439_v43 = vadd.f32 %v2437_v60, %v416_v56 }
0x2480   :  { %3927 = vtanh.f32 %v2439_v43 }
0x248d   :  { %v3928_v61 = vpop.eup %3927 }
0x248e   :  { %2443 = vrot.lane.b32.xlu1 %v3928_v61, %s3979_s24 }
0x2500   :  { %v2444_v44 = vpop.permute.xlu1 %2443 }
0x2501   :  { %v2446_v1 = vmul.f32 %v2444_v44, %v2441_v62  ;;  %v4639_v62 = vsub.s32 0, %v4101_v10  ;;  %v928_v10 = vrot.slane %v4315_v21, %v4635_v0 }
0x2503   :  { %v4613_v2 = vadd.f32 %v2447_v45, %v2446_v1  ;;  %v587_v45 = vrot.slane %v4226_v35, %v4635_v0  ;;  %v4656_v35 = vrot.slane %v4350_v17, %v4635_v0  ;;  %v929_v21 = vcombine.high %v928_v10, %v928_v10 }
0x2505   :  { %v2474_v3 = vpack.c.bf16 %v4613_v2, %v4613_v2  ;;  %v937_v17 = vrot.slane %v929_v21, %v4639_v62  ;;  %v1930_v21 = vrot.slane %v4520_v40, %v4635_v0 }
0x2507   :  { %2476 = vrot.lane.b32.xlu0 %v2474_v3, %s3979_s24 }
0x2579   :  { %v2477_v38 = vpop.permute.xlu0 %2476 }
0x257a   :  { %3705 = vmatmul.mubr.msk.bf16.vlgmr.msra.gmra.mxu0 %vm455_vm2, %v2477_v38  ;;  %v592_v38 = vrot.slane %v587_v45, %v4639_v62 }
0x263a   :  { %v2515_v4 = vpop.f32.mrf.mxu0 }
0x263b   :  { %v2516_v5 = vadd.f32 %v4505_v24, %v2515_v4  ;;  %v758_v4 = vrot.slane %v4271_v25, %v4635_v0  ;;  %v1103_v25 = vrot.slane %v4656_v35, %v4639_v62 }
0x263c   :  { %v3706_v6 = vpop.f32.mrf.mxu0 }
0x263d   :  { %v2535_v8 = vrot.slane %v2516_v5, %v4116_v19  ;;  %v2521_v49 = vadd.f32 %v2516_v5, %v415_v15  ;;  %v588_v5 = vcombine.high %v587_v45, %v587_v45  ;;  %v1243_v45 = vrot.slane %v4383_v53, %v4635_v0 }
0x263e   :  { %v2518_v58 = vpop.f32.mrf.mxu0  ;;  %v1753_v53 = vrot.slane %v4486_v11, %v4635_v0 }
0x263f   :  { %2536 = vrot.lane.b32.xlu1 %v2535_v8, %s3983_s4  ;;  %v3465_v23 = vmul.f32 -1.442695, %v2521_v49  ;;  %v596_v6 = vrot.slane %v588_v5, %v4639_v62  ;;  %v759_v8 = vcombine.high %v758_v4, %v758_v4 }
0x2640   :  { %v3707_v13 = vpop.f32.mrf.mxu0  ;;  %v1754_v11 = vcombine.high %v1753_v53, %v1753_v53 }
0x2641   :  { %3929 = vpow2.f32 %v3465_v23  ;;  %v767_v58 = vrot.slane %v759_v8, %v4639_v62  ;;  %v4668_v13 = vcombine.high %v415_v15, %v415_v15 }
0x264e   :  { %v3930_v29 = vpop.eup %3929 }
0x264f   :  { %v2525_v30 = vadd.f32 1.0, %v3930_v29 }
0x2651   :  { %3931 = vrcp.f32 %v2525_v30 }
0x265e   :  { %v3932_v33 = vpop.eup %3931 }
0x265f   :  { %v2546_v46 = vsub.f32 1.0, %v3932_v33  ;;  %v2552_v52 = vmul.f32 %v3932_v33, %v4613_v2 }
0x26b1   :  { %v2537_v34 = vpop.permute.xlu1 %2536 }
0x26b2   :  { %v2539_v37 = vmul.f32 %v3932_v33, %v2537_v34 }
0x26b4   :  { %2541 = vrot.lane.b32.xlu0 %v2539_v37, %s3983_s4  ;;  %v561_v37 = vrot.slane %v4228_v36, %v4635_v0  ;;  %v903_v36 = vrot.slane %v4317_v22, %v4635_v0 }
0x2726   :  { %v2542_v41 = vpop.permute.xlu0 %2541 }
0x2727   :  { %v2544_v48 = vadd.f32 %v2542_v41, %v415_v15  ;;  %v566_v41 = vrot.slane %v561_v37, %v4639_v62 }
0x2729   :  { %3933 = vtanh.f32 %v2544_v48  ;;  %v733_v48 = vrot.slane %v4273_v26, %v4635_v0  ;;  %v1073_v26 = vrot.slane %v4352_v18, %v4635_v0  ;;  %v904_v18 = vcombine.high %v903_v36, %v903_v36 }
0x272b   :  { %v734_v39 = vcombine.high %v733_v48, %v733_v48 }
0x2736   :  { %v3934_v27 = vpop.eup %3933 }
0x2737   :  { %2548 = vrot.lane.b32.xlu1 %v3934_v27, %s3979_s24 }
0x27a9   :  { %v2549_v50 = vpop.permute.xlu1 %2548 }
0x27aa   :  { %v2551_v56 = vmul.f32 %v2549_v50, %v2546_v46  ;;  %v738_v46 = vrot.slane %v733_v48, %v4639_v62 }
0x27ac   :  { %v4628_v32 = vadd.f32 %v2552_v52, %v2551_v56  ;;  %v908_v52 = vrot.slane %v903_v36, %v4639_v62 }
0x27ae   :  { %v2579_v63 = vpack.c.bf16 %v4628_v32, %v4628_v32  ;;  %v2561_v40 = vrot.slane %v4628_v32, %v4635_v0 }
0x27b0   :  { %2581 = vrot.lane.b32.xlu0 %v2579_v63, %s3979_s24  ;;  %v1078_v63 = vrot.slane %v1073_v26, %v4639_v62 }
0x2822   :  { %v2582_v28 = vpop.permute.xlu0 %2581 }
0x2823   :  { %3713 = vmatmul.mubr.msk.bf16.vlgmr.msra.gmra.mxu1 %vm455_vm2, %v2582_v28  ;;  %v562_v28 = vcombine.high %v561_v37, %v561_v37 }
0x2825   :  { %v570_v51 = vrot.slane %v562_v28, %v4639_v62 }
0x28e3   :  { %v2620_v60 = vpop.f32.mrf.mxu1 }
0x28e4   :  { %v2621_v43 = vadd.f32 %v4505_v24, %v2620_v60  ;;  %v763_v24 = vrot.slane %v758_v4, %v4639_v62  ;;  %v742_v60 = vrot.slane %v734_v39, %v4639_v62  ;;  %v1583_v4 = vrot.slane %v4441_v42, %v4635_v0 }
0x28e5   :  { %v3714_v61 = vpop.f32.mrf.mxu1 }
0x28e6   :  { %v2640_v44 = vrot.slane %v2621_v43, %v4116_v19  ;;  %v933_v19 = vrot.slane %v928_v10, %v4639_v62  ;;  %v2626_v54 = vadd.f32 %v2621_v43, %v4668_v13  ;;  %v1074_v61 = vcombine.high %v1073_v26, %v1073_v26 }
0x28e7   :  { %v2623_v1 = vpop.f32.mrf.mxu1  ;;  %v1588_v10 = vrot.slane %v1583_v4, %v4639_v62 }
0x28e8   :  { %2641 = vrot.lane.b32.xlu1 %v2640_v44, %s3983_s4  ;;  %v3467_v49 = vmul.f32 -1.442695, %v2626_v54  ;;  %v912_v44 = vrot.slane %v904_v18, %v4639_v62  ;;  %v1082_v1 = vrot.slane %v1074_v61, %v4639_v62  ;;  %v1935_v54 = vrot.slane %v1930_v21, %v4639_v62 }
0x28e9   :  { %v3715_v3 = vpop.f32.mrf.mxu1 }
0x28ea   :  { %3935 = vpow2.f32 %v3467_v49  ;;  %v1413_v3 = vrot.slane %v4414_v55, %v4635_v0  ;;  %v1758_v55 = vrot.slane %v1753_v53, %v4639_v62  ;;  %v2351_v49 = vrot.slane %v4596_v31, %v4635_v0 }
0x28ec   :  { %597 = vrot.lane.b32.xlu1 %v592_v38, %s3982_s0  ;;  %v1248_v38 = vrot.slane %v1243_v45, %v4639_v62  ;;  %v1414_v5 = vcombine.high %v1413_v3, %v1413_v3  ;;  %v2352_v31 = vcombine.high %v2351_v49, %v2351_v49 }
0x28ee   :  { %v1422_v42 = vrot.slane %v1414_v5, %v4639_v62  ;;  %v2360_v48 = vrot.slane %v2352_v31, %v4639_v62 }
0x28f0   :  { %768 = vrot.lane.b32.xlu1 %v763_v24, %s3982_s0  ;;  %v1418_v24 = vrot.slane %v1413_v3, %v4639_v62 }
0x28f4   :  { %938 = vrot.lane.b32.xlu1 %v933_v19, %s3982_s0  ;;  %v1244_v19 = vcombine.high %v1243_v45, %v1243_v45 }
0x28f7   :  { %v3936_v23 = vpop.eup %3935 }
0x28f8   :  { %1108 = vrot.lane.b32.xlu1 %v1103_v25, %s3982_s0  ;;  %v2630_v29 = vadd.f32 1.0, %v3936_v23  ;;  %v1252_v25 = vrot.slane %v1244_v19, %v4639_v62  ;;  %v2688_v19 = vld [vmem:[%s4960_s10] sm:$0xff] }
0x28fa   :  { %3937 = vrcp.f32 %v2630_v29  ;;  %v2356_v29 = vrot.slane %v2351_v49, %v4639_v62 }
0x28fc   :  { %599 = vrot.lane.b32.xlu1 %v596_v6, %s3982_s0  ;;  %v1584_v6 = vcombine.high %v1583_v4, %v1583_v4  ;;  %v2690_v4 = vld [vmem:[%s4960_s10 + $0x10] sm:$0xff] }
0x28fe   :  { %v1592_v8 = vrot.slane %v1584_v6, %v4639_v62  ;;  %v2036_v6 = vrot.slane %v4538_v47, %v4635_v0 }
0x2900   :  { %770 = vrot.lane.b32.xlu1 %v767_v58, %s3982_s0  ;;  %v1762_v58 = vrot.slane %v1754_v11, %v4639_v62 }
0x2904   :  { %940 = vrot.lane.b32.xlu1 %v937_v17, %s3982_s0  ;;  %v2141_v17 = vrot.slane %v4559_v7, %v4635_v0  ;;  %v2566_v7 = vrot.slane %v2561_v40, %v4639_v62 }
0x2906   :  { %v2146_v23 = vrot.slane %v2141_v17, %v4639_v62 }
0x2907   :  { %v4671_v30 = vpop.eup %3937 }
0x295a   :  { %v2642_v33 = vpop.permute.xlu1 %2641 }
0x295b   :  { %v2644_v34 = vmul.f32 %v4671_v30, %v2642_v33  ;;  %v1931_v33 = vcombine.high %v1930_v21, %v1930_v21  ;;  %v2246_v21 = vrot.slane %v4577_v57, %v4635_v0 }
0x295d   :  { %2646 = vrot.lane.b32.xlu0 %v2644_v34, %s3983_s4  ;;  %v2142_v34 = vcombine.high %v2141_v17, %v2141_v17  ;;  %v1939_v37 = vrot.slane %v1931_v33, %v4639_v62  ;;  %v2251_v47 = vrot.slane %v2246_v21, %v4639_v62 }
0x295e   :  { %v598_v15 = vpop.permute.xlu1 %597 }
0x295f   :  { %604 = vst.msk [vmem:[#allocation2 + $0x7] sm:$0x1] %vm603_vm3, %v598_v15  ;;  %v2150_v15 = vrot.slane %v2142_v34, %v4639_v62 }
0x2961   :  { %571 = vrot.lane.b32.xlu0 %v566_v41, %s3981_s30  ;;  %v2562_v41 = vcombine.high %v2561_v40, %v2561_v40 }
0x2962   :  { %v769_v27 = vpop.permute.xlu1 %768 }
0x2963   :  { %774 = vst.msk [vmem:[#allocation2 + $0x6] sm:$0x1] %vm603_vm3, %v769_v27  ;;  %v2570_v27 = vrot.slane %v2562_v41, %v4639_v62 }
0x2965   :  { %743 = vrot.lane.b32.xlu0 %v738_v46, %s3981_s30 }
0x2966   :  { %v939_v50 = vpop.permute.xlu1 %938 }
0x2967   :  { %944 = vst.msk [vmem:[#allocation2 + $0x5] sm:$0x1] %vm603_vm3, %v939_v50 }
0x2969   :  { %913 = vrot.lane.b32.xlu0 %v908_v52, %s3981_s30 }
0x296a   :  { %v1109_v56 = vpop.permute.xlu1 %1108 }
0x296b   :  { %1114 = vst.msk [vmem:[#allocation2 + $0x4] sm:$0x1] %vm603_vm3, %v1109_v56  ;;  %v1099_v56 = vcombine.high %v4656_v35, %v4656_v35 }
0x296d   :  { %1083 = vrot.lane.b32.xlu0 %v1078_v63, %s3981_s30 }
0x296e   :  { %v600_v22 = vpop.permute.xlu1 %599 }
0x296f   :  { %605 = vst.msk [vmem:[#allocation2 + $0xf] sm:$0x1] %vm603_vm3, %v600_v22  ;;  %v1107_v22 = vrot.slane %v1099_v56, %v4639_v62  ;;  %v2782_v56 = vld [vmem:[%s4962_s12 + $0x10] sm:$0xff] }
0x2971   :  { %573 = vrot.lane.b32.xlu0 %v570_v51, %s3981_s30  ;;  %v1438_v51 = vrot.slane %v4412_v14, %v4635_v0  ;;  %v1778_v14 = vrot.slane %v4484_v9, %v4635_v0  ;;  %v2691_v9 = vld [vmem:[%s4960_s10 + $0x18] sm:$0xff] }
0x2972   :  { %v771_v59 = vpop.permute.xlu1 %770  ;;  %3716 = vmatprep.subr.mxu0 %v2691_v9 }
0x2973   :  { %775 = vst.msk [vmem:[#allocation2 + $0xe] sm:$0x1] %vm603_vm3, %v771_v59  ;;  %v1443_v18 = vrot.slane %v1438_v51, %v4639_v62  ;;  %v1439_v3 = vcombine.high %v1438_v51, %v1438_v51  ;;  %3717 = vmatpush3.msra.mxu0 %v2691_v9  ;;  %v2780_v51 = vld [vmem:[%s4962_s12] sm:$0xff] }
0x2974   :  { %3718 = vmatprep.subr.mxu0 %v2690_v4 }
0x2975   :  { %745 = vrot.lane.b32.xlu0 %v742_v60, %s3981_s30  ;;  %v1447_v53 = vrot.slane %v1439_v3, %v4639_v62  ;;  %3719 = vmatpush3.msra.mxu0 %v2690_v4 }
0x2976   :  { %v941_v43 = vpop.permute.xlu1 %940 }
0x2977   :  { %945 = vst.msk [vmem:[#allocation2 + $0xd] sm:$0x1] %vm603_vm3, %v941_v43 }
0x2979   :  { %915 = vrot.lane.b32.xlu0 %v912_v44, %s3981_s30  ;;  %v1783_v44 = vrot.slane %v1778_v14, %v4639_v62 }
0x297d   :  { %1085 = vrot.lane.b32.xlu0 %v1082_v1, %s3981_s30 }
0x2981   :  { %1253 = vrot.lane.b32.xlu0 %v1248_v38, %s3981_s30 }
0x2985   :  { %1423 = vrot.lane.b32.xlu0 %v1418_v24, %s3981_s30 }
0x2989   :  { %1593 = vrot.lane.b32.xlu0 %v1588_v10, %s3981_s30  ;;  %v2689_v10 = vld [vmem:[%s4960_s10 + $0x8] sm:$0xff] }
0x298a   :  { %3720 = vmatprep.subr.mxu0 %v2689_v10 }
0x298b   :  { %3721 = vmatpush3.msra.mxu0 %v2689_v10 }
0x298c   :  { %3722 = vmatprep.subr.mxu0 %v2688_v19 }
0x298d   :  { %1763 = vrot.lane.b32.xlu0 %v1758_v55, %s3981_s30  ;;  %3723 = vmatpush3.msra.mxu0 %v2688_v19  ;;  %v3468_v19 = vld [vmem:[%s4961_s11] ss:$0 sm:$0xff] }
0x298e   :  { %3738 = vmatprep.subr.mxu0 %v3976_v20 }
0x2991   :  { %1255 = vrot.lane.b32.xlu0 %v1252_v25, %s3981_s30  ;;  %v1779_v25 = vcombine.high %v1778_v14, %v1778_v14 }
0x2993   :  { %v1787_v11 = vrot.slane %v1779_v25, %v4639_v62 }
0x2995   :  { %1425 = vrot.lane.b32.xlu0 %v1422_v42, %s3981_s30 }
0x2999   :  { %1595 = vrot.lane.b32.xlu0 %v1592_v8, %s3981_s30 }
0x299d   :  { %1765 = vrot.lane.b32.xlu0 %v1762_v58, %s3981_s30  ;;  %v2041_v58 = vrot.slane %v2036_v6, %v4639_v62 }
0x29a1   :  { %1940 = vrot.lane.b32.xlu0 %v1935_v54, %s3979_s24  ;;  %v2456_v54 = vrot.slane %v4613_v2, %v4635_v0 }
0x29a3   :  { %v2461_v57 = vrot.slane %v2456_v54, %v4639_v62 }
0x29a5   :  { %2151 = vrot.lane.b32.xlu0 %v2146_v23, %s3979_s24  ;;  %v2037_v23 = vcombine.high %v2036_v6, %v2036_v6 }
0x29a7   :  { %v2045_v33 = vrot.slane %v2037_v23, %v4639_v62 }
0x29a9   :  { %2361 = vrot.lane.b32.xlu0 %v2356_v29, %s3979_s24  ;;  %v2247_v29 = vcombine.high %v2246_v21, %v2246_v21 }
0x29ab   :  { %v2255_v34 = vrot.slane %v2247_v29, %v4639_v62 }
0x29ad   :  { %2571 = vrot.lane.b32.xlu0 %v2566_v7, %s3979_s24  ;;  %v2457_v7 = vcombine.high %v2456_v54, %v2456_v54 }
0x29af   :  { %v2465_v31 = vrot.slane %v2457_v7, %v4639_v62 }
0x29b1   :  { %1942 = vrot.lane.b32.xlu0 %v1939_v37, %s3979_s24 }
0x29b5   :  { %2153 = vrot.lane.b32.xlu0 %v2150_v15, %s3979_s24 }
0x29b9   :  { %2363 = vrot.lane.b32.xlu0 %v2360_v48, %s3979_s24 }
0x29bd   :  { %2573 = vrot.lane.b32.xlu0 %v2570_v27, %s3979_s24 }
0x29cf   :  { %v2647_v46 = vpop.permute.xlu0 %2646 }
0x29d0   :  { %v2649_v36 = vadd.f32 %v2647_v46, %v4668_v13  ;;  %v1268_v13 = vrot.slane %v4381_v16, %v4635_v0  ;;  %v1608_v16 = vrot.slane %v4439_v12, %v4635_v0 }
0x29d2   :  { %3939 = vtanh.f32 %v2649_v36  ;;  %v1273_v35 = vrot.slane %v1268_v13, %v4639_v62  ;;  %v1613_v43 = vrot.slane %v1608_v16, %v4639_v62  ;;  %v1269_v12 = vcombine.high %v1268_v13, %v1268_v13 }
0x29d3   :  { %v572_v50 = vpop.permute.xlu0 %571  ;;  %v1609_v24 = vcombine.high %v1608_v16, %v1608_v16 }
0x29d4   :  { %578 = vst.msk [vmem:[#allocation2] sm:$0x1] %vm577_vm4, %v572_v50  ;;  %v1277_v1 = vrot.slane %v1269_v12, %v4639_v62  ;;  %v2783_v50 = vld [vmem:[%s4962_s12 + $0x18] sm:$0xff] }
0x29d5   :  { %v1617_v5 = vrot.slane %v1609_v24, %v4639_v62  ;;  %3727 = vmatprep.subr.mxu1 %v2783_v50 }
0x29d6   :  { %3728 = vmatpush3.msra.mxu1 %v2783_v50 }
0x29d7   :  { %v744_v52 = vpop.permute.xlu0 %743  ;;  %3729 = vmatprep.subr.mxu1 %v2782_v56 }
0x29d8   :  { %749 = vst.msk [vmem:[#allocation2 + $0x1] sm:$0x1] %vm577_vm4, %v744_v52  ;;  %v2651_v52 = vsub.f32 1.0, %v4671_v30  ;;  %3730 = vmatpush3.msra.mxu1 %v2782_v56 }
0x29db   :  { %v914_v26 = vpop.permute.xlu0 %913 }
0x29dc   :  { %919 = vst.msk [vmem:[#allocation2 + $0x2] sm:$0x1] %vm577_vm4, %v914_v26 }
0x29df   :  { %v3940_v63 = vpop.eup %3939  ;;  %v1084_v28 = vpop.permute.xlu0 %1083 }
0x29e0   :  { %1089 = vst.msk [vmem:[#allocation2 + $0x3] sm:$0x1] %vm577_vm4, %v1084_v28  ;;  %2653 = vrot.lane.b32.xlu1 %v3940_v63, %s3979_s24  ;;  %v2781_v63 = vld [vmem:[%s4962_s12 + $0x8] sm:$0xff]  ;;  %v2657_v28 = vmul.f32 %v4671_v30, %v4628_v32 }
0x29e1   :  { %3731 = vmatprep.subr.mxu1 %v2781_v63 }
0x29e2   :  { %3732 = vmatpush3.msra.mxu1 %v2781_v63 }
0x29e3   :  { %v574_v39 = vpop.permute.xlu0 %573  ;;  %3733 = vmatprep.subr.mxu1 %v2780_v51 }
0x29e4   :  { %579 = vst.msk [vmem:[#allocation2 + $0x8] sm:$0x1] %vm577_vm4, %v574_v39  ;;  %1110 = vrot.lane.b32.xlu1 %v1107_v22, %s3982_s0  ;;  %3734 = vmatpush3.msra.mxu1 %v2780_v51  ;;  %v3203_v51 = vld [vmem:[%s4964_s14] sm:$0xff] }
0x29e5   :  { %3743 = vmatprep.subr.mxu1 %v3976_v20 }
0x29e7   :  { %v746_v59 = vpop.permute.xlu0 %745 }
0x29e8   :  { %750 = vst.msk [vmem:[#allocation2 + $0x9] sm:$0x1] %vm577_vm4, %v746_v59  ;;  %1278 = vrot.lane.b32.xlu1 %v1273_v35, %s3982_s0 }
0x29eb   :  { %v916_v60 = vpop.permute.xlu0 %915 }
0x29ec   :  { %920 = vst.msk [vmem:[#allocation2 + $0xa] sm:$0x1] %vm577_vm4, %v916_v60  ;;  %1448 = vrot.lane.b32.xlu1 %v1443_v18, %s3982_s0 }
0x29ef   :  { %v1086_v61 = vpop.permute.xlu0 %1085 }
0x29f0   :  { %1090 = vst.msk [vmem:[#allocation2 + $0xb] sm:$0x1] %vm577_vm4, %v1086_v61  ;;  %1618 = vrot.lane.b32.xlu1 %v1613_v43, %s3982_s0 }
0x29f3   :  { %v1254_v45 = vpop.permute.xlu0 %1253 }
0x29f4   :  { %1259 = vst.msk [vmem:[#allocation2 + $0x4] sm:$0x1] %vm577_vm4, %v1254_v45  ;;  %1788 = vrot.lane.b32.xlu1 %v1783_v44, %s3982_s0 }
0x29f7   :  { %v1424_v38 = vpop.permute.xlu0 %1423 }
0x29f8   :  { %1429 = vst.msk [vmem:[#allocation2 + $0x5] sm:$0x1] %vm577_vm4, %v1424_v38  ;;  %1280 = vrot.lane.b32.xlu1 %v1277_v1, %s3982_s0 }
0x29fb   :  { %v1594_v55 = vpop.permute.xlu0 %1593 }
0x29fc   :  { %1599 = vst.msk [vmem:[#allocation2 + $0x6] sm:$0x1] %vm577_vm4, %v1594_v55  ;;  %1450 = vrot.lane.b32.xlu1 %v1447_v53, %s3982_s0 }
0x29ff   :  { %v1764_v42 = vpop.permute.xlu0 %1763 }
0x2a00   :  { %1769 = vst.msk [vmem:[#allocation2 + $0x7] sm:$0x1] %vm577_vm4, %v1764_v42  ;;  %1620 = vrot.lane.b32.xlu1 %v1617_v5, %s3982_s0 }
0x2a03   :  { %v1256_v8 = vpop.permute.xlu0 %1255 }
0x2a04   :  { %1790 = vrot.lane.b32.xlu1 %v1787_v11, %s3982_s0  ;;  %v3473_v11 = vld [vmem:[%s4963_s13] ss:$0 sm:$0xff]  ;;  %s3985_s0 = smov [#allocation4]  }
0x2a05   :  { %s3406_s19 = sshll.u32 %s3985_s0, 4  ;;  %s3407_s19 = int_to_ptr.vmem [resolvable:$true] %s3406_s19 }
0x2a06   :  { %p3958_p1 = scmp.lt.s32.totalorder %s3407_s19, %s3407_s19 }
0x2a07   :  { %v1426_v17 = vpop.permute.xlu0 %1425 }
0x2a08   :  { %1430 = vst.msk [vmem:[#allocation2 + $0xd] sm:$0x1] %vm577_vm4, %v1426_v17  ;;  %2046 = vrot.lane.b32.xlu1 %v2041_v58, %s3979_s24 }
0x2a0b   :  { %v1596_v49 = vpop.permute.xlu0 %1595 }
0x2a0c   :  { %1600 = vst.msk [vmem:[#allocation2 + $0xe] sm:$0x1] %vm577_vm4, %v1596_v49  ;;  %2256 = vrot.lane.b32.xlu1 %v2251_v47, %s3979_s24 }
0x2a0f   :  { %v1766_v40 = vpop.permute.xlu0 %1765 }
0x2a10   :  { %1770 = vst.msk [vmem:[#allocation2 + $0xf] sm:$0x1] %vm577_vm4, %v1766_v40  ;;  %2466 = vrot.lane.b32.xlu1 %v2461_v57, %s3979_s24 }
0x2a13   :  { %v1941_v2 = vpop.permute.xlu0 %1940 }
0x2a14   :  { %1947 = vst.msk [vmem:[#allocation3] sm:$0x1] %vm1946_vm5, %v1941_v2  ;;  %2048 = vrot.lane.b32.xlu1 %v2045_v33, %s3979_s24 }
0x2a17   :  { %v2152_v37 = vpop.permute.xlu0 %2151 }
0x2a18   :  { %2157 = vst.msk [vmem:[#allocation3 + $0x2] sm:$0x1] %vm1946_vm5, %v2152_v37  ;;  %2258 = vrot.lane.b32.xlu1 %v2255_v34, %s3979_s24 }
0x2a1b   :  { %v2362_v15 = vpop.permute.xlu0 %2361 }
0x2a1c   :  { %2367 = vst.msk [vmem:[#allocation3 + $0x4] sm:$0x1] %vm1946_vm5, %v2362_v15  ;;  %2468 = vrot.lane.b32.xlu1 %v2465_v31, %s3979_s24 }
0x2a1f   :  { %v2572_v41 = vpop.permute.xlu0 %2571 }
0x2a20   :  { %2577 = vst.msk [vmem:[#allocation3 + $0x6] sm:$0x1] %vm1946_vm5, %v2572_v41 }
0x2a23   :  { %v1943_v48 = vpop.permute.xlu0 %1942 }
0x2a24   :  { %1948 = vst.msk [vmem:[#allocation3 + $0x8] sm:$0x1] %vm1946_vm5, %v1943_v48 }
0x2a27   :  { %v2154_v27 = vpop.permute.xlu0 %2153 }
0x2a28   :  { %2158 = vst.msk [vmem:[#allocation3 + $0xa] sm:$0x1] %vm1946_vm5, %v2154_v27 }
0x2a2b   :  { %v2364_v46 = vpop.permute.xlu0 %2363 }
0x2a2c   :  { %2368 = vst.msk [vmem:[#allocation3 + $0xc] sm:$0x1] %vm1946_vm5, %v2364_v46 }
0x2a2f   :  { %v2574_v36 = vpop.permute.xlu0 %2573 }
0x2a30   :  { %2578 = vst.msk [vmem:[#allocation3 + $0xe] sm:$0x1] %vm1946_vm5, %v2574_v36  ;;  %v3206_v36 = vld [vmem:[%s4964_s14 + $0x18] sm:$0xff] }
0x2a52   :  { %v2654_v26 = vpop.permute.xlu1 %2653 }
0x2a53   :  { %v2656_v13 = vmul.f32 %v2654_v26, %v2651_v52 }
0x2a55   :  { %v2658_v22 = vadd.f32 %v2657_v28, %v2656_v13 }
0x2a56   :  { %v1111_v39 = vpop.permute.xlu1 %1110 }
0x2a57   :  { %v2666_v35 = vrot.slane %v2658_v22, %v4635_v0  ;;  %1115 = vst.msk [vmem:[#allocation2 + $0xc] sm:$0x1] %vm603_vm3, %v1111_v39  ;;  %v3205_v22 = vld [vmem:[%s4964_s14 + $0x10] sm:$0xff]  ;;  %v3204_v39 = vld [vmem:[%s4964_s14 + $0x8] sm:$0xff] }
0x2a58   :  { %1260 = vst.msk [vmem:[#allocation2 + $0xc] sm:$0x1] %vm577_vm4, %v1256_v8 }
0x2a59   :  { %v2667_v32 = vcombine.high %v2666_v35, %v2666_v35  ;;  %v2671_v30 = vrot.slane %v2666_v35, %v4639_v62 }
0x2a5a   :  { %v1279_v59 = vpop.permute.xlu1 %1278 }
0x2a5b   :  { %1284 = vst.msk [vmem:[#allocation2 + $0x3] sm:$0x1] %vm603_vm3, %v1279_v59  ;;  %2676 = vrot.lane.b32.xlu1 %v2671_v30, %s3979_s24  ;;  %v2675_v16 = vrot.slane %v2667_v32, %v4639_v62 }
0x2a5e   :  { %v1449_v18 = vpop.permute.xlu1 %1448 }
0x2a5f   :  { %1454 = vst.msk [vmem:[#allocation2 + $0x2] sm:$0x1] %vm603_vm3, %v1449_v18  ;;  %2678 = vrot.lane.b32.xlu1 %v2675_v16, %s3979_s24  ;;  %v3310_v16 = vld [vmem:[%s4966_s16 + $0x18] sm:$0xff]  ;;  %v3309_v18 = vld [vmem:[%s4966_s16 + $0x10] sm:$0xff] }
0x2a62   :  { %v1619_v0 = vpop.permute.xlu1 %1618 }
0x2a63   :  { %1624 = vst.msk [vmem:[#allocation2 + $0x1] sm:$0x1] %vm603_vm3, %v1619_v0  ;;  %v3308_v0 = vld [vmem:[%s4966_s16 + $0x8] sm:$0xff] }
0x2a66   :  { %v1789_v60 = vpop.permute.xlu1 %1788 }
0x2a67   :  { %1794 = vst.msk [vmem:[#allocation2] sm:$0x1] %vm603_vm3, %v1789_v60  ;;  %v3307_v60 = vld [vmem:[%s4966_s16] sm:$0xff] }
0x2a6a   :  { %v1281_v14 = vpop.permute.xlu1 %1280 }
0x2a6b   :  { %1285 = vst.msk [vmem:[#allocation2 + $0xb] sm:$0x1] %vm603_vm3, %v1281_v14 }
0x2a6e   :  { %v1451_v43 = vpop.permute.xlu1 %1450  ;;  %v2684_v61 = vld [vmem:[#allocation2] sm:$0xff] }
0x2a6f   :  { %1455 = vst.msk [vmem:[#allocation2 + $0xa] sm:$0x1] %vm603_vm3, %v1451_v43  ;;  %3724 = vmatprep.mubr.msk.f32.mxu0 %vm455_vm2, %v2684_v61 }
0x2a72   :  { %v1621_v62 = vpop.permute.xlu1 %1620 }
0x2a73   :  { %1625 = vst.msk [vmem:[#allocation2 + $0x9] sm:$0x1] %vm603_vm3, %v1621_v62 }
0x2a76   :  { %v1791_v44 = vpop.permute.xlu1 %1790 }
0x2a77   :  { %1795 = vst.msk [vmem:[#allocation2 + $0x8] sm:$0x1] %vm603_vm3, %v1791_v44  ;;  %v3482_v44 = vld [vmem:[%s4965_s15] ss:$0 sm:$0xff]  ;;  %s3953_s15 = scalar_lea.vmem %s3407_s19, 256 }
0x2a78   :  { %p3954_p0 = scmp.ne.s32.totalorder %s3407_s19, %s3953_s15  ;;  %p3959_p2 = scmp.lt.s32.totalorder %s3953_s15, %s3953_s15 }
0x2a7a   :  { %v2047_v12 = vpop.permute.xlu1 %2046  ;;  %p3960_p3 = por %p3959_p2, %p3958_p1 }
0x2a7b   :  { %2052 = vst.msk [vmem:[#allocation3 + $0x1] sm:$0x1] %vm1946_vm5, %v2047_v12 }
0x2a7c   :  { %p3961_p4 = pnand %p3960_p3, %p3954_p0 }
0x2a7e   :  { %v2257_v45 = vpop.permute.xlu1 %2256  ;;  %v2685_v1 = vld [vmem:[#allocation2 + $0x8] sm:$0xff] }
0x2a7f   :  { %2262 = vst.msk [vmem:[#allocation3 + $0x3] sm:$0x1] %vm1946_vm5, %v2257_v45  ;;  %3725 = vmatmul.mubr.msk.f32.vlgmr.msra.gmra.mxu0 %vm455_vm2, %v2685_v1 }
0x2a80   :  { %3740 = vmatprep.mubr.msk.f32.mxu0 %vm3977_vm1, %v3976_v20 }
0x2a82   :  { %v2467_v3 = vpop.permute.xlu1 %2466 }
0x2a83   :  { %2472 = vst.msk [vmem:[#allocation3 + $0x5] sm:$0x1] %vm1946_vm5, %v2467_v3 }
0x2a86   :  { %v2049_v9 = vpop.permute.xlu1 %2048 }
0x2a87   :  { %2053 = vst.msk [vmem:[#allocation3 + $0x9] sm:$0x1] %vm1946_vm5, %v2049_v9 }
0x2a8a   :  { %v2259_v38 = vpop.permute.xlu1 %2258 }
0x2a8b   :  { %2263 = vst.msk [vmem:[#allocation3 + $0xb] sm:$0x1] %vm1946_vm5, %v2259_v38 }
0x2a8e   :  { %v2469_v4 = vpop.permute.xlu1 %2468 }
0x2a8f   :  { %2473 = vst.msk [vmem:[#allocation3 + $0xd] sm:$0x1] %vm1946_vm5, %v2469_v4  ;;  %v3483_v4 = vld [vmem:[%s4967_s17] ss:$0 sm:$0xff] }
0x2acd   :  { %v2677_v24 = vpop.permute.xlu1 %2676 }
0x2ace   :  { %2682 = vst.msk [vmem:[#allocation3 + $0x7] sm:$0x1] %vm1946_vm5, %v2677_v24 }
0x2ad1   :  { %v2679_v53 = vpop.permute.xlu1 %2678 }
0x2ad2   :  { %2683 = vst.msk [vmem:[#allocation3 + $0xf] sm:$0x1] %vm1946_vm5, %v2679_v53 }
0x2ad5   :  { %v2686_v10 = vld [vmem:[#allocation3] sm:$0xff] }
0x2ad6   :  { %3735 = vmatprep.mubr.msk.f32.mxu1 %vm455_vm2, %v2686_v10 }
0x2ad9   :  { %v2687_v55 = vld [vmem:[#allocation3 + $0x8] sm:$0xff] }
0x2ada   :  { %3736 = vmatmul.mubr.msk.f32.vlgmr.msra.gmra.mxu1 %vm455_vm2, %v2687_v55 }
0x2adb   :  { %3745 = vmatprep.mubr.msk.f32.mxu1 %vm3977_vm1, %v3976_v20 }
0x2b3f   :  { %v3726_v25 = vpop.f32.mrf.mxu0 }
0x2b40   :  { %v2777_v5 = vadd.f32 %v3726_v25, %v3468_v19 }
0x2b41   :  { %v2771_v42 = vpop.f32.mrf.mxu0 }
0x2b42   :  { %v2772_v6 = vadd.f32 %v3468_v19, %v2771_v42  ;;  %3744 = vmatpush3.xpose.msk.msra.mxu1 %vm455_vm2, %v2777_v5 }
0x2b43   :  { %3753 = vmatprep.subr.mxu1 %v3976_v20 }
0x2b44   :  { %3739 = vmatpush3.xpose.msk.msra.mxu0 %vm455_vm2, %v2772_v6 }
0x2b45   :  { %3748 = vmatprep.subr.mxu0 %v3976_v20 }
0x2b9a   :  { %v3737_v8 = vpop.f32.mrf.mxu1 }
0x2b9b   :  { %v2873_v21 = vadd.f32 %v3737_v8, %v3473_v11 }
0x2b9c   :  { %v2856_v58 = vpop.f32.mrf.mxu1 }
0x2b9d   :  { %v2872_v17 = vadd.f32 %v3473_v11, %v2856_v58  ;;  %3746 = vmatmul.mubr.msk.f32.vlgmr.msra.gmra.mxu1 %vm455_vm2, %v2873_v21 }
0x2b9e   :  { %3755 = vmatprep.mubr.msk.f32.mxu1 %vm3977_vm1, %v3976_v20 }
0x2b9f   :  { %3741 = vmatmul.mubr.msk.f32.vlgmr.msra.gmra.mxu0 %vm455_vm2, %v2872_v17 }
0x2ba0   :  { %3750 = vmatprep.mubr.msk.f32.mxu0 %vm3977_vm1, %v3976_v20 }
0x2c5d   :  { %v3022_v54 = vpop.f32.mrf.mxu1 }
0x2c5e   :  { %v3027_v47 = vmul.f32 0.17677669, %v3022_v54 }
0x2c5f   :  { %v2946_v49 = vpop.f32.mrf.mxu0  ;;  %v3747_v23 = vpop.f32.mrf.mxu1 }
0x2c60   :  { %v3026_v57 = vmul.f32 0.17677669, %v2946_v49  ;;  %v3032_v40 = vsel %vm3028_vm6, %v3027_v47, -inf }
0x2c61   :  { %3033 = vmax.xlane.f32.xlu1 %v3032_v40  ;;  %v3742_v29 = vpop.f32.mrf.mxu0 }
0x2c62   :  { %v3029_v33 = vsel %vm3028_vm6, %v3026_v57, -inf }
0x2c63   :  { %3030 = vmax.xlane.f32.xlu0 %v3029_v33 }
0x2c72   :  { %3051 = vrot.lane.b32.xlu1 %v2772_v6, %s3979_s24 }
0x2c76   :  { %3209 = vrot.lane.b32.xlu1 %v2856_v58, %s3979_s24 }
0x2c7a   :  { %3211 = vrot.lane.b32.xlu1 %v3737_v8, %s3979_s24 }
0x2cea   :  { %v3034_v20 = vpop.xlane.xlu1 %3033 }
0x2ceb   :  { %v3036_v2 = vsub.f32 %v3027_v47, %v3034_v20 }
0x2cec   :  { %v3031_v7 = vpop.xlane.xlu0 %3030 }
0x2ced   :  { %v3039_v34 = vmul.f32 1.442695, %v3036_v2  ;;  %v3035_v37 = vsub.f32 %v3026_v57, %v3031_v7 }
0x2cee   :  { %v3052_v31 = vpop.permute.xlu1 %3051 }
0x2cef   :  { %3941 = vpow2.f32 %v3039_v34  ;;  %v3037_v15 = vmul.f32 1.442695, %v3035_v37  ;;  %3749 = vmatpush3.msra.mxu0 %v3052_v31 }
0x2cf0   :  { %3758 = vmatprep.subr.mxu0 %v3206_v36 }
0x2cf1   :  { %3943 = vpow2.f32 %v3037_v15 }
0x2cf2   :  { %v3210_v14 = vpop.permute.xlu1 %3209 }
0x2cf6   :  { %v3212_v43 = vpop.permute.xlu1 %3211 }
0x2cfc   :  { %v3942_v41 = vpop.eup %3941 }
0x2cfd   :  { %v3044_v48 = vsel %vm3028_vm6, %v3942_v41, 0.0 }
0x2cfe   :  { %v3944_v27 = vpop.eup %3943  ;;  %3045 = vadd.xlane.f32.xlu0 %v3044_v48 }
0x2cff   :  { %v3041_v46 = vsel %vm3028_vm6, %v3944_v27, 0.0 }
0x2d02   :  { %3042 = vadd.xlane.f32.xlu0 %v3041_v46 }
0x2d18   :  { %3127 = vrot.lane.b32.xlu0 %v2777_v5, %s3979_s24 }
0x2d87   :  { %v3046_v50 = vpop.xlane.xlu0 %3045 }
0x2d88   :  { %3945 = vrcp.f32 %v3046_v50 }
0x2d8b   :  { %v3043_v52 = vpop.xlane.xlu0 %3042 }
0x2d8c   :  { %3947 = vrcp.f32 %v3043_v52 }
0x2d8f   :  { %v3128_v26 = vpop.permute.xlu0 %3127 }
0x2d90   :  { %3754 = vmatpush3.msra.mxu1 %v3128_v26 }
0x2d91   :  { %3769 = vmatprep.subr.mxu1 %v3310_v16 }
0x2d95   :  { %v3946_v56 = vpop.eup %3945 }
0x2d96   :  { %v3050_v63 = vmul.f32 %v3946_v56, %v3942_v41 }
0x2d98   :  { %3756 = vmatmul.mubr.msk.f32.vlgmr.msra.gmra.mxu1 %vm3028_vm6, %v3050_v63 }
0x2d99   :  { %v3948_v28 = vpop.eup %3947  ;;  %3770 = vmatpush3.msra.mxu1 %v3310_v16 }
0x2d9a   :  { %v3048_v13 = vmul.f32 %v3948_v28, %v3944_v27  ;;  %3771 = vmatprep.subr.mxu1 %v3309_v18 }
0x2d9b   :  { %3772 = vmatpush3.msra.mxu1 %v3309_v18 }
0x2d9c   :  { %3751 = vmatmul.mubr.msk.f32.vlgmr.msra.gmra.mxu0 %vm3028_vm6, %v3048_v13  ;;  %3773 = vmatprep.subr.mxu1 %v3308_v0 }
0x2d9d   :  { %3759 = vmatpush3.msra.mxu0 %v3206_v36  ;;  %3774 = vmatpush3.msra.mxu1 %v3308_v0 }
0x2d9e   :  { %3760 = vmatprep.subr.mxu0 %v3205_v22  ;;  %3775 = vmatprep.subr.mxu1 %v3307_v60 }
0x2d9f   :  { %3761 = vmatpush3.msra.mxu0 %v3205_v22  ;;  %3776 = vmatpush3.msra.mxu1 %v3307_v60 }
0x2da0   :  { %3762 = vmatprep.subr.mxu0 %v3204_v39 }
0x2da1   :  { %3763 = vmatpush3.msra.mxu0 %v3204_v39 }
0x2da2   :  { %3764 = vmatprep.subr.mxu0 %v3203_v51 }
0x2da3   :  { %3765 = vmatpush3.msra.mxu0 %v3203_v51 }
0x2e58   :  { %v3199_v35 = vpop.f32.mrf.mxu1 }
0x2e5a   :  { %v3757_v32 = vpop.f32.mrf.mxu1 }
0x2e5c   :  { %v3123_v30 = vpop.f32.mrf.mxu0 }
0x2e5d   :  { %3766 = vmatprep.mubr.msk.f32.mxu0 %vm455_vm2, %v3123_v30 }
0x2e5e   :  { %v3752_v59 = vpop.f32.mrf.mxu0  ;;  %3767 = vmatmul.mubr.msk.f32.vlgmr.msra.gmra.mxu0 %vm455_vm2, %v3199_v35 }
0x2f1e   :  { %v3768_v61 = vpop.f32.mrf.mxu0 }
0x2f1f   :  { %v3293_v62 = vadd.f32 %v3768_v61, %v3212_v43 }
0x2f20   :  { %v3287_v12 = vpop.f32.mrf.mxu0 }
0x2f21   :  { %v3288_v45 = vadd.f32 %v3287_v12, %v3210_v14  ;;  %v3304_v1 = vadd.f32 %v3482_v44, %v3293_v62 }
0x2f23   :  { %v3303_v3 = vadd.f32 %v3482_v44, %v3288_v45 }
0x2f25   :  { %3949 = vtanh.f32 %v3303_v3 }
0x2f26   :  { %3951 = vtanh.f32 %v3304_v1 }
0x2f32   :  { %v3950_v9 = vpop.eup %3949 }
0x2f33   :  { %v3952_v38 = vpop.eup %3951  ;;  %3777 = vmatprep.mubr.msk.f32.mxu1 %vm455_vm2, %v3950_v9 }
0x2f34   :  { %3778 = vmatmul.mubr.msk.f32.vlgmr.msra.gmra.mxu1 %vm455_vm2, %v3952_v38 }
0x2ff4   :  { %v3779_v24 = vpop.f32.mrf.mxu1 }
0x2ff5   :  { %v3396_v53 = vadd.f32 %v3779_v24, %v3483_v4 }
0x2ff6   :  { %v3390_v10 = vpop.f32.mrf.mxu1 }
0x2ff7   :  { %3400 = vst.msk [vmem:[#allocation4 + $0x8] sm:$0xff] %vm455_vm2, %v3396_v53  ;;  %v3391_v55 = vadd.f32 %v3483_v4, %v3390_v10 }
0x2ff9   :  { %3399 = vst.msk [vmem:[#allocation4] sm:$0xff] %vm455_vm2, %v3391_v55 }
0x2ffa   :  { %3964 = shalt.err (!%p3961_p4)
}
0x2ffb   :  { %s3986_s1 = smov 128   ;;  %s3987_s17 = smov 8  }
0x2ffc   :  { %3412 = dma.vmem_to_hbm [thread:$0]  %s3407_s19, 256, %s4968_s18, [#allocation5], %s3986_s1, %s3986_s1, %s3987_s17  }
0x2ffd   :  { %3973 = dma.done.wait [#allocation5], 256  }
0x2ffe   :  { %3974 = vsyncadd [#allocation5], 4294967040 }
0x2fff   :  { %3416 = vsyncpa [#allocation5], 1 }

</bundles_post_ra>
